<compile_context>
chip_gen: v7x
topology: tpu7x:2x2x1
jax: 0.10.0
libtpu: 0.0.40
codegen_flags: <defaults>
</compile_context>

<pallas_src>
import functools

import jax
import jax.numpy as jnp
from jax.experimental import pallas as pl
from jax.experimental.pallas import tpu as pltpu

LANE = 128


def _round_up(x, m):
    return (x + m - 1) // m * m


def mlp_kernel(x_ref, w1_ref, b1_ref, w2_ref, b2_ref, o_ref):
    # One batch tile per grid step; both matmuls + bias + ReLU fused in VMEM.
    # x arrives in its native dtype; cast on the VPU (free, kernel is DMA bound).
    x = x_ref[...].astype(w1_ref.dtype)
    # Layer 1: MXU matmul with f32 accumulation; bias add + ReLU in f32 (VPU).
    h = jnp.dot(x, w1_ref[...], preferred_element_type=jnp.float32) + b1_ref[...]
    h = jnp.maximum(h, 0.0)
    # Layer 2: cast activations back to the weight dtype for the MXU.
    y = (
        jnp.dot(h.astype(w2_ref.dtype), w2_ref[...], preferred_element_type=jnp.float32)
        + b2_ref[...]
    )
    o_ref[...] = y.astype(o_ref.dtype)


def pad_params(w1, b1, w2, b2, *, compute_dtype=jnp.bfloat16):
    """One-time preprocessing: pad feature dims to multiples of 128 and cast.

    w1: [D, H]  b1: [H]  w2: [H, C]  b2: [C]  ->  padded (w1_p, b1_p, w2_p, b2_p).
    Do this once at init / model-load time and reuse the result on every call.
    """
    D, H = w1.shape
    _, C = w2.shape
    Hp = _round_up(H, LANE)
    Cp = _round_up(C, LANE)
    w1_p = jnp.zeros((D, Hp), compute_dtype).at[:, :H].set(w1.astype(compute_dtype))
    w2_p = jnp.zeros((Hp, Cp), compute_dtype).at[:H, :C].set(w2.astype(compute_dtype))
    # Biases stay f32 (added to the f32 accumulator; padded lanes are zero).
    b1_p = jnp.zeros((1, Hp), jnp.float32).at[0, :H].set(b1.astype(jnp.float32))
    b2_p = jnp.zeros((1, Cp), jnp.float32).at[0, :C].set(b2.astype(jnp.float32))
    return w1_p, b1_p, w2_p, b2_p


def _pick_tm(B):
    """Batch tile: as large as 512 for big batches, but keep >= 4 grid steps
    when possible so v7x's 2 TensorCores both get work; small batches use one
    snug (8-aligned) tile."""
    if B <= 128:
        return max(8, _round_up(B, 8))
    for tm in (512, 256, 128):
        if pl.cdiv(B, tm) >= 4:
            return tm
    return 128


def mlp_forward(x, padded_params, num_classes, *, tm=None):
    """Fused MLP forward: relu(x @ w1 + b1) @ w2 + b2.

    x: [B, D] in its native dtype (cast to the weight dtype happens in-kernel).
    padded_params: output of pad_params (pre-padded / pre-cast, reused per call).
    Returns [B, num_classes] in x.dtype.
    """
    w1_p, b1_p, w2_p, b2_p = padded_params
    B, D = x.shape
    Hp = w1_p.shape[1]
    Cp = w2_p.shape[1]
    out_dtype = x.dtype

    if tm is None:
        tm = _pick_tm(B)
    grid = (pl.cdiv(B, tm),)  # no batch padding; last block is masked by Pallas

    x_item = jnp.dtype(x.dtype).itemsize
    w_item = jnp.dtype(w1_p.dtype).itemsize
    out_item = jnp.dtype(out_dtype).itemsize

    # VMEM budget: 2x streamed x tile + 2x streamed out tile + 1x resident
    # weights/biases + f32 intermediates, +25% headroom; floor 32 MiB, capped
    # at 64 MiB so the same spec fits v7x's smaller physical VMEM.
    per_step_bytes = (
        2 * tm * D * x_item
        + 2 * tm * Cp * out_item
        + (D * Hp + Hp * Cp) * w_item
        + (Hp + Cp) * 4
        + tm * (D + Hp + Cp) * 4
    )
    vmem_limit = int(
        min(max(per_step_bytes * 5 // 4, 32 * 1024 * 1024), 64 * 1024 * 1024)
    )

    cost = pl.CostEstimate(
        flops=2 * B * D * Hp + 2 * B * Hp * Cp,
        transcendentals=0,
        bytes_accessed=(
            B * D * x_item
            + (D * Hp + Hp * Cp) * w_item
            + (Hp + Cp) * 4
            + B * Cp * out_item
        ),
    )

    out_padded = pl.pallas_call(
        mlp_kernel,
        out_shape=jax.ShapeDtypeStruct((B, Cp), out_dtype),
        grid_spec=pltpu.PrefetchScalarGridSpec(
            num_scalar_prefetch=0,
            grid=grid,
            in_specs=[
                pl.BlockSpec((tm, D), lambda i: (i, 0)),   # x: streamed per batch tile
                pl.BlockSpec((D, Hp), lambda i: (0, 0)),   # w1: resident (constant block)
                pl.BlockSpec((1, Hp), lambda i: (0, 0)),   # b1: resident
                pl.BlockSpec((Hp, Cp), lambda i: (0, 0)),  # w2: resident
                pl.BlockSpec((1, Cp), lambda i: (0, 0)),   # b2: resident
            ],
            out_specs=pl.BlockSpec((tm, Cp), lambda i: (i, 0)),
        ),
        compiler_params=pltpu.CompilerParams(
            dimension_semantics=("parallel",),  # shard batch tiles across TCs (v7x)
            vmem_limit_bytes=vmem_limit,
        ),
        cost_estimate=cost,
    )(x, w1_p, b1_p, w2_p, b2_p)

    # Drop only the padded class lanes; batch was never padded.
    return out_padded[:, :num_classes]


def init_params(key, input_size=32 * 32 * 3, hidden_layers=(50,), num_classes=10):
    """Mimic MultiLayerPerceptron.weights_init: W ~ N(0, 0.001), b = 0."""
    sizes = [input_size] + list(hidden_layers) + [num_classes]
    params = []
    for i in range(len(sizes) - 1):
        key, sub = jax.random.split(key)
        # stored as [in, out] (transpose of torch's [out, in])
        w = 0.001 * jax.random.normal(sub, (sizes[i], sizes[i + 1]), dtype=jnp.float32)
        b = jnp.zeros((sizes[i + 1],), dtype=jnp.float32)
        params.append((w, b))
    return params


def reference_forward(x, params):
    h = x
    n = len(params)
    for i, (w, b) in enumerate(params):
        h = h @ w + b
        if i < n - 1:
            h = jnp.maximum(h, 0.0)
    return h


if __name__ == "__main__":
    key = jax.random.PRNGKey(0)
    key, xkey = jax.random.split(key)

    B = 200                      # grid=(2,), exercises the masked partial last tile
    INPUT_SIZE = 32 * 32 * 3     # 3072, module default
    HIDDEN = [50]
    NUM_CLASSES = 10

    params = init_params(key, INPUT_SIZE, HIDDEN, NUM_CLASSES)
    (w1, b1), (w2, b2) = params

    x = jax.random.normal(xkey, (B, INPUT_SIZE), dtype=jnp.float32)
    ref = reference_forward(x, params)

    fwd = jax.jit(functools.partial(mlp_forward, num_classes=NUM_CLASSES))

    # f32 weights (exact vs reference). Padding/casting hoisted out of the call path.
    padded_f32 = pad_params(w1, b1, w2, b2, compute_dtype=jnp.float32)
    out = jax.block_until_ready(fwd(x, padded_f32))
    assert out.shape == (B, NUM_CLASSES)
    assert jnp.allclose(out, ref, atol=1e-4, rtol=1e-4), "f32 mismatch vs reference"

    # bf16 weights (default): x streamed in f32, cast in-kernel; f32 accumulation.
    padded_bf16 = pad_params(w1, b1, w2, b2)
    out_bf16 = jax.block_until_ready(fwd(x, padded_bf16))
    assert out_bf16.shape == (B, NUM_CLASSES)
    assert jnp.allclose(out_bf16, ref, atol=5e-3, rtol=5e-2), "bf16 mismatch vs reference"

    print("KERNEL_OK")
</pallas_src>

<mosaic_0001>
module attributes {stable_mosaic.version = 11 : i64} {
  func.func @mlp_kernel(%arg0: i32, %arg1: memref<128x3072xf32, #tpu.memory_space<vmem>>, %arg2: memref<3072x128xf32, #tpu.memory_space<vmem>>, %arg3: memref<1x128xf32, #tpu.memory_space<vmem>>, %arg4: memref<128x128xf32, #tpu.memory_space<vmem>>, %arg5: memref<1x128xf32, #tpu.memory_space<vmem>>, %arg6: memref<128x128xf32, #tpu.memory_space<vmem>>) attributes {dimension_semantics = [#tpu.dimension_semantics<parallel>], iteration_bounds = array<i64: 2>, scalar_prefetch = 0 : i64, scratch_operands = 0 : i64, tpu.core_type = #tpu.core_type<tc>, window_params = [{transform_indices = @transform_0, window_bounds = array<i64: 128, 3072>}, {pipeline_mode = #tpu.pipeline_mode<synchronous>, transform_indices = @transform_1, window_bounds = array<i64: 3072, 128>}, {pipeline_mode = #tpu.pipeline_mode<synchronous>, transform_indices = @transform_2, window_bounds = array<i64: 1, 128>}, {pipeline_mode = #tpu.pipeline_mode<synchronous>, transform_indices = @transform_3, window_bounds = array<i64: 128, 128>}, {pipeline_mode = #tpu.pipeline_mode<synchronous>, transform_indices = @transform_4, window_bounds = array<i64: 1, 128>}, {transform_indices = @transform_5, window_bounds = array<i64: 128, 128>}]} {
    %c0 = arith.constant 0 : index
    %c0_0 = arith.constant 0 : index
    %0 = vector.load %arg1[%c0, %c0_0] : memref<128x3072xf32, #tpu.memory_space<vmem>>, vector<128x3072xf32>
    %c0_1 = arith.constant 0 : index
    %c0_2 = arith.constant 0 : index
    %1 = vector.load %arg2[%c0_1, %c0_2] : memref<3072x128xf32, #tpu.memory_space<vmem>>, vector<3072x128xf32>
    %cst = arith.constant dense<0.000000e+00> : vector<128x128xf32>
    %2 = tpu.matmul %0, %1, %cst {dimension_numbers = #tpu.dot_dimension_numbers<[1], [0], [0], [1], [0, 0, 1, 1], [], []>} : vector<128x3072xf32>, vector<3072x128xf32>, vector<128x128xf32> -> vector<128x128xf32>
    %c0_3 = arith.constant 0 : index
    %c0_4 = arith.constant 0 : index
    %3 = vector.load %arg3[%c0_3, %c0_4] : memref<1x128xf32, #tpu.memory_space<vmem>>, vector<1x128xf32>
    %4 = vector.broadcast %3 : vector<1x128xf32> to vector<128x128xf32>
    %5 = arith.addf %2, %4 : vector<128x128xf32>
    %cst_5 = arith.constant 0.000000e+00 : f32
    %6 = vector.broadcast %cst_5 : f32 to vector<128x128xf32>
    %7 = arith.maximumf %5, %6 : vector<128x128xf32>
    %c0_6 = arith.constant 0 : index
    %c0_7 = arith.constant 0 : index
    %8 = vector.load %arg4[%c0_6, %c0_7] : memref<128x128xf32, #tpu.memory_space<vmem>>, vector<128x128xf32>
    %cst_8 = arith.constant dense<0.000000e+00> : vector<128x128xf32>
    %9 = tpu.matmul %7, %8, %cst_8 {dimension_numbers = #tpu.dot_dimension_numbers<[1], [0], [0], [1], [0, 0, 1, 1], [], []>} : vector<128x128xf32>, vector<128x128xf32>, vector<128x128xf32> -> vector<128x128xf32>
    %c0_9 = arith.constant 0 : index
    %c0_10 = arith.constant 0 : index
    %10 = vector.load %arg5[%c0_9, %c0_10] : memref<1x128xf32, #tpu.memory_space<vmem>>, vector<1x128xf32>
    %11 = vector.broadcast %10 : vector<1x128xf32> to vector<128x128xf32>
    %12 = arith.addf %9, %11 : vector<128x128xf32>
    %c0_11 = arith.constant 0 : index
    %c0_12 = arith.constant 0 : index
    %13 = vector.load %arg6[%c0_11, %c0_12] : memref<128x128xf32, #tpu.memory_space<vmem>>, vector<128x128xf32>
    tpu.vector_store %arg6[%c0_11, %c0_12], %12 {strides = array<i32>} : memref<128x128xf32, #tpu.memory_space<vmem>>, vector<128x128xf32>,
    return
  }
  func.func @transform_0(%arg0: i32) -> (i32, i32) {
    %c0_i32 = arith.constant 0 : i32
    %c0_i32_0 = arith.constant 0 : i32
    return %arg0, %c0_i32 : i32, i32
  }
  func.func @transform_1(%arg0: i32) -> (i32, i32) {
    %c0_i32 = arith.constant 0 : i32
    %c0_i32_0 = arith.constant 0 : i32
    %c0_i32_1 = arith.constant 0 : i32
    return %c0_i32, %c0_i32_0 : i32, i32
  }
  func.func @transform_2(%arg0: i32) -> (i32, i32) {
    %c0_i32 = arith.constant 0 : i32
    %c0_i32_0 = arith.constant 0 : i32
    %c0_i32_1 = arith.constant 0 : i32
    return %c0_i32, %c0_i32_0 : i32, i32
  }
  func.func @transform_3(%arg0: i32) -> (i32, i32) {
    %c0_i32 = arith.constant 0 : i32
    %c0_i32_0 = arith.constant 0 : i32
    %c0_i32_1 = arith.constant 0 : i32
    return %c0_i32, %c0_i32_0 : i32, i32
  }
  func.func @transform_4(%arg0: i32) -> (i32, i32) {
    %c0_i32 = arith.constant 0 : i32
    %c0_i32_0 = arith.constant 0 : i32
    %c0_i32_1 = arith.constant 0 : i32
    return %c0_i32, %c0_i32_0 : i32, i32
  }
  func.func @transform_5(%arg0: i32) -> (i32, i32) {
    %c0_i32 = arith.constant 0 : i32
    %c0_i32_0 = arith.constant 0 : i32
    return %arg0, %c0_i32 : i32, i32
  }
}

</mosaic_0001>

<bundles_post_ra>
// kernel: mlp_forward.1
= control target key start
LH: loop header
LB: loop body
LE: loop exit
PB: predicated region body
PF: predicated region fallthrough
CT: control target
= control target key end

     0   :  { %10 = vsyncpa [#allocation3], 0  ;;  %s6294_s0 = inlined_call_operand.hbm [shape: f32[200,3072], index: 0, kind: input, shape index: {}]   ;;  %s6295_s1 = inlined_call_operand.hbm [shape: f32[3072,128], index: 1, kind: input, shape index: {}]   ;;  %s6296_s2 = inlined_call_operand.hbm [shape: f32[1,128], index: 2, kind: input, shape index: {}]   ;;  %s6297_s3 = inlined_call_operand.hbm [shape: f32[128,128], index: 3, kind: input, shape index: {}]   ;;  %s6298_s4 = inlined_call_operand.hbm [shape: f32[1,128], index: 4, kind: input, shape index: {}]   ;;  %s6299_s5 = inlined_call_operand.vmem [shape: f32[200,128], index: 5, kind: output, shape index: {}]  }
   0x1   :  { %12 = vsyncpa [#allocation3 + $0x1], 0 }
   0x2   :  { %13 = vsyncpa [#allocation5], 0 }
   0x3   :  { %14 = vsyncpa [#allocation8], 0  ;;  %s5305_s18 = smov 0   ;;  %s5307_s19 = smov 0  }
   0x4   :  { %s5309_s20 = smov 0   ;;  %s5311_s21 = smov 0  }
   0x5 LB: > { %s5324_s22 = sadd.s32 4294967295, %s5232_s21   ;;  %s5327_s23 = sadd.s32 1, %s5232_s21   ;;  %s5232_s21 = sphi %s5311_s21, %s6325_s21   ;;  %s5228_s20 = sphi %s5309_s20, %s6324_s20   ;;  %s5224_s19 = sphi %s5307_s19, %s6323_s19   ;;  %s5220_s18 = sphi %s5305_s18, %s6322_s18  }
   0x6   : > { %s24_s24 = ssub.s32 %s5232_s21, %s5327_s23  ;;  %s27_s25 = sadd.s32 1, %s5228_s20 }
   0x7   : > { %p25_p0 = scmp.eq.s32.totalorder %s24_s24, 0  ;;  %p34_p1 = scmp.ne.s32.totalorder %s5228_s20, %s5224_s19 }
   0x8   : > { %p35_p2 = scmp.eq.s32.totalorder %s5232_s21, 0  ;;  %p40_p3 = scmp.ne.s32.totalorder %s5224_s19, %s5220_s18 }
   0x9   : > { %s5337_s26 = scalar_select %p25_p0, %s5228_s20, %s27_s25  }
   0xa   : > { %p5339_p4 = por %p35_p2, %p34_p1  ;;  %p6300_p5 = scmp.eq.s32.totalorder %s5324_s22, 0 }
   0xb   : > { %6303 = sst [smem:[#allocation14_spill]] %s5337_s26  ;;  %p148_p6 = scmp.eq.s32.totalorder %s5324_s22, 1 }
   0xc   : > { %s6304_s27 = scalar_select %p5339_p4, 1, 0 }
   0xd   : > { %p3352_p7 = scmp.ge.s32.totalorder %s5232_s21, 1  ;;  %p5348_p8 = por %p6300_p5, %p40_p3 }
   0xe   : > { %p161_p9 = scmp.lt.s32.totalorder %s5232_s21, 3  ;;  %p5353_p10 = por %p148_p6, %p34_p1 }
   0xf   : > { %s6305_s28 = scalar_select %p5348_p8, 1, 0 }
  0x10   : > { %s6306_s29 = scalar_select %p5353_p10, 1, 0 }
  0x11   : > { %p5357_p11 = pnand %p3352_p7, %p161_p9  ;;  %s5266_s6 = smov [#allocation4]  }
  0x12   : > { %s173_s7 = sshll.u32 %s5266_s6, 4  ;;  %s5267_s9 = smov [#allocation7]   ;;  %s5363_s7 = int_to_ptr.vmem [resolvable:$true] %s173_s7 }
  0x13   : > { %s6307_s30 = scalar_select %p5357_p11, 1, 0 }
  0x14   : > { %p4893_p12 = pneg %p5357_p11  ;;  %s197_s10 = sshll.u32 %s5267_s9, 4  ;;  %s5371_s10 = int_to_ptr.vmem [resolvable:$true] %s197_s10 }
  0x15   : > { %s5268_s11 = smov [#allocation6]   ;;  %s5018_s15 = scalar_lea.hbm %s6295_s1, 49152 }
  0x16   : > { %p5367_p13 = pnand %p4893_p12, %p6300_p5  ;;  %s5373_s12 = sshll.u32 %s5268_s11, 4  ;;  %s188_s12 = int_to_ptr.vmem [resolvable:$true] %s5373_s12 }
  0x17   : > { %p5019_p0 = scmp.ne.s32.totalorder %s6295_s1, %s5018_s15  ;;  %p5025_p6 = scmp.lt.u32.totalorder %s5018_s15, %s6295_s1 }
  0x18   : > { %p5383_p1 = pneg %p5367_p13 }
  0x1a   : > { %p5021_p2 = pnand %p5383_p1, %p5019_p0 }
  0x1c   : > { %p5022_p3 = pneg %p5021_p2 }
  0x1e   : > { %p5027_p7 = pnand %p5025_p6, %p5022_p3 }
  0x20   : > { %5030 = shalt.err (!%p5027_p7)
}
  0x21   : > { %s5031_s6 = scalar_lea.vmem %s5363_s7, 49152  ;;  %p5039_p10 = scmp.lt.s32.totalorder %s5363_s7, %s5363_s7 }
  0x22   : > { %p5032_p9 = scmp.ne.s32.totalorder %s5363_s7, %s5031_s6  ;;  %p5040_p8 = scmp.lt.s32.totalorder %s5031_s6, %s5031_s6 }
  0x24   : > { %p5034_p12 = pnand %p5032_p9, %p5383_p1  ;;  %p5041_p0 = por %p5040_p8, %p5039_p10 }
  0x26   : > { %p5035_p5 = pneg %p5034_p12 }
  0x28   : > { %p5042_p2 = pnand %p5041_p0, %p5035_p5 }
  0x2a   : > { %5045 = shalt.err (!%p5042_p2)
}
  0x2b   : > { %s5269_s9 = smov 128   ;;  %s5270_s11 = smov 8  }
  0x2c   : > { %4896 = dma.hbm_to_vmem [thread:$0]  (!%p5367_p13), %s6295_s1, 49152, %s5363_s7, [#allocation5], %s5269_s9, %s5269_s9, %s5270_s11  }
  0x2d   : > { %s5046_s17 = scalar_lea.hbm %s6297_s3, 2048 }
  0x2e   : > { %p5047_p8 = scmp.ne.s32.totalorder %s6297_s3, %s5046_s17  ;;  %p5053_p3 = scmp.lt.u32.totalorder %s5046_s17, %s6297_s3 }
  0x30   : > { %p5049_p5 = pnand %p5047_p8, %p5383_p1 }
  0x32   : > { %p5050_p10 = pneg %p5049_p5 }
  0x34   : > { %p5055_p6 = pnand %p5053_p3, %p5050_p10 }
  0x36   : > { %5058 = shalt.err (!%p5055_p6)
}
  0x37   : > { %s5059_s7 = scalar_lea.vmem %s5371_s10, 2048  ;;  %p5067_p0 = scmp.lt.s32.totalorder %s5371_s10, %s5371_s10 }
  0x38   : > { %p5060_p7 = scmp.ne.s32.totalorder %s5371_s10, %s5059_s7  ;;  %p5068_p2 = scmp.lt.s32.totalorder %s5059_s7, %s5059_s7 }
  0x3a   : > { %p5062_p9 = pnand %p5060_p7, %p5383_p1  ;;  %p5069_p8 = por %p5068_p2, %p5067_p0 }
  0x3c   : > { %p5063_p12 = pneg %p5062_p9 }
  0x3e   : > { %p5070_p5 = pnand %p5069_p8, %p5063_p12 }
  0x40   : > { %5073 = shalt.err (!%p5070_p5)
}
  0x41   : > { %4902 = dma.hbm_to_vmem [thread:$0]  (!%p5367_p13), %s6297_s3, 2048, %s5371_s10, [#allocation8], %s5269_s9, %s5269_s9, %s5270_s11  }
  0x42   : > { %s5074_s16 = scalar_lea.hbm %s6296_s2, 16 }
  0x43   : > { %p5075_p10 = scmp.ne.s32.totalorder %s6296_s2, %s5074_s16  ;;  %p5081_p7 = scmp.lt.u32.totalorder %s5074_s16, %s6296_s2 }
  0x45   : > { %p5077_p3 = pnand %p5075_p10, %p5383_p1 }
  0x47   : > { %p5078_p6 = pneg %p5077_p3 }
  0x49   : > { %p5083_p9 = pnand %p5081_p7, %p5078_p6 }
  0x4b   : > { %5086 = shalt.err (!%p5083_p9)
}
  0x4c   : > { %s5087_s7 = scalar_lea.vmem %s188_s12, 16  ;;  %s5094_s10 = scalar_lea.vmem %s188_s12, 32 }
  0x4d   : > { %p5088_p12 = scmp.ne.s32.totalorder %s188_s12, %s5087_s7  ;;  %p5095_p8 = scmp.lt.s32.totalorder %s188_s12, %s188_s12 }
  0x4e   : > { %p5096_p5 = scmp.lt.s32.totalorder %s5094_s10, %s5087_s7 }
  0x4f   : > { %p5090_p0 = pnand %p5088_p12, %p5383_p1 }
  0x50   : > { %p5097_p11 = por %p5096_p5, %p5095_p8 }
  0x51   : > { %p5091_p2 = pneg %p5090_p0 }
  0x53   : > { %p5098_p4 = pnand %p5097_p11, %p5091_p2 }
  0x55   : > { %5101 = shalt.err (!%p5098_p4)
}
  0x56   : > { %4899 = dma.hbm_to_vmem [thread:$0]  (!%p5367_p13), %s6296_s2, 16, %s188_s12, [#allocation5]  }
  0x57   : > { %s5271_s26 = smov [#allocation9]   ;;  %s5102_s16 = scalar_lea.hbm %s6298_s4, 16 }
  0x58   : > { %s211_s13 = sshll.u32 %s5271_s26, 4  ;;  %p5103_p10 = scmp.ne.s32.totalorder %s6298_s4, %s5102_s16  ;;  %s212_s13 = int_to_ptr.vmem [resolvable:$true] %s211_s13 }
  0x59   : > { %p5109_p3 = scmp.lt.u32.totalorder %s5102_s16, %s6298_s4 }
  0x5a   : > { %p5105_p4 = pnand %p5103_p10, %p5383_p1 }
  0x5c   : > { %p5106_p11 = pneg %p5105_p4 }
  0x5e   : > { %p5111_p6 = pnand %p5109_p3, %p5106_p11 }
  0x60   : > { %5114 = shalt.err (!%p5111_p6)
}
  0x61   : > { %s5115_s12 = scalar_lea.vmem %s212_s13, 16  ;;  %s5122_s7 = scalar_lea.vmem %s212_s13, 32 }
  0x62   : > { %p5116_p7 = scmp.ne.s32.totalorder %s212_s13, %s5115_s12  ;;  %p5123_p0 = scmp.lt.s32.totalorder %s212_s13, %s212_s13 }
  0x63   : > { %p5124_p2 = scmp.lt.s32.totalorder %s5122_s7, %s5115_s12 }
  0x64   : > { %p5118_p9 = pnand %p5116_p7, %p5383_p1 }
  0x65   : > { %p5125_p8 = por %p5124_p2, %p5123_p0 }
  0x66   : > { %p5119_p12 = pneg %p5118_p9 }
  0x68   : > { %p5126_p5 = pnand %p5125_p8, %p5119_p12 }
  0x6a   : > { %5129 = shalt.err (!%p5126_p5)
}
  0x6b   : > { %4905 = dma.hbm_to_vmem [thread:$0]  (!%p5367_p13), %s6298_s4, 16, %s212_s13, [#allocation8]  }
  0x6c   : > { %p3357_p10 = scmp.ge.s32.totalorder %s5232_s21, 2 }
  0x6d   : > { %p6310_p4 = scmp.ne.s32.totalorder (!%p3357_p10), %s6304_s27, 0 }
  0x6e   : > { %218 = sbr.rel (%p3357_p10) target bundleno = 153 (0x99), region = 32 }
  0x75   : > { %221 = sbr.rel (!%p6310_p4) target bundleno = 153 (0x99), region = 36  ;;  %s222_s18 = sand.u32 (%p6310_p4), 1, %s5228_s20  }
  0x76   : > { %s3358_s11 = sshll.u32 (%p6310_p4), %s5232_s21, 4  ;;  %s4873_s26 = smul.u32 (%p6310_p4), 3072, %s222_s18 }
  0x77   : > { %s228_s14 = ssub.s32 (%p6310_p4), 25, %s3358_s11  ;;  %s5472_s16 = scalar_lea.sflag (%p6310_p4), [#allocation3], %s222_s18 }
  0x78   : > { %p229_p1 = scmp.lt.s32.totalorder (%p6310_p4), %s228_s14, 16  ;;  %s226_s13 = scalar_lea.vmem (%p6310_p4), [#allocation2], %s4873_s26 }
  0x7c   : > { %s6327_s14 = smov (!%p229_p1, %s228_s14), 16 }
  0x7d   : > { %s5469_s15 = smul.u32 3072, %s6327_s14 }
  0x7f   : > { %s234_s8 = ssub.s32 49152, %s5469_s15 }
  0x80   : > { %235 = vsyncadd %s5472_s16, %s234_s8  ;;  %p3361_p13 = scmp.ne.s32.totalorder %s5469_s15, 0  ;;  %s4874_s27 = smul.u32 49152, %s5232_s21 }
  0x81   : > { %s241_s17 = sshll.u32 %s226_s13, 4  ;;  %s5134_s21 = scalar_lea.hbm %s6294_s0, 76800  ;;  %s5482_s17 = int_to_ptr.vmem [resolvable:$true] %s241_s17 }
  0x82   : > { %s5480_s6 = scalar_lea.hbm %s6294_s0, %s4874_s27 }
  0x83   : > { %s5130_s12 = scalar_lea.hbm %s5480_s6, %s5469_s15  ;;  %p5135_p7 = scmp.lt.u32.totalorder %s5480_s6, %s6294_s0 }
  0x84   : > { %p5131_p11 = scmp.ne.s32.totalorder %s5480_s6, %s5130_s12  ;;  %p5136_p9 = scmp.lt.u32.totalorder %s5134_s21, %s5130_s12 }
  0x85   : > { %p5138_p0 = scmp.lt.u32.totalorder %s5130_s12, %s5480_s6 }
  0x86   : > { %p5132_p3 = pnand %p5131_p11, %p3361_p13  ;;  %p5137_p12 = por %p5136_p9, %p5135_p7 }
  0x88   : > { %p5133_p6 = pneg %p5132_p3  ;;  %p5139_p2 = por %p5138_p0, %p5137_p12 }
  0x8a   : > { %p5140_p8 = pnand %p5139_p2, %p5133_p6 }
  0x8c   : > { %5143 = shalt.err (!%p5140_p8)
}
  0x8d   : > { %s5144_s11 = scalar_lea.vmem %s5482_s17, %s5469_s15  ;;  %s5272_s26 = smov [#allocation2]  }
  0x8e   : > { %p5145_p5 = scmp.ne.s32.totalorder %s5482_s17, %s5144_s11  ;;  %s5148_s14 = sshll.u32 %s5272_s26, 4  ;;  %s5149_s14 = int_to_ptr.vmem [resolvable:$false] %s5148_s14 }
  0x8f   : > { %s5150_s8 = scalar_lea.vmem %s5149_s14, 98304  ;;  %p5151_p1 = scmp.lt.s32.totalorder %s5482_s17, %s5149_s14 }
  0x90   : > { %p5146_p10 = pnand %p5145_p5, %p3361_p13  ;;  %p5152_p11 = scmp.lt.s32.totalorder %s5150_s8, %s5144_s11 }
  0x92   : > { %p5147_p4 = pneg %p5146_p10  ;;  %p5153_p3 = por %p5152_p11, %p5151_p1 }
  0x94   : > { %p5154_p7 = pnand %p5153_p3, %p5147_p4 }
  0x96   : > { %5157 = shalt.err (!%p5154_p7)
}
  0x97   : > { %s5273_s13 = smov 3072   ;;  %s5274_s27 = smov 192  }
  0x98   : > { %247 = dma.hbm_to_vmem [thread:$0]  (%p3361_p13), %s5480_s6, %s5469_s15, %s5482_s17, %s5472_s16, %s5273_s13, %s5273_s13, %s5274_s27  }
  0x99 PF: > { %p6311_p6 = scmp.ne.s32.totalorder %s6307_s30, 0 }
  0x9a   : > { %s5512_s24 = sand.u32 (!%p6311_p6), 1, %s5224_s19   ;;  %p6312_p9 = scmp.ne.s32.totalorder (!%p6311_p6), %s6305_s28, 0 }
  0x9b   : > { %253 = sbr.rel (%p6311_p6) target bundleno = 1071 (0x42f), region = 40  ;;  %s256_s12 = scalar_lea.sflag (!%p6311_p6), [#allocation3], %s5512_s24 }
  0x9c   : > { %s4875_s25 = smul.u32 (!%p6311_p6), 3072, %s5512_s24 }
  0x9e   : > { %s5516_s7 = scalar_lea.vmem (!%p6311_p6), [#allocation2], %s4875_s25 }
  0xa2   : > { %5207 = dma.done.wait (%p6312_p9), %s256_s12, 49152  }
  0xa3   : > { %5209 = vsyncadd (%p6312_p9), %s256_s12, 4294918144  ;;  %p6313_p13 = scmp.eq.s32.totalorder %s5324_s22, 0 }
  0xa5   : > { %5211 = dma.done.wait (%p6313_p13), [#allocation5], 49168   ;;  %p6314_p12 = pmov %p6313_p13 }
  0xa7   : > { %5213 = vsyncadd (%p6314_p12), [#allocation5], 4294918128  ;;  %p6315_p0 = pmov %p6314_p12 }
  0xa9   : > { %5215 = dma.done.wait (%p6315_p0), [#allocation8], 2064   ;;  %p6316_p2 = pmov %p6315_p0 }
  0xaa   : > { %v712_v0 = vld [vmem:[#allocation4 + $0x80] sm:$0xff]  ;;  %v713_v1 = vld [vmem:[#allocation4 + $0x88] sm:$0xff]  ;;  %v714_v11 = vld [vmem:[#allocation4 + $0x90] sm:$0xff]  ;;  %s3370_s28 = sshll.u32 %s5512_s24, 7  ;;  %p6317_p8 = scmp.ne.s32.totalorder %s6306_s29, 0 }
  0xab   : > { %5217 = vsyncadd (%p6316_p2), [#allocation8], 4294965232  ;;  %v696_v2 = vld [vmem:[#allocation4] sm:$0xff]  ;;  %v4441_v3 = vpack.c.bf16 %v713_v1, %v712_v0  ;;  %v697_v4 = vld [vmem:[#allocation4 + $0x8] sm:$0xff]  ;;  %s6173_s30 = scalar_lea.vmem [#allocation10], %s3370_s28   ;;  %s3374_s15 = sshll.u32 (%p6317_p8), %s5324_s22, 4 }
  0xac   : > { %v744_v5 = vld [vmem:[#allocation4 + $0x180] sm:$0xff]  ;;  %v745_v6 = vld [vmem:[#allocation4 + $0x188] sm:$0xff]  ;;  %v4443_v7 = vpack.c.bf16 %v697_v4, %v696_v2  ;;  %v715_v13 = vld [vmem:[#allocation4 + $0x98] sm:$0xff]  ;;  %s3390_s16 = sshll.u32 (%p6317_p8), %s5324_s22, 7  ;;  %s3035_s17 = ssub.s32 (%p6317_p8), 25, %s3374_s15 }
  0xad   : > { %v4473_v8 = vpack.c.bf16 %v745_v6, %v744_v5  ;;  %v728_v9 = vld [vmem:[#allocation4 + $0x100] sm:$0xff]  ;;  %v729_v10 = vld [vmem:[#allocation4 + $0x108] sm:$0xff]  ;;  %4442 = vmatprep.subr.bf16.mxu0 %v4441_v3  ;;  %v698_v14 = vld [vmem:[#allocation4 + $0x10] sm:$0xff]  ;;  %v4445_v16 = vpack.c.bf16 %v715_v13, %v714_v11  ;;  %s6198_s21 = scalar_lea.vmem (%p6317_p8), %s6299_s5, %s3390_s16   ;;  %p3036_p5 = scmp.lt.s32.totalorder (%p6317_p8), %s3035_s17, 16 }
  0xae   : > { %v4475_v12 = vpack.c.bf16 %v729_v10, %v728_v9  ;;  %v699_v15 = vld [vmem:[#allocation4 + $0x18] sm:$0xff]  ;;  %4444 = vmatpush3.bf16.msra.mxu0 %v4443_v7  ;;  %v746_v18 = vld [vmem:[#allocation4 + $0x190] sm:$0xff]  ;;  %v716_v23 = vld [vmem:[#allocation4 + $0xa0] sm:$0xff] }
  0xaf   : > { %4474 = vmatprep.subr.bf16.mxu1 %v4473_v8  ;;  %v4447_v17 = vpack.c.bf16 %v699_v15, %v698_v14  ;;  %v747_v19 = vld [vmem:[#allocation4 + $0x198] sm:$0xff]  ;;  %v730_v20 = vld [vmem:[#allocation4 + $0x110] sm:$0xff]  ;;  %v717_v24 = vld [vmem:[#allocation4 + $0xa8] sm:$0xff]  ;;  %4446 = vmatprep.subr.bf16.mxu0 %v4445_v16 }
  0xb0   : > { %4476 = vmatpush3.bf16.msra.mxu1 %v4475_v12  ;;  %v4477_v21 = vpack.c.bf16 %v747_v19, %v746_v18  ;;  %v731_v22 = vld [vmem:[#allocation4 + $0x118] sm:$0xff]  ;;  %v4449_v26 = vpack.c.bf16 %v717_v24, %v716_v23  ;;  %v700_v27 = vld [vmem:[#allocation4 + $0x20] sm:$0xff]  ;;  %v701_v28 = vld [vmem:[#allocation4 + $0x28] sm:$0xff] }
  0xb1   : > { %v4479_v25 = vpack.c.bf16 %v731_v22, %v730_v20  ;;  %v748_v29 = vld [vmem:[#allocation4 + $0x1a0] sm:$0xff]  ;;  %v749_v30 = vld [vmem:[#allocation4 + $0x1a8] sm:$0xff]  ;;  %v4451_v33 = vpack.c.bf16 %v701_v28, %v700_v27  ;;  %v718_v35 = vld [vmem:[#allocation4 + $0xb0] sm:$0xff] }
  0xb2   : > { %4478 = vmatprep.subr.bf16.mxu1 %v4477_v21  ;;  %v732_v31 = vld [vmem:[#allocation4 + $0x120] sm:$0xff]  ;;  %v733_v32 = vld [vmem:[#allocation4 + $0x128] sm:$0xff]  ;;  %4448 = vmatpush3.bf16.msra.mxu0 %v4447_v17  ;;  %v4481_v34 = vpack.c.bf16 %v749_v30, %v748_v29  ;;  %v719_v36 = vld [vmem:[#allocation4 + $0xb8] sm:$0xff] }
  0xb3   : > { %v702_v37 = vld [vmem:[#allocation4 + $0x30] sm:$0xff]  ;;  %4450 = vmatprep.subr.bf16.mxu0 %v4449_v26  ;;  %v4483_v38 = vpack.c.bf16 %v733_v32, %v732_v31  ;;  %v4453_v39 = vpack.c.bf16 %v719_v36, %v718_v35  ;;  %v703_v40 = vld [vmem:[#allocation4 + $0x38] sm:$0xff]  ;;  %v720_v46 = vld [vmem:[#allocation4 + $0xc0] sm:$0xff] }
  0xb4   : > { %4480 = vmatpush3.bf16.msra.mxu1 %v4479_v25  ;;  %v750_v41 = vld [vmem:[#allocation4 + $0x1b0] sm:$0xff]  ;;  %v751_v42 = vld [vmem:[#allocation4 + $0x1b8] sm:$0xff]  ;;  %v721_v47 = vld [vmem:[#allocation4 + $0xc8] sm:$0xff]  ;;  %v4455_v48 = vpack.c.bf16 %v703_v40, %v702_v37 }
  0xb5   : > { %4482 = vmatprep.subr.bf16.mxu1 %v4481_v34  ;;  %v4485_v43 = vpack.c.bf16 %v751_v42, %v750_v41  ;;  %v734_v44 = vld [vmem:[#allocation4 + $0x130] sm:$0xff]  ;;  %v735_v45 = vld [vmem:[#allocation4 + $0x138] sm:$0xff]  ;;  %v752_v49 = vld [vmem:[#allocation4 + $0x1c0] sm:$0xff]  ;;  %v4457_v52 = vpack.c.bf16 %v721_v47, %v720_v46 }
  0xb6   : > { %4452 = vmatpush3.bf16.msra.mxu0 %v4451_v33  ;;  %v753_v50 = vld [vmem:[#allocation4 + $0x1c8] sm:$0xff]  ;;  %v4487_v51 = vpack.c.bf16 %v735_v45, %v734_v44  ;;  %v704_v53 = vld [vmem:[#allocation4 + $0x40] sm:$0xff]  ;;  %v722_v58 = vld [vmem:[#allocation4 + $0xd0] sm:$0xff] }
  0xb7   : > { %4454 = vmatprep.subr.bf16.mxu0 %v4453_v39  ;;  %v705_v54 = vld [vmem:[#allocation4 + $0x48] sm:$0xff]  ;;  %v736_v55 = vld [vmem:[#allocation4 + $0x140] sm:$0xff]  ;;  %v4489_v56 = vpack.c.bf16 %v753_v50, %v752_v49  ;;  %v723_v59 = vld [vmem:[#allocation4 + $0xd8] sm:$0xff] }
  0xb8   : > { %4484 = vmatpush3.bf16.msra.mxu1 %v4483_v38  ;;  %v737_v57 = vld [vmem:[#allocation4 + $0x148] sm:$0xff]  ;;  %v754_v60 = vld [vmem:[#allocation4 + $0x1d0] sm:$0xff]  ;;  %v755_v61 = vld [vmem:[#allocation4 + $0x1d8] sm:$0xff]  ;;  %v4459_v62 = vpack.c.bf16 %v705_v54, %v704_v53  ;;  %v4461_v0 = vpack.c.bf16 %v723_v59, %v722_v58 }
  0xb9   : > { %4486 = vmatprep.subr.bf16.mxu1 %v4485_v43  ;;  %v4491_v63 = vpack.c.bf16 %v737_v57, %v736_v55  ;;  %v706_v1 = vld [vmem:[#allocation4 + $0x50] sm:$0xff]  ;;  %v707_v2 = vld [vmem:[#allocation4 + $0x58] sm:$0xff]  ;;  %v4493_v4 = vpack.c.bf16 %v755_v61, %v754_v60  ;;  %v724_v6 = vld [vmem:[#allocation4 + $0xe0] sm:$0xff] }
  0xba   : > { %4456 = vmatpush3.bf16.msra.mxu0 %v4455_v48  ;;  %v738_v3 = vld [vmem:[#allocation4 + $0x150] sm:$0xff]  ;;  %v739_v5 = vld [vmem:[#allocation4 + $0x158] sm:$0xff]  ;;  %v725_v7 = vld [vmem:[#allocation4 + $0xe8] sm:$0xff]  ;;  %v4463_v10 = vpack.c.bf16 %v707_v2, %v706_v1 }
  0xbb   : > { %4458 = vmatprep.subr.bf16.mxu0 %v4457_v52  ;;  %v756_v8 = vld [vmem:[#allocation4 + $0x1e0] sm:$0xff]  ;;  %v757_v9 = vld [vmem:[#allocation4 + $0x1e8] sm:$0xff]  ;;  %v4495_v13 = vpack.c.bf16 %v739_v5, %v738_v3  ;;  %v4465_v14 = vpack.c.bf16 %v725_v7, %v724_v6  ;;  %v726_v19 = vld [vmem:[#allocation4 + $0xf0] sm:$0xff] }
  0xbc   : > { %4488 = vmatpush3.bf16.msra.mxu1 %v4487_v51  ;;  %v708_v11 = vld [vmem:[#allocation4 + $0x60] sm:$0xff]  ;;  %v313_v12 = vld [vmem:[%s5516_s7 + $0x8] sm:$0xff]  ;;  %v4497_v18 = vpack.c.bf16 %v757_v9, %v756_v8  ;;  %v727_v20 = vld [vmem:[#allocation4 + $0xf8] sm:$0xff] }
  0xbd   : > { %4490 = vmatprep.subr.bf16.mxu1 %v4489_v56  ;;  %v709_v15 = vld [vmem:[#allocation4 + $0x68] sm:$0xff]  ;;  %v740_v16 = vld [vmem:[#allocation4 + $0x160] sm:$0xff]  ;;  %1151 = vmatprep.mubr.f32.mxu0 %v313_v12  ;;  %v315_v21 = vld [vmem:[%s5516_s7 + $0x18] sm:$0xff]  ;;  %v4469_v26 = vpack.c.bf16 %v727_v20, %v726_v19 }
  0xbe   : > { %4460 = vmatpush3.bf16.msra.mxu0 %v4459_v62  ;;  %v741_v17 = vld [vmem:[#allocation4 + $0x168] sm:$0xff]  ;;  %v758_v22 = vld [vmem:[#allocation4 + $0x1f0] sm:$0xff]  ;;  %v759_v23 = vld [vmem:[#allocation4 + $0x1f8] sm:$0xff]  ;;  %1296 = vmatprep.mubr.f32.mxu1 %v315_v21  ;;  %v4467_v24 = vpack.c.bf16 %v709_v15, %v708_v11 }
  0xbf   : > { %4462 = vmatprep.subr.bf16.mxu0 %v4461_v0  ;;  %v4499_v25 = vpack.c.bf16 %v741_v17, %v740_v16  ;;  %v710_v27 = vld [vmem:[#allocation4 + $0x70] sm:$0xff]  ;;  %v711_v28 = vld [vmem:[#allocation4 + $0x78] sm:$0xff]  ;;  %v4501_v30 = vpack.c.bf16 %v759_v23, %v758_v22  ;;  %v776_v32 = vld [vmem:[#allocation4 + $0x280] sm:$0xff] }
  0xc0   : > { %4492 = vmatpush3.bf16.msra.mxu1 %v4491_v63  ;;  %v742_v29 = vld [vmem:[#allocation4 + $0x170] sm:$0xff]  ;;  %v743_v31 = vld [vmem:[#allocation4 + $0x178] sm:$0xff]  ;;  %v777_v33 = vld [vmem:[#allocation4 + $0x288] sm:$0xff]  ;;  %v4471_v36 = vpack.c.bf16 %v711_v28, %v710_v27 }
  0xc1   : > { %4494 = vmatprep.subr.bf16.mxu1 %v4493_v4  ;;  %v808_v34 = vld [vmem:[#allocation4 + $0x380] sm:$0xff]  ;;  %v809_v35 = vld [vmem:[#allocation4 + $0x388] sm:$0xff]  ;;  %v4503_v37 = vpack.c.bf16 %v743_v31, %v742_v29  ;;  %v4505_v38 = vpack.c.bf16 %v777_v33, %v776_v32  ;;  %v778_v44 = vld [vmem:[#allocation4 + $0x290] sm:$0xff] }
  0xc2   : > { %4464 = vmatpush3.bf16.msra.mxu0 %v4463_v10  ;;  %v760_v39 = vld [vmem:[#allocation4 + $0x200] sm:$0xff]  ;;  %v761_v40 = vld [vmem:[#allocation4 + $0x208] sm:$0xff]  ;;  %v4537_v41 = vpack.c.bf16 %v809_v35, %v808_v34  ;;  %v779_v45 = vld [vmem:[#allocation4 + $0x298] sm:$0xff] }
  0xc3   : > { %4466 = vmatprep.subr.bf16.mxu0 %v4465_v14  ;;  %v792_v42 = vld [vmem:[#allocation4 + $0x300] sm:$0xff]  ;;  %v793_v43 = vld [vmem:[#allocation4 + $0x308] sm:$0xff]  ;;  %v4507_v47 = vpack.c.bf16 %v761_v40, %v760_v39  ;;  %v810_v48 = vld [vmem:[#allocation4 + $0x390] sm:$0xff]  ;;  %v4509_v54 = vpack.c.bf16 %v779_v45, %v778_v44 }
  0xc4   : > { %4496 = vmatpush3.bf16.msra.mxu1 %v4495_v13  ;;  %v312_v46 = vld [vmem:[%s5516_s7] sm:$0xff]  ;;  %v811_v49 = vld [vmem:[#allocation4 + $0x398] sm:$0xff]  ;;  %v314_v50 = vld [vmem:[%s5516_s7 + $0x10] sm:$0xff]  ;;  %v4539_v52 = vpack.c.bf16 %v793_v43, %v792_v42 }
  0xc5   : > { %4498 = vmatprep.subr.bf16.mxu1 %v4497_v18  ;;  %v337_v51 = vld [vmem:[%s5516_s7 + $0xc8] sm:$0xff]  ;;  %v339_v53 = vld [vmem:[%s5516_s7 + $0xd8] sm:$0xff]  ;;  %v762_v55 = vld [vmem:[#allocation4 + $0x210] sm:$0xff]  ;;  %v4541_v58 = vpack.c.bf16 %v811_v49, %v810_v48 }
  0xc6   : > { %4468 = vmatpush3.bf16.msra.mxu0 %v4467_v24  ;;  %v763_v56 = vld [vmem:[#allocation4 + $0x218] sm:$0xff]  ;;  %v794_v57 = vld [vmem:[#allocation4 + $0x310] sm:$0xff]  ;;  %v780_v60 = vld [vmem:[#allocation4 + $0x2a0] sm:$0xff] }
  0xc7   : > { %4470 = vmatprep.subr.bf16.mxu0 %v4469_v26  ;;  %v795_v59 = vld [vmem:[#allocation4 + $0x318] sm:$0xff]  ;;  %v781_v61 = vld [vmem:[#allocation4 + $0x2a8] sm:$0xff]  ;;  %v336_v62 = vld [vmem:[%s5516_s7 + $0xc0] sm:$0xff]  ;;  %v4511_v4 = vpack.c.bf16 %v763_v56, %v762_v55 }
  0xc8   : > { %4500 = vmatpush3.bf16.msra.mxu1 %v4499_v25  ;;  %v812_v63 = vld [vmem:[#allocation4 + $0x3a0] sm:$0xff]  ;;  %v813_v0 = vld [vmem:[#allocation4 + $0x3a8] sm:$0xff]  ;;  %v338_v1 = vld [vmem:[%s5516_s7 + $0xd0] sm:$0xff]  ;;  %v4543_v5 = vpack.c.bf16 %v795_v59, %v794_v57  ;;  %v4513_v6 = vpack.c.bf16 %v781_v61, %v780_v60 }
  0xc9   : > { %4502 = vmatprep.subr.bf16.mxu1 %v4501_v30  ;;  %v361_v2 = vld [vmem:[%s5516_s7 + $0x188] sm:$0xff]  ;;  %v363_v3 = vld [vmem:[%s5516_s7 + $0x198] sm:$0xff]  ;;  %v764_v7 = vld [vmem:[#allocation4 + $0x220] sm:$0xff]  ;;  %v4545_v10 = vpack.c.bf16 %v813_v0, %v812_v63 }
  0xca   : > { %4472 = vmatpush3.bf16.msra.mxu0 %v4471_v36  ;;  %v765_v8 = vld [vmem:[#allocation4 + $0x228] sm:$0xff]  ;;  %v796_v9 = vld [vmem:[#allocation4 + $0x320] sm:$0xff]  ;;  %v782_v12 = vld [vmem:[#allocation4 + $0x2b0] sm:$0xff] }
  0xcb   : > { %4506 = vmatprep.subr.bf16.mxu0 %v4505_v38  ;;  %v797_v11 = vld [vmem:[#allocation4 + $0x328] sm:$0xff]  ;;  %v783_v13 = vld [vmem:[#allocation4 + $0x2b8] sm:$0xff]  ;;  %v360_v14 = vld [vmem:[%s5516_s7 + $0x180] sm:$0xff]  ;;  %v4515_v20 = vpack.c.bf16 %v765_v8, %v764_v7 }
  0xcc   : > { %4504 = vmatpush3.bf16.msra.mxu1 %v4503_v37  ;;  %v814_v15 = vld [vmem:[#allocation4 + $0x3b0] sm:$0xff]  ;;  %v815_v16 = vld [vmem:[#allocation4 + $0x3b8] sm:$0xff]  ;;  %v385_v18 = vld [vmem:[%s5516_s7 + $0x248] sm:$0xff]  ;;  %v4547_v21 = vpack.c.bf16 %v797_v11, %v796_v9  ;;  %v4517_v22 = vpack.c.bf16 %v783_v13, %v782_v12 }
  0xcd   : > { %4538 = vmatprep.subr.bf16.mxu1 %v4537_v41  ;;  %1152 = vmatmul.mubr.f32.vlgmr.msra.gmra.mrb[0].mxu0 %v312_v46  ;;  %v362_v17 = vld [vmem:[%s5516_s7 + $0x190] sm:$0xff]  ;;  %v387_v19 = vld [vmem:[%s5516_s7 + $0x258] sm:$0xff]  ;;  %v4549_v26 = vpack.c.bf16 %v815_v16, %v814_v15  ;;  %v784_v28 = vld [vmem:[#allocation4 + $0x2c0] sm:$0xff] }
  0xce   : > { %4508 = vmatpush3.bf16.msra.mxu0 %v4507_v47  ;;  %1156 = vmatprep.mubr.f32.mxu0 %v337_v51  ;;  %v766_v23 = vld [vmem:[#allocation4 + $0x230] sm:$0xff]  ;;  %v767_v24 = vld [vmem:[#allocation4 + $0x238] sm:$0xff]  ;;  %v785_v29 = vld [vmem:[#allocation4 + $0x2c8] sm:$0xff] }
  0xcf   : > { %1297 = vmatmul.mubr.f32.vlgmr.msra.gmra.mrb[0].mxu1 %v314_v50  ;;  %4510 = vmatprep.subr.bf16.mxu0 %v4509_v54  ;;  %v798_v25 = vld [vmem:[#allocation4 + $0x330] sm:$0xff]  ;;  %v799_v27 = vld [vmem:[#allocation4 + $0x338] sm:$0xff]  ;;  %v384_v30 = vld [vmem:[%s5516_s7 + $0x240] sm:$0xff]  ;;  %v4519_v33 = vpack.c.bf16 %v767_v24, %v766_v23  ;;  %v4521_v38 = vpack.c.bf16 %v785_v29, %v784_v28 }
  0xd0   : > { %4540 = vmatpush3.bf16.msra.mxu1 %v4539_v52  ;;  %1301 = vmatprep.mubr.f32.mxu1 %v339_v53  ;;  %v386_v31 = vld [vmem:[%s5516_s7 + $0x250] sm:$0xff]  ;;  %v409_v32 = vld [vmem:[%s5516_s7 + $0x308] sm:$0xff]  ;;  %v816_v34 = vld [vmem:[#allocation4 + $0x3c0] sm:$0xff]  ;;  %v4551_v37 = vpack.c.bf16 %v799_v27, %v798_v25 }
  0xd1   : > { %1157 = vmatmul.mubr.f32.gmra.mrb[2].mxu0 %v336_v62  ;;  %4542 = vmatprep.subr.bf16.mxu1 %v4541_v58  ;;  %v817_v35 = vld [vmem:[#allocation4 + $0x3c8] sm:$0xff]  ;;  %v411_v36 = vld [vmem:[%s5516_s7 + $0x318] sm:$0xff]  ;;  %v768_v39 = vld [vmem:[#allocation4 + $0x240] sm:$0xff] }
  0xd2   : > { %1161 = vmatprep.mubr.f32.mxu0 %v361_v2  ;;  %4512 = vmatpush3.bf16.msra.mxu0 %v4511_v4  ;;  %v769_v40 = vld [vmem:[#allocation4 + $0x248] sm:$0xff]  ;;  %v4553_v41 = vpack.c.bf16 %v817_v35, %v816_v34  ;;  %v800_v42 = vld [vmem:[#allocation4 + $0x340] sm:$0xff]  ;;  %v410_v45 = vld [vmem:[%s5516_s7 + $0x310] sm:$0xff] }
  0xd3   : > { %1302 = vmatmul.mubr.f32.gmra.mrb[2].mxu1 %v338_v1  ;;  %4514 = vmatprep.subr.bf16.mxu0 %v4513_v6  ;;  %v801_v43 = vld [vmem:[#allocation4 + $0x348] sm:$0xff]  ;;  %v408_v44 = vld [vmem:[%s5516_s7 + $0x300] sm:$0xff]  ;;  %v786_v46 = vld [vmem:[#allocation4 + $0x2d0] sm:$0xff]  ;;  %v4523_v49 = vpack.c.bf16 %v769_v40, %v768_v39 }
  0xd4   : > { %1306 = vmatprep.mubr.f32.mxu1 %v363_v3  ;;  %4544 = vmatpush3.bf16.msra.mxu1 %v4543_v5  ;;  %v433_v47 = vld [vmem:[%s5516_s7 + $0x3c8] sm:$0xff]  ;;  %v435_v48 = vld [vmem:[%s5516_s7 + $0x3d8] sm:$0xff]  ;;  %v4555_v51 = vpack.c.bf16 %v801_v43, %v800_v42  ;;  %v770_v53 = vld [vmem:[#allocation4 + $0x250] sm:$0xff] }
  0xd5   : > { %1162 = vmatmul.mubr.f32.gmra.mrb[4].mxu0 %v360_v14  ;;  %4546 = vmatprep.subr.bf16.mxu1 %v4545_v10  ;;  %v787_v50 = vld [vmem:[#allocation4 + $0x2d8] sm:$0xff]  ;;  %v818_v55 = vld [vmem:[#allocation4 + $0x3d0] sm:$0xff]  ;;  %v432_v58 = vld [vmem:[%s5516_s7 + $0x3c0] sm:$0xff] }
  0xd6   : > { %1166 = vmatprep.mubr.f32.mxu0 %v385_v18  ;;  %4516 = vmatpush3.bf16.msra.mxu0 %v4515_v20  ;;  %v4525_v52 = vpack.c.bf16 %v787_v50, %v786_v46  ;;  %v771_v54 = vld [vmem:[#allocation4 + $0x258] sm:$0xff]  ;;  %v802_v57 = vld [vmem:[#allocation4 + $0x350] sm:$0xff]  ;;  %v457_v62 = vld [vmem:[%s5516_s7 + $0x488] sm:$0xff] }
  0xd7   : > { %1307 = vmatmul.mubr.f32.gmra.mrb[4].mxu1 %v362_v17  ;;  %4518 = vmatprep.subr.bf16.mxu0 %v4517_v22  ;;  %v819_v56 = vld [vmem:[#allocation4 + $0x3d8] sm:$0xff]  ;;  %v434_v61 = vld [vmem:[%s5516_s7 + $0x3d0] sm:$0xff]  ;;  %v4527_v63 = vpack.c.bf16 %v771_v54, %v770_v53  ;;  %v788_v2 = vld [vmem:[#allocation4 + $0x2e0] sm:$0xff] }
  0xd8   : > { %1311 = vmatprep.mubr.f32.mxu1 %v387_v19  ;;  %4548 = vmatpush3.bf16.msra.mxu1 %v4547_v21  ;;  %v4557_v59 = vpack.c.bf16 %v819_v56, %v818_v55  ;;  %v803_v60 = vld [vmem:[#allocation4 + $0x358] sm:$0xff]  ;;  %v789_v3 = vld [vmem:[#allocation4 + $0x2e8] sm:$0xff]  ;;  %v456_v4 = vld [vmem:[%s5516_s7 + $0x480] sm:$0xff] }
  0xd9   : > { %1167 = vmatmul.mubr.f32.gmra.mrb[6].mxu0 %v384_v30  ;;  %4550 = vmatprep.subr.bf16.mxu1 %v4549_v26  ;;  %v459_v0 = vld [vmem:[%s5516_s7 + $0x498] sm:$0xff]  ;;  %v4559_v1 = vpack.c.bf16 %v803_v60, %v802_v57  ;;  %v4529_v5 = vpack.c.bf16 %v789_v3, %v788_v2  ;;  %v772_v6 = vld [vmem:[#allocation4 + $0x260] sm:$0xff]  ;;  %v773_v7 = vld [vmem:[#allocation4 + $0x268] sm:$0xff] }
  0xda   : > { %1171 = vmatprep.mubr.f32.mxu0 %v409_v32  ;;  %4520 = vmatpush3.bf16.msra.mxu0 %v4519_v33  ;;  %v458_v8 = vld [vmem:[%s5516_s7 + $0x490] sm:$0xff]  ;;  %v820_v9 = vld [vmem:[#allocation4 + $0x3e0] sm:$0xff]  ;;  %v821_v10 = vld [vmem:[#allocation4 + $0x3e8] sm:$0xff]  ;;  %v4531_v12 = vpack.c.bf16 %v773_v7, %v772_v6 }
  0xdb   : > { %1312 = vmatmul.mubr.f32.gmra.mrb[6].mxu1 %v386_v31  ;;  %4522 = vmatprep.subr.bf16.mxu0 %v4521_v38  ;;  %v481_v11 = vld [vmem:[%s5516_s7 + $0x548] sm:$0xff]  ;;  %v4561_v13 = vpack.c.bf16 %v821_v10, %v820_v9  ;;  %v804_v14 = vld [vmem:[#allocation4 + $0x360] sm:$0xff]  ;;  %v483_v16 = vld [vmem:[%s5516_s7 + $0x558] sm:$0xff] }
  0xdc   : > { %1316 = vmatprep.mubr.f32.mxu1 %v411_v36  ;;  %4552 = vmatpush3.bf16.msra.mxu1 %v4551_v37  ;;  %v805_v15 = vld [vmem:[#allocation4 + $0x368] sm:$0xff]  ;;  %v480_v18 = vld [vmem:[%s5516_s7 + $0x540] sm:$0xff]  ;;  %v790_v19 = vld [vmem:[#allocation4 + $0x2f0] sm:$0xff] }
  0xdd   : > { %1172 = vmatmul.mubr.f32.gmra.mrb[8].mxu0 %v408_v44  ;;  %4554 = vmatprep.subr.bf16.mxu1 %v4553_v41  ;;  %v4563_v17 = vpack.c.bf16 %v805_v15, %v804_v14  ;;  %v791_v20 = vld [vmem:[#allocation4 + $0x2f8] sm:$0xff]  ;;  %v482_v21 = vld [vmem:[%s5516_s7 + $0x550] sm:$0xff]  ;;  %v505_v25 = vld [vmem:[%s5516_s7 + $0x608] sm:$0xff] }
  0xde   : > { %1176 = vmatprep.mubr.f32.mxu0 %v433_v47  ;;  %4524 = vmatpush3.bf16.msra.mxu0 %v4523_v49  ;;  %v4533_v22 = vpack.c.bf16 %v791_v20, %v790_v19  ;;  %v774_v23 = vld [vmem:[#allocation4 + $0x270] sm:$0xff]  ;;  %v775_v24 = vld [vmem:[#allocation4 + $0x278] sm:$0xff]  ;;  %v504_v34 = vld [vmem:[%s5516_s7 + $0x600] sm:$0xff] }
  0xdf   : > { %1317 = vmatmul.mubr.f32.gmra.mrb[8].mxu1 %v410_v45  ;;  %4526 = vmatprep.subr.bf16.mxu0 %v4525_v52  ;;  %v4535_v26 = vpack.c.bf16 %v775_v24, %v774_v23  ;;  %v822_v27 = vld [vmem:[#allocation4 + $0x3f0] sm:$0xff]  ;;  %v823_v28 = vld [vmem:[#allocation4 + $0x3f8] sm:$0xff]  ;;  %v840_v35 = vld [vmem:[#allocation4 + $0x480] sm:$0xff] }
  0xe0   : > { %1321 = vmatprep.mubr.f32.mxu1 %v435_v48  ;;  %4556 = vmatpush3.bf16.msra.mxu1 %v4555_v51  ;;  %v507_v29 = vld [vmem:[%s5516_s7 + $0x618] sm:$0xff]  ;;  %v4565_v30 = vpack.c.bf16 %v823_v28, %v822_v27  ;;  %v806_v31 = vld [vmem:[#allocation4 + $0x370] sm:$0xff]  ;;  %v529_v37 = vld [vmem:[%s5516_s7 + $0x6c8] sm:$0xff] }
  0xe1   : > { %1177 = vmatmul.mubr.f32.gmra.mrb[10].mxu0 %v432_v58  ;;  %4558 = vmatprep.subr.bf16.mxu1 %v4557_v59  ;;  %v807_v32 = vld [vmem:[#allocation4 + $0x378] sm:$0xff]  ;;  %v506_v36 = vld [vmem:[%s5516_s7 + $0x610] sm:$0xff]  ;;  %v841_v38 = vld [vmem:[#allocation4 + $0x488] sm:$0xff] }
  0xe2   : > { %1181 = vmatprep.mubr.f32.mxu0 %v457_v62  ;;  %4528 = vmatpush3.bf16.msra.mxu0 %v4527_v63  ;;  %v4567_v33 = vpack.c.bf16 %v807_v32, %v806_v31  ;;  %v531_v39 = vld [vmem:[%s5516_s7 + $0x6d8] sm:$0xff]  ;;  %v4569_v40 = vpack.c.bf16 %v841_v38, %v840_v35  ;;  %v872_v41 = vld [vmem:[#allocation4 + $0x580] sm:$0xff]  ;;  %v873_v42 = vld [vmem:[#allocation4 + $0x588] sm:$0xff] }
  0xe3   : > { %1322 = vmatmul.mubr.f32.gmra.mrb[10].mxu1 %v434_v61  ;;  %4530 = vmatprep.subr.bf16.mxu0 %v4529_v5  ;;  %v528_v43 = vld [vmem:[%s5516_s7 + $0x6c0] sm:$0xff]  ;;  %v4601_v44 = vpack.c.bf16 %v873_v42, %v872_v41  ;;  %v530_v45 = vld [vmem:[%s5516_s7 + $0x6d0] sm:$0xff]  ;;  %v553_v46 = vld [vmem:[%s5516_s7 + $0x788] sm:$0xff] }
  0xe4   : > { %1326 = vmatprep.mubr.f32.mxu1 %v459_v0  ;;  %4560 = vmatpush3.bf16.msra.mxu1 %v4559_v1  ;;  %v555_v47 = vld [vmem:[%s5516_s7 + $0x798] sm:$0xff]  ;;  %v552_v48 = vld [vmem:[%s5516_s7 + $0x780] sm:$0xff]  ;;  %v554_v49 = vld [vmem:[%s5516_s7 + $0x790] sm:$0xff] }
  0xe5   : > { %1182 = vmatmul.mubr.f32.gmra.mrb[12].mxu0 %v456_v4  ;;  %4562 = vmatprep.subr.bf16.mxu1 %v4561_v13  ;;  %v577_v50 = vld [vmem:[%s5516_s7 + $0x848] sm:$0xff]  ;;  %v579_v51 = vld [vmem:[%s5516_s7 + $0x858] sm:$0xff]  ;;  %v576_v52 = vld [vmem:[%s5516_s7 + $0x840] sm:$0xff] }
  0xe6   : > { %1186 = vmatprep.mubr.f32.mxu0 %v481_v11  ;;  %4532 = vmatpush3.bf16.msra.mxu0 %v4531_v12  ;;  %v578_v53 = vld [vmem:[%s5516_s7 + $0x850] sm:$0xff]  ;;  %v601_v54 = vld [vmem:[%s5516_s7 + $0x908] sm:$0xff]  ;;  %v603_v55 = vld [vmem:[%s5516_s7 + $0x918] sm:$0xff] }
  0xe7   : > { %1327 = vmatmul.mubr.f32.gmra.mrb[12].mxu1 %v458_v8  ;;  %4534 = vmatprep.subr.bf16.mxu0 %v4533_v22  ;;  %v600_v56 = vld [vmem:[%s5516_s7 + $0x900] sm:$0xff]  ;;  %v602_v57 = vld [vmem:[%s5516_s7 + $0x910] sm:$0xff]  ;;  %v625_v58 = vld [vmem:[%s5516_s7 + $0x9c8] sm:$0xff] }
  0xe8   : > { %1331 = vmatprep.mubr.f32.mxu1 %v483_v16  ;;  %4564 = vmatpush3.bf16.msra.mxu1 %v4563_v17  ;;  %v627_v59 = vld [vmem:[%s5516_s7 + $0x9d8] sm:$0xff]  ;;  %v624_v60 = vld [vmem:[%s5516_s7 + $0x9c0] sm:$0xff]  ;;  %v626_v61 = vld [vmem:[%s5516_s7 + $0x9d0] sm:$0xff] }
  0xe9   : > { %1187 = vmatmul.mubr.f32.gmra.mrb[14].mxu0 %v480_v18  ;;  %4566 = vmatprep.subr.bf16.mxu1 %v4565_v30  ;;  %v649_v62 = vld [vmem:[%s5516_s7 + $0xa88] sm:$0xff]  ;;  %v651_v63 = vld [vmem:[%s5516_s7 + $0xa98] sm:$0xff]  ;;  %v648_v0 = vld [vmem:[%s5516_s7 + $0xa80] sm:$0xff] }
  0xea   : > { %1191 = vmatprep.mubr.f32.mxu0 %v505_v25  ;;  %4536 = vmatpush3.bf16.msra.mxu0 %v4535_v26  ;;  %v650_v1 = vld [vmem:[%s5516_s7 + $0xa90] sm:$0xff]  ;;  %v673_v2 = vld [vmem:[%s5516_s7 + $0xb48] sm:$0xff]  ;;  %v675_v3 = vld [vmem:[%s5516_s7 + $0xb58] sm:$0xff] }
  0xeb   : > { %1332 = vmatmul.mubr.f32.gmra.mrb[14].mxu1 %v482_v21  ;;  %4570 = vmatprep.subr.bf16.mxu0 %v4569_v40  ;;  %v672_v4 = vld [vmem:[%s5516_s7 + $0xb40] sm:$0xff]  ;;  %v674_v5 = vld [vmem:[%s5516_s7 + $0xb50] sm:$0xff]  ;;  %v317_v6 = vld [vmem:[%s5516_s7 + $0x28] sm:$0xff] }
  0xec   : > { %1336 = vmatprep.mubr.f32.mxu1 %v507_v29  ;;  %4568 = vmatpush3.bf16.msra.mxu1 %v4567_v33  ;;  %v824_v7 = vld [vmem:[#allocation4 + $0x400] sm:$0xff]  ;;  %v825_v8 = vld [vmem:[#allocation4 + $0x408] sm:$0xff]  ;;  %v319_v9 = vld [vmem:[%s5516_s7 + $0x38] sm:$0xff] }
  0xed   : > { %1192 = vmatmul.mubr.f32.gmra.mrb[16].mxu0 %v504_v34  ;;  %4602 = vmatprep.subr.bf16.mxu1 %v4601_v44  ;;  %v856_v10 = vld [vmem:[#allocation4 + $0x500] sm:$0xff]  ;;  %v857_v11 = vld [vmem:[#allocation4 + $0x508] sm:$0xff]  ;;  %v842_v12 = vld [vmem:[#allocation4 + $0x490] sm:$0xff]  ;;  %v4571_v15 = vpack.c.bf16 %v825_v8, %v824_v7 }
  0xee   : > { %1196 = vmatprep.mubr.f32.mxu0 %v529_v37  ;;  %v843_v13 = vld [vmem:[#allocation4 + $0x498] sm:$0xff]  ;;  %v316_v14 = vld [vmem:[%s5516_s7 + $0x20] sm:$0xff]  ;;  %v874_v16 = vld [vmem:[#allocation4 + $0x590] sm:$0xff]  ;;  %v4603_v20 = vpack.c.bf16 %v857_v11, %v856_v10 }
  0xef   : > { %1337 = vmatmul.mubr.f32.gmra.mrb[16].mxu1 %v506_v36  ;;  %v875_v17 = vld [vmem:[#allocation4 + $0x598] sm:$0xff]  ;;  %v318_v18 = vld [vmem:[%s5516_s7 + $0x30] sm:$0xff]  ;;  %v341_v19 = vld [vmem:[%s5516_s7 + $0xe8] sm:$0xff]  ;;  %v4573_v22 = vpack.c.bf16 %v843_v13, %v842_v12 }
  0xf0   : > { %1341 = vmatprep.mubr.f32.mxu1 %v531_v39  ;;  %v343_v21 = vld [vmem:[%s5516_s7 + $0xf8] sm:$0xff]  ;;  %v826_v23 = vld [vmem:[#allocation4 + $0x410] sm:$0xff]  ;;  %v4605_v26 = vpack.c.bf16 %v875_v17, %v874_v16  ;;  %v844_v28 = vld [vmem:[#allocation4 + $0x4a0] sm:$0xff] }
  0xf1   : > { %1197 = vmatmul.mubr.f32.gmra.mrb[18].mxu0 %v528_v43  ;;  %v827_v24 = vld [vmem:[#allocation4 + $0x418] sm:$0xff]  ;;  %v858_v25 = vld [vmem:[#allocation4 + $0x510] sm:$0xff]  ;;  %v845_v29 = vld [vmem:[#allocation4 + $0x4a8] sm:$0xff] }
  0xf2   : > { %1201 = vmatprep.mubr.f32.mxu0 %v553_v46  ;;  %v859_v27 = vld [vmem:[#allocation4 + $0x518] sm:$0xff]  ;;  %v340_v30 = vld [vmem:[%s5516_s7 + $0xe0] sm:$0xff]  ;;  %v877_v32 = vld [vmem:[#allocation4 + $0x5a8] sm:$0xff]  ;;  %v4575_v36 = vpack.c.bf16 %v827_v24, %v826_v23  ;;  %v4577_v38 = vpack.c.bf16 %v845_v29, %v844_v28 }
  0xf3   : > { %1342 = vmatmul.mubr.f32.gmra.mrb[18].mxu1 %v530_v45  ;;  %v876_v31 = vld [vmem:[#allocation4 + $0x5a0] sm:$0xff]  ;;  %v342_v33 = vld [vmem:[%s5516_s7 + $0xf0] sm:$0xff]  ;;  %v365_v34 = vld [vmem:[%s5516_s7 + $0x1a8] sm:$0xff]  ;;  %v4607_v37 = vpack.c.bf16 %v859_v27, %v858_v25 }
  0xf4   : > { %1346 = vmatprep.mubr.f32.mxu1 %v555_v47  ;;  %v367_v35 = vld [vmem:[%s5516_s7 + $0x1b8] sm:$0xff]  ;;  %v828_v39 = vld [vmem:[#allocation4 + $0x420] sm:$0xff]  ;;  %v829_v40 = vld [vmem:[#allocation4 + $0x428] sm:$0xff]  ;;  %v4609_v42 = vpack.c.bf16 %v877_v32, %v876_v31 }
  0xf5   : > { %1202 = vmatmul.mubr.f32.gmra.mrb[20].mxu0 %v552_v48  ;;  %v860_v41 = vld [vmem:[#allocation4 + $0x520] sm:$0xff]  ;;  %v861_v43 = vld [vmem:[#allocation4 + $0x528] sm:$0xff]  ;;  %v846_v44 = vld [vmem:[#allocation4 + $0x4b0] sm:$0xff] }
  0xf6   : > { %1206 = vmatprep.mubr.f32.mxu0 %v577_v50  ;;  %v847_v45 = vld [vmem:[#allocation4 + $0x4b8] sm:$0xff]  ;;  %v364_v46 = vld [vmem:[%s5516_s7 + $0x1a0] sm:$0xff]  ;;  %v878_v47 = vld [vmem:[#allocation4 + $0x5b0] sm:$0xff] }
  0xf7   : > { %1347 = vmatmul.mubr.f32.gmra.mrb[20].mxu1 %v554_v49  ;;  %v879_v48 = vld [vmem:[#allocation4 + $0x5b8] sm:$0xff]  ;;  %v366_v49 = vld [vmem:[%s5516_s7 + $0x1b0] sm:$0xff]  ;;  %v389_v50 = vld [vmem:[%s5516_s7 + $0x268] sm:$0xff] }
  0xf8   : > { %1351 = vmatprep.mubr.f32.mxu1 %v579_v51  ;;  %v391_v51 = vld [vmem:[%s5516_s7 + $0x278] sm:$0xff]  ;;  %v832_v7 = vld [vmem:[#allocation4 + $0x440] sm:$0xff]  ;;  %v833_v8 = vld [vmem:[#allocation4 + $0x448] sm:$0xff] }
  0xf9   : > { %1207 = vmatmul.mubr.f32.gmra.mrb[22].mxu0 %v576_v52  ;;  %v4579_v52 = vpack.c.bf16 %v829_v40, %v828_v39  ;;  %v865_v11 = vld [vmem:[#allocation4 + $0x548] sm:$0xff]  ;;  %v850_v12 = vld [vmem:[#allocation4 + $0x4d0] sm:$0xff]  ;;  %v851_v13 = vld [vmem:[#allocation4 + $0x4d8] sm:$0xff] }
  0xfa   : > { %1211 = vmatprep.mubr.f32.mxu0 %v601_v54  ;;  %v4581_v54 = vpack.c.bf16 %v847_v45, %v846_v44  ;;  %v883_v16 = vld [vmem:[#allocation4 + $0x5d8] sm:$0xff]  ;;  %v414_v17 = vld [vmem:[%s5516_s7 + $0x330] sm:$0xff]  ;;  %v852_v28 = vld [vmem:[#allocation4 + $0x4e0] sm:$0xff] }
  0xfb   : > { %1352 = vmatmul.mubr.f32.gmra.mrb[22].mxu1 %v578_v53  ;;  %v4611_v53 = vpack.c.bf16 %v861_v43, %v860_v41  ;;  %v834_v23 = vld [vmem:[#allocation4 + $0x450] sm:$0xff]  ;;  %v835_v24 = vld [vmem:[#allocation4 + $0x458] sm:$0xff]  ;;  %v853_v29 = vld [vmem:[#allocation4 + $0x4e8] sm:$0xff] }
  0xfc   : > { %1356 = vmatprep.mubr.f32.mxu1 %v603_v55  ;;  %v830_v55 = vld [vmem:[#allocation4 + $0x430] sm:$0xff]  ;;  %v867_v27 = vld [vmem:[#allocation4 + $0x558] sm:$0xff]  ;;  %v884_v31 = vld [vmem:[#allocation4 + $0x5e0] sm:$0xff] }
  0xfd   : > { %1212 = vmatmul.mubr.f32.gmra.mrb[24].mxu0 %v600_v56  ;;  %v831_v56 = vld [vmem:[#allocation4 + $0x438] sm:$0xff]  ;;  %v866_v25 = vld [vmem:[#allocation4 + $0x550] sm:$0xff]  ;;  %v885_v32 = vld [vmem:[#allocation4 + $0x5e8] sm:$0xff] }
  0xfe   : > { %1216 = vmatprep.mubr.f32.mxu0 %v625_v58  ;;  %v4613_v58 = vpack.c.bf16 %v879_v48, %v878_v47  ;;  %v836_v39 = vld [vmem:[#allocation4 + $0x460] sm:$0xff]  ;;  %v837_v40 = vld [vmem:[#allocation4 + $0x468] sm:$0xff]  ;;  %v854_v44 = vld [vmem:[#allocation4 + $0x4f0] sm:$0xff] }
  0xff   : > { %1357 = vmatmul.mubr.f32.gmra.mrb[24].mxu1 %v602_v57  ;;  %v862_v57 = vld [vmem:[#allocation4 + $0x530] sm:$0xff]  ;;  %v868_v41 = vld [vmem:[#allocation4 + $0x560] sm:$0xff]  ;;  %v869_v43 = vld [vmem:[#allocation4 + $0x568] sm:$0xff] }
 0x100   : > { %1361 = vmatprep.mubr.f32.mxu1 %v627_v59  ;;  %v863_v59 = vld [vmem:[#allocation4 + $0x538] sm:$0xff]  ;;  %v886_v47 = vld [vmem:[#allocation4 + $0x5f0] sm:$0xff] }
 0x101   : > { %1217 = vmatmul.mubr.f32.gmra.mrb[26].mxu0 %v624_v60  ;;  %v848_v60 = vld [vmem:[#allocation4 + $0x4c0] sm:$0xff]  ;;  %v855_v45 = vld [vmem:[#allocation4 + $0x4f8] sm:$0xff] }
 0x102   : > { %1221 = vmatprep.mubr.f32.mxu0 %v649_v62  ;;  %v388_v62 = vld [vmem:[%s5516_s7 + $0x260] sm:$0xff]  ;;  %v887_v48 = vld [vmem:[#allocation4 + $0x5f8] sm:$0xff] }
 0x103   : > { %1362 = vmatmul.mubr.f32.gmra.mrb[26].mxu1 %v626_v61  ;;  %v849_v61 = vld [vmem:[#allocation4 + $0x4c8] sm:$0xff] }
 0x104   : > { %1366 = vmatprep.mubr.f32.mxu1 %v651_v63  ;;  %v880_v63 = vld [vmem:[#allocation4 + $0x5c0] sm:$0xff] }
 0x105   : > { %1222 = vmatmul.mubr.f32.gmra.mrb[28].mxu0 %v648_v0  ;;  %v881_v0 = vld [vmem:[#allocation4 + $0x5c8] sm:$0xff] }
 0x106   : > { %1226 = vmatprep.mubr.f32.mxu0 %v673_v2  ;;  %v413_v2 = vld [vmem:[%s5516_s7 + $0x328] sm:$0xff]  ;;  %v4617_v10 = vpack.c.bf16 %v881_v0, %v880_v63  ;;  %v936_v63 = vld [vmem:[#allocation4 + $0x780] sm:$0xff] }
 0x107   : > { %1367 = vmatmul.mubr.f32.gmra.mrb[28].mxu1 %v650_v1  ;;  %v390_v1 = vld [vmem:[%s5516_s7 + $0x270] sm:$0xff]  ;;  %v937_v0 = vld [vmem:[#allocation4 + $0x788] sm:$0xff] }
 0x108   : > { %1371 = vmatprep.mubr.f32.mxu1 %v675_v3  ;;  %v415_v3 = vld [vmem:[%s5516_s7 + $0x338] sm:$0xff] }
 0x109   : > { %1227 = vmatmul.mubr.f32.gmra.mrb[30].mxu0 %v672_v4  ;;  %v4583_v4 = vpack.c.bf16 %v831_v56, %v830_v55  ;;  %v838_v55 = vld [vmem:[#allocation4 + $0x470] sm:$0xff]  ;;  %v839_v56 = vld [vmem:[#allocation4 + $0x478] sm:$0xff] }
 0x10a   : > { %1441 = vmatprep.mubr.f32.mxu0 %v317_v6  ;;  %v4585_v6 = vpack.c.bf16 %v849_v61, %v848_v60  ;;  %v904_v60 = vld [vmem:[#allocation4 + $0x680] sm:$0xff]  ;;  %v905_v61 = vld [vmem:[#allocation4 + $0x688] sm:$0xff] }
 0x10b   : > { %1372 = vmatmul.mubr.f32.gmra.mrb[30].mxu1 %v674_v5  ;;  %v4615_v5 = vpack.c.bf16 %v863_v59, %v862_v57  ;;  %v870_v57 = vld [vmem:[#allocation4 + $0x570] sm:$0xff]  ;;  %v871_v59 = vld [vmem:[#allocation4 + $0x578] sm:$0xff] }
 0x10c   : > { %1586 = vmatprep.mubr.f32.mxu1 %v319_v9  ;;  %v864_v9 = vld [vmem:[#allocation4 + $0x540] sm:$0xff] }
 0x10d   : > { %1442 = vmatmul.mubr.f32.vlgmr.msra.gmra.mrb[32].mxu0 %v316_v14  ;;  %v412_v14 = vld [vmem:[%s5516_s7 + $0x320] sm:$0xff] }
 0x10e   : > { %4572 = vmatpush3.bf16.msra.mxu0 %v4571_v15  ;;  %1446 = vmatprep.mubr.f32.mxu0 %v341_v19  ;;  %v882_v15 = vld [vmem:[#allocation4 + $0x5d0] sm:$0xff]  ;;  %v439_v19 = vld [vmem:[%s5516_s7 + $0x3f8] sm:$0xff] }
 0x10f   : > { %1587 = vmatmul.mubr.f32.vlgmr.msra.gmra.mrb[32].mxu1 %v318_v18  ;;  %4574 = vmatprep.subr.bf16.mxu0 %v4573_v22  ;;  %v437_v18 = vld [vmem:[%s5516_s7 + $0x3e8] sm:$0xff]  ;;  %v4589_v22 = vpack.c.bf16 %v851_v13, %v850_v12  ;;  %v532_v12 = vld [vmem:[%s5516_s7 + $0x6e0] sm:$0xff]  ;;  %v534_v13 = vld [vmem:[%s5516_s7 + $0x6f0] sm:$0xff] }
 0x110   : > { %4604 = vmatpush3.bf16.msra.mxu1 %v4603_v20  ;;  %1591 = vmatprep.mubr.f32.mxu1 %v343_v21  ;;  %v4587_v20 = vpack.c.bf16 %v833_v8, %v832_v7  ;;  %v4619_v21 = vpack.c.bf16 %v865_v11, %v864_v9  ;;  %v4665_v7 = vpack.c.bf16 %v937_v0, %v936_v63  ;;  %v508_v8 = vld [vmem:[%s5516_s7 + $0x620] sm:$0xff]  ;;  %v510_v9 = vld [vmem:[%s5516_s7 + $0x630] sm:$0xff]  ;;  %v535_v11 = vld [vmem:[%s5516_s7 + $0x6f8] sm:$0xff] }
 0x111   : > { %1447 = vmatmul.mubr.f32.gmra.mrb[34].mxu0 %v340_v30  ;;  %4606 = vmatprep.subr.bf16.mxu1 %v4605_v26  ;;  %v4621_v26 = vpack.c.bf16 %v883_v16, %v882_v15  ;;  %v436_v30 = vld [vmem:[%s5516_s7 + $0x3e0] sm:$0xff]  ;;  %v559_v15 = vld [vmem:[%s5516_s7 + $0x7b8] sm:$0xff]  ;;  %v941_v0 = vld [vmem:[#allocation4 + $0x7a8] sm:$0xff] }
 0x112   : > { %1451 = vmatprep.mubr.f32.mxu0 %v365_v34  ;;  %4576 = vmatpush3.bf16.msra.mxu0 %v4575_v36  ;;  %v461_v34 = vld [vmem:[%s5516_s7 + $0x4a8] sm:$0xff]  ;;  %v4591_v36 = vpack.c.bf16 %v835_v24, %v834_v23  ;;  %v556_v16 = vld [vmem:[%s5516_s7 + $0x7a0] sm:$0xff]  ;;  %v607_v23 = vld [vmem:[%s5516_s7 + $0x938] sm:$0xff] }
 0x113   : > { %1592 = vmatmul.mubr.f32.gmra.mrb[34].mxu1 %v342_v33  ;;  %4578 = vmatprep.subr.bf16.mxu0 %v4577_v38  ;;  %v438_v33 = vld [vmem:[%s5516_s7 + $0x3f0] sm:$0xff]  ;;  %v4593_v38 = vpack.c.bf16 %v853_v29, %v852_v28  ;;  %v604_v24 = vld [vmem:[%s5516_s7 + $0x920] sm:$0xff] }
 0x114   : > { %1596 = vmatprep.mubr.f32.mxu1 %v367_v35  ;;  %4608 = vmatpush3.bf16.msra.mxu1 %v4607_v37  ;;  %v463_v35 = vld [vmem:[%s5516_s7 + $0x4b8] sm:$0xff]  ;;  %v4623_v37 = vpack.c.bf16 %v867_v27, %v866_v25  ;;  %v606_v25 = vld [vmem:[%s5516_s7 + $0x930] sm:$0xff]  ;;  %v628_v28 = vld [vmem:[%s5516_s7 + $0x9e0] sm:$0xff] }
 0x115   : > { %1452 = vmatmul.mubr.f32.gmra.mrb[36].mxu0 %v364_v46  ;;  %4610 = vmatprep.subr.bf16.mxu1 %v4609_v42  ;;  %v4625_v42 = vpack.c.bf16 %v885_v32, %v884_v31  ;;  %v460_v46 = vld [vmem:[%s5516_s7 + $0x4a0] sm:$0xff]  ;;  %v631_v27 = vld [vmem:[%s5516_s7 + $0x9f8] sm:$0xff]  ;;  %v630_v29 = vld [vmem:[%s5516_s7 + $0x9f0] sm:$0xff] }
 0x116   : > { %1456 = vmatprep.mubr.f32.mxu0 %v389_v50  ;;  %4580 = vmatpush3.bf16.msra.mxu0 %v4579_v52  ;;  %v485_v50 = vld [vmem:[%s5516_s7 + $0x568] sm:$0xff]  ;;  %v4595_v52 = vpack.c.bf16 %v837_v40, %v836_v39  ;;  %v655_v31 = vld [vmem:[%s5516_s7 + $0xab8] sm:$0xff]  ;;  %v652_v32 = vld [vmem:[%s5516_s7 + $0xaa0] sm:$0xff] }
 0x117   : > { %1597 = vmatmul.mubr.f32.gmra.mrb[36].mxu1 %v366_v49  ;;  %4582 = vmatprep.subr.bf16.mxu0 %v4581_v54  ;;  %v462_v49 = vld [vmem:[%s5516_s7 + $0x4b0] sm:$0xff]  ;;  %v4597_v54 = vpack.c.bf16 %v855_v45, %v854_v44  ;;  %v888_v39 = vld [vmem:[#allocation4 + $0x600] sm:$0xff]  ;;  %v889_v40 = vld [vmem:[#allocation4 + $0x608] sm:$0xff] }
 0x118   : > { %1601 = vmatprep.mubr.f32.mxu1 %v391_v51  ;;  %4612 = vmatpush3.bf16.msra.mxu1 %v4611_v53  ;;  %v487_v51 = vld [vmem:[%s5516_s7 + $0x578] sm:$0xff]  ;;  %v4627_v53 = vpack.c.bf16 %v869_v43, %v868_v41  ;;  %v921_v43 = vld [vmem:[#allocation4 + $0x708] sm:$0xff]  ;;  %v906_v44 = vld [vmem:[#allocation4 + $0x690] sm:$0xff] }
 0x119   : > { %1457 = vmatmul.mubr.f32.gmra.mrb[38].mxu0 %v388_v62  ;;  %4614 = vmatprep.subr.bf16.mxu1 %v4613_v58  ;;  %v4629_v58 = vpack.c.bf16 %v887_v48, %v886_v47  ;;  %v484_v62 = vld [vmem:[%s5516_s7 + $0x560] sm:$0xff]  ;;  %v323_v41 = vld [vmem:[%s5516_s7 + $0x58] sm:$0xff]  ;;  %v4635_v47 = vpack.c.bf16 %v889_v40, %v888_v39  ;;  %v938_v48 = vld [vmem:[#allocation4 + $0x790] sm:$0xff] }
 0x11a   : > { %1461 = vmatprep.mubr.f32.mxu0 %v413_v2  ;;  %4584 = vmatpush3.bf16.msra.mxu0 %v4583_v4  ;;  %v509_v2 = vld [vmem:[%s5516_s7 + $0x628] sm:$0xff]  ;;  %v511_v4 = vld [vmem:[%s5516_s7 + $0x638] sm:$0xff]  ;;  %v940_v63 = vld [vmem:[#allocation4 + $0x7a0] sm:$0xff] }
 0x11b   : > { %1602 = vmatmul.mubr.f32.gmra.mrb[38].mxu1 %v390_v1  ;;  %4586 = vmatprep.subr.bf16.mxu0 %v4585_v6  ;;  %v486_v1 = vld [vmem:[%s5516_s7 + $0x570] sm:$0xff]  ;;  %v4633_v6 = vpack.c.bf16 %v905_v61, %v904_v60  ;;  %v907_v45 = vld [vmem:[#allocation4 + $0x698] sm:$0xff]  ;;  %v908_v60 = vld [vmem:[#allocation4 + $0x6a0] sm:$0xff] }
 0x11c   : > { %1606 = vmatprep.mubr.f32.mxu1 %v415_v3  ;;  %4616 = vmatpush3.bf16.msra.mxu1 %v4615_v5  ;;  %v4599_v3 = vpack.c.bf16 %v839_v56, %v838_v55  ;;  %v4631_v5 = vpack.c.bf16 %v871_v59, %v870_v57  ;;  %v890_v55 = vld [vmem:[#allocation4 + $0x610] sm:$0xff]  ;;  %v891_v56 = vld [vmem:[#allocation4 + $0x618] sm:$0xff]  ;;  %v909_v61 = vld [vmem:[#allocation4 + $0x6a8] sm:$0xff] }
 0x11d   : > { %1462 = vmatmul.mubr.f32.gmra.mrb[40].mxu0 %v412_v14  ;;  %4618 = vmatprep.subr.bf16.mxu1 %v4617_v10  ;;  %v533_v10 = vld [vmem:[%s5516_s7 + $0x6e8] sm:$0xff]  ;;  %v922_v57 = vld [vmem:[#allocation4 + $0x710] sm:$0xff]  ;;  %v923_v59 = vld [vmem:[#allocation4 + $0x718] sm:$0xff] }
 0x11e   : > { %1466 = vmatprep.mubr.f32.mxu0 %v437_v18  ;;  %4588 = vmatpush3.bf16.msra.mxu0 %v4587_v20  ;;  %v557_v14 = vld [vmem:[%s5516_s7 + $0x7a8] sm:$0xff]  ;;  %v580_v20 = vld [vmem:[%s5516_s7 + $0x860] sm:$0xff] }
 0x11f   : > { %1607 = vmatmul.mubr.f32.gmra.mrb[40].mxu1 %v414_v17  ;;  %4590 = vmatprep.subr.bf16.mxu0 %v4589_v22  ;;  %v558_v17 = vld [vmem:[%s5516_s7 + $0x7b0] sm:$0xff]  ;;  %v581_v18 = vld [vmem:[%s5516_s7 + $0x868] sm:$0xff]  ;;  %v896_v39 = vld [vmem:[#allocation4 + $0x640] sm:$0xff] }
 0x120   : > { %1611 = vmatprep.mubr.f32.mxu1 %v439_v19  ;;  %4620 = vmatpush3.bf16.msra.mxu1 %v4619_v21  ;;  %v583_v19 = vld [vmem:[%s5516_s7 + $0x878] sm:$0xff]  ;;  %v582_v21 = vld [vmem:[%s5516_s7 + $0x870] sm:$0xff]  ;;  %v605_v22 = vld [vmem:[%s5516_s7 + $0x928] sm:$0xff] }
 0x121   : > { %1467 = vmatmul.mubr.f32.gmra.mrb[42].mxu0 %v436_v30  ;;  %4622 = vmatprep.subr.bf16.mxu1 %v4621_v26  ;;  %v629_v26 = vld [vmem:[%s5516_s7 + $0x9e8] sm:$0xff] }
 0x122   : > { %1471 = vmatprep.mubr.f32.mxu0 %v461_v34  ;;  %4592 = vmatpush3.bf16.msra.mxu0 %v4591_v36  ;;  %v653_v30 = vld [vmem:[%s5516_s7 + $0xaa8] sm:$0xff]  ;;  %v676_v36 = vld [vmem:[%s5516_s7 + $0xb60] sm:$0xff] }
 0x123   : > { %1612 = vmatmul.mubr.f32.gmra.mrb[42].mxu1 %v438_v33  ;;  %4594 = vmatprep.subr.bf16.mxu0 %v4593_v38  ;;  %v654_v33 = vld [vmem:[%s5516_s7 + $0xab0] sm:$0xff]  ;;  %v677_v34 = vld [vmem:[%s5516_s7 + $0xb68] sm:$0xff] }
 0x124   : > { %1616 = vmatprep.mubr.f32.mxu1 %v463_v35  ;;  %4624 = vmatpush3.bf16.msra.mxu1 %v4623_v37  ;;  %v679_v35 = vld [vmem:[%s5516_s7 + $0xb78] sm:$0xff]  ;;  %v678_v37 = vld [vmem:[%s5516_s7 + $0xb70] sm:$0xff]  ;;  %v321_v38 = vld [vmem:[%s5516_s7 + $0x48] sm:$0xff] }
 0x125   : > { %1472 = vmatmul.mubr.f32.gmra.mrb[44].mxu0 %v460_v46  ;;  %4626 = vmatprep.subr.bf16.mxu1 %v4625_v42  ;;  %v920_v42 = vld [vmem:[#allocation4 + $0x700] sm:$0xff]  ;;  %v897_v40 = vld [vmem:[#allocation4 + $0x648] sm:$0xff] }
 0x126   : > { %1476 = vmatprep.mubr.f32.mxu0 %v485_v50  ;;  %4596 = vmatpush3.bf16.msra.mxu0 %v4595_v52  ;;  %v320_v46 = vld [vmem:[%s5516_s7 + $0x40] sm:$0xff]  ;;  %v322_v50 = vld [vmem:[%s5516_s7 + $0x50] sm:$0xff]  ;;  %v4667_v52 = vpack.c.bf16 %v921_v43, %v920_v42  ;;  %v929_v43 = vld [vmem:[#allocation4 + $0x748] sm:$0xff] }
 0x127   : > { %1617 = vmatmul.mubr.f32.gmra.mrb[44].mxu1 %v462_v49  ;;  %4598 = vmatprep.subr.bf16.mxu0 %v4597_v54  ;;  %v939_v49 = vld [vmem:[#allocation4 + $0x798] sm:$0xff]  ;;  %v4637_v54 = vpack.c.bf16 %v907_v45, %v906_v44  ;;  %v914_v44 = vld [vmem:[#allocation4 + $0x6d0] sm:$0xff] }
 0x128   : > { %1621 = vmatprep.mubr.f32.mxu1 %v487_v51  ;;  %4628 = vmatpush3.bf16.msra.mxu1 %v4627_v53  ;;  %v345_v51 = vld [vmem:[%s5516_s7 + $0x108] sm:$0xff]  ;;  %v347_v53 = vld [vmem:[%s5516_s7 + $0x118] sm:$0xff] }
 0x129   : > { %1477 = vmatmul.mubr.f32.gmra.mrb[46].mxu0 %v484_v62  ;;  %4630 = vmatprep.subr.bf16.mxu1 %v4629_v58  ;;  %v4669_v58 = vpack.c.bf16 %v939_v49, %v938_v48  ;;  %v344_v62 = vld [vmem:[%s5516_s7 + $0x100] sm:$0xff]  ;;  %v915_v45 = vld [vmem:[#allocation4 + $0x6d8] sm:$0xff]  ;;  %v418_v49 = vld [vmem:[%s5516_s7 + $0x350] sm:$0xff] }
 0x12a   : > { %1481 = vmatprep.mubr.f32.mxu0 %v509_v2  ;;  %4600 = vmatpush3.bf16.msra.mxu0 %v4599_v3  ;;  %v369_v2 = vld [vmem:[%s5516_s7 + $0x1c8] sm:$0xff]  ;;  %v371_v3 = vld [vmem:[%s5516_s7 + $0x1d8] sm:$0xff] }
 0x12b   : > { %1622 = vmatmul.mubr.f32.gmra.mrb[46].mxu1 %v486_v1  ;;  %4634 = vmatprep.subr.bf16.mxu0 %v4633_v6  ;;  %v346_v1 = vld [vmem:[%s5516_s7 + $0x110] sm:$0xff]  ;;  %v4641_v6 = vpack.c.bf16 %v909_v61, %v908_v60  ;;  %v947_v48 = vld [vmem:[#allocation4 + $0x7d8] sm:$0xff]  ;;  %v916_v60 = vld [vmem:[#allocation4 + $0x6e0] sm:$0xff] }
 0x12c   : > { %1626 = vmatprep.mubr.f32.mxu1 %v511_v4  ;;  %4632 = vmatpush3.bf16.msra.mxu1 %v4631_v5  ;;  %v4639_v4 = vpack.c.bf16 %v891_v56, %v890_v55  ;;  %v4671_v5 = vpack.c.bf16 %v923_v59, %v922_v57  ;;  %v898_v55 = vld [vmem:[#allocation4 + $0x650] sm:$0xff]  ;;  %v899_v56 = vld [vmem:[#allocation4 + $0x658] sm:$0xff]  ;;  %v917_v61 = vld [vmem:[#allocation4 + $0x6e8] sm:$0xff] }
 0x12d   : > { %1482 = vmatmul.mubr.f32.gmra.mrb[48].mxu0 %v508_v8  ;;  %4666 = vmatprep.subr.bf16.mxu1 %v4665_v7  ;;  %v892_v7 = vld [vmem:[#allocation4 + $0x620] sm:$0xff]  ;;  %v893_v8 = vld [vmem:[#allocation4 + $0x628] sm:$0xff]  ;;  %v930_v57 = vld [vmem:[#allocation4 + $0x750] sm:$0xff] }
 0x12e   : > { %1486 = vmatprep.mubr.f32.mxu0 %v533_v10  ;;  %v4673_v10 = vpack.c.bf16 %v941_v0, %v940_v63  ;;  %v931_v59 = vld [vmem:[#allocation4 + $0x758] sm:$0xff]  ;;  %v948_v63 = vld [vmem:[#allocation4 + $0x7e0] sm:$0xff]  ;;  %v949_v0 = vld [vmem:[#allocation4 + $0x7e8] sm:$0xff] }
 0x12f   : > { %1627 = vmatmul.mubr.f32.gmra.mrb[48].mxu1 %v510_v9  ;;  %v924_v9 = vld [vmem:[#allocation4 + $0x720] sm:$0xff] }
 0x130   : > { %1631 = vmatprep.mubr.f32.mxu1 %v535_v11  ;;  %v925_v11 = vld [vmem:[#allocation4 + $0x728] sm:$0xff] }
 0x131   : > { %1487 = vmatmul.mubr.f32.gmra.mrb[50].mxu0 %v532_v12  ;;  %v910_v12 = vld [vmem:[#allocation4 + $0x6b0] sm:$0xff] }
 0x132   : > { %1491 = vmatprep.mubr.f32.mxu0 %v557_v14  ;;  %v368_v14 = vld [vmem:[%s5516_s7 + $0x1c0] sm:$0xff] }
 0x133   : > { %1632 = vmatmul.mubr.f32.gmra.mrb[50].mxu1 %v534_v13  ;;  %v911_v13 = vld [vmem:[#allocation4 + $0x6b8] sm:$0xff] }
 0x134   : > { %1636 = vmatprep.mubr.f32.mxu1 %v559_v15  ;;  %v942_v15 = vld [vmem:[#allocation4 + $0x7b0] sm:$0xff] }
 0x135   : > { %1492 = vmatmul.mubr.f32.gmra.mrb[52].mxu0 %v556_v16  ;;  %v943_v16 = vld [vmem:[#allocation4 + $0x7b8] sm:$0xff] }
 0x136   : > { %1496 = vmatprep.mubr.f32.mxu0 %v581_v18  ;;  %v393_v18 = vld [vmem:[%s5516_s7 + $0x288] sm:$0xff] }
 0x137   : > { %1637 = vmatmul.mubr.f32.gmra.mrb[52].mxu1 %v558_v17  ;;  %v370_v17 = vld [vmem:[%s5516_s7 + $0x1d0] sm:$0xff] }
 0x138   : > { %1641 = vmatprep.mubr.f32.mxu1 %v583_v19  ;;  %v395_v19 = vld [vmem:[%s5516_s7 + $0x298] sm:$0xff] }
 0x139   : > { %1497 = vmatmul.mubr.f32.gmra.mrb[54].mxu0 %v580_v20  ;;  %v4643_v20 = vpack.c.bf16 %v893_v8, %v892_v7  ;;  %v900_v7 = vld [vmem:[#allocation4 + $0x660] sm:$0xff]  ;;  %v901_v8 = vld [vmem:[#allocation4 + $0x668] sm:$0xff] }
 0x13a   : > { %1501 = vmatprep.mubr.f32.mxu0 %v605_v22  ;;  %v4645_v22 = vpack.c.bf16 %v911_v13, %v910_v12  ;;  %v918_v12 = vld [vmem:[#allocation4 + $0x6f0] sm:$0xff]  ;;  %v919_v13 = vld [vmem:[#allocation4 + $0x6f8] sm:$0xff] }
 0x13b   : > { %1642 = vmatmul.mubr.f32.gmra.mrb[54].mxu1 %v582_v21  ;;  %v4675_v21 = vpack.c.bf16 %v925_v11, %v924_v9  ;;  %v932_v9 = vld [vmem:[#allocation4 + $0x760] sm:$0xff]  ;;  %v933_v11 = vld [vmem:[#allocation4 + $0x768] sm:$0xff] }
 0x13c   : > { %1646 = vmatprep.mubr.f32.mxu1 %v607_v23  ;;  %v894_v23 = vld [vmem:[#allocation4 + $0x630] sm:$0xff] }
 0x13d   : > { %1502 = vmatmul.mubr.f32.gmra.mrb[56].mxu0 %v604_v24  ;;  %v895_v24 = vld [vmem:[#allocation4 + $0x638] sm:$0xff] }
 0x13e   : > { %1506 = vmatprep.mubr.f32.mxu0 %v629_v26  ;;  %v4677_v26 = vpack.c.bf16 %v943_v16, %v942_v15  ;;  %v950_v15 = vld [vmem:[#allocation4 + $0x7f0] sm:$0xff]  ;;  %v951_v16 = vld [vmem:[#allocation4 + $0x7f8] sm:$0xff] }
 0x13f   : > { %1647 = vmatmul.mubr.f32.gmra.mrb[56].mxu1 %v606_v25  ;;  %v926_v25 = vld [vmem:[#allocation4 + $0x730] sm:$0xff] }
 0x140   : > { %1651 = vmatprep.mubr.f32.mxu1 %v631_v27  ;;  %v927_v27 = vld [vmem:[#allocation4 + $0x738] sm:$0xff] }
 0x141   : > { %1507 = vmatmul.mubr.f32.gmra.mrb[58].mxu0 %v628_v28  ;;  %v912_v28 = vld [vmem:[#allocation4 + $0x6c0] sm:$0xff] }
 0x142   : > { %1511 = vmatprep.mubr.f32.mxu0 %v653_v30  ;;  %v392_v30 = vld [vmem:[%s5516_s7 + $0x280] sm:$0xff] }
 0x143   : > { %1652 = vmatmul.mubr.f32.gmra.mrb[58].mxu1 %v630_v29  ;;  %v913_v29 = vld [vmem:[#allocation4 + $0x6c8] sm:$0xff] }
 0x144   : > { %1656 = vmatprep.mubr.f32.mxu1 %v655_v31  ;;  %v944_v31 = vld [vmem:[#allocation4 + $0x7c0] sm:$0xff] }
 0x145   : > { %1512 = vmatmul.mubr.f32.gmra.mrb[60].mxu0 %v652_v32  ;;  %v945_v32 = vld [vmem:[#allocation4 + $0x7c8] sm:$0xff] }
 0x146   : > { %1516 = vmatprep.mubr.f32.mxu0 %v677_v34  ;;  %v417_v34 = vld [vmem:[%s5516_s7 + $0x348] sm:$0xff]  ;;  %v4681_v42 = vpack.c.bf16 %v945_v32, %v944_v31  ;;  %v1000_v31 = vld [vmem:[#allocation4 + $0x980] sm:$0xff] }
 0x147   : > { %1657 = vmatmul.mubr.f32.gmra.mrb[60].mxu1 %v654_v33  ;;  %v394_v33 = vld [vmem:[%s5516_s7 + $0x290] sm:$0xff]  ;;  %v1001_v32 = vld [vmem:[#allocation4 + $0x988] sm:$0xff] }
 0x148   : > { %1661 = vmatprep.mubr.f32.mxu1 %v679_v35  ;;  %v419_v35 = vld [vmem:[%s5516_s7 + $0x358] sm:$0xff] }
 0x149   : > { %1517 = vmatmul.mubr.f32.gmra.mrb[62].mxu0 %v676_v36  ;;  %v4647_v36 = vpack.c.bf16 %v895_v24, %v894_v23  ;;  %v902_v23 = vld [vmem:[#allocation4 + $0x670] sm:$0xff]  ;;  %v903_v24 = vld [vmem:[#allocation4 + $0x678] sm:$0xff] }
 0x14a   : > { %1731 = vmatprep.mubr.f32.mxu0 %v321_v38  ;;  %v4649_v38 = vpack.c.bf16 %v913_v29, %v912_v28  ;;  %v968_v28 = vld [vmem:[#allocation4 + $0x880] sm:$0xff]  ;;  %v969_v29 = vld [vmem:[#allocation4 + $0x888] sm:$0xff] }
 0x14b   : > { %1662 = vmatmul.mubr.f32.gmra.mrb[62].mxu1 %v678_v37  ;;  %v4679_v37 = vpack.c.bf16 %v927_v27, %v926_v25  ;;  %v934_v25 = vld [vmem:[#allocation4 + $0x770] sm:$0xff]  ;;  %v935_v27 = vld [vmem:[#allocation4 + $0x778] sm:$0xff] }
 0x14c   : > { %1876 = vmatprep.mubr.f32.mxu1 %v323_v41  ;;  %v928_v41 = vld [vmem:[#allocation4 + $0x740] sm:$0xff] }
 0x14d   : > { %1732 = vmatmul.mubr.f32.vlgmr.msra.gmra.mrb[64].mxu0 %v320_v46  ;;  %v416_v46 = vld [vmem:[%s5516_s7 + $0x340] sm:$0xff] }
 0x14e   : > { %4636 = vmatpush3.bf16.msra.mxu0 %v4635_v47  ;;  %1736 = vmatprep.mubr.f32.mxu0 %v345_v51  ;;  %v946_v47 = vld [vmem:[#allocation4 + $0x7d0] sm:$0xff]  ;;  %v443_v51 = vld [vmem:[%s5516_s7 + $0x418] sm:$0xff] }
 0x14f   : > { %1877 = vmatmul.mubr.f32.vlgmr.msra.gmra.mrb[64].mxu1 %v322_v50  ;;  %4638 = vmatprep.subr.bf16.mxu0 %v4637_v54  ;;  %v441_v50 = vld [vmem:[%s5516_s7 + $0x408] sm:$0xff]  ;;  %v4653_v54 = vpack.c.bf16 %v915_v45, %v914_v44  ;;  %v536_v44 = vld [vmem:[%s5516_s7 + $0x700] sm:$0xff]  ;;  %v538_v45 = vld [vmem:[%s5516_s7 + $0x710] sm:$0xff] }
 0x150   : > { %4668 = vmatpush3.bf16.msra.mxu1 %v4667_v52  ;;  %1881 = vmatprep.mubr.f32.mxu1 %v347_v53  ;;  %v4651_v52 = vpack.c.bf16 %v897_v40, %v896_v39  ;;  %v4683_v53 = vpack.c.bf16 %v929_v43, %v928_v41  ;;  %v4729_v39 = vpack.c.bf16 %v1001_v32, %v1000_v31  ;;  %v512_v40 = vld [vmem:[%s5516_s7 + $0x640] sm:$0xff]  ;;  %v514_v41 = vld [vmem:[%s5516_s7 + $0x650] sm:$0xff]  ;;  %v539_v43 = vld [vmem:[%s5516_s7 + $0x718] sm:$0xff] }
 0x151   : > { %1737 = vmatmul.mubr.f32.gmra.mrb[66].mxu0 %v344_v62  ;;  %4670 = vmatprep.subr.bf16.mxu1 %v4669_v58  ;;  %v4685_v58 = vpack.c.bf16 %v947_v48, %v946_v47  ;;  %v440_v62 = vld [vmem:[%s5516_s7 + $0x400] sm:$0xff]  ;;  %v563_v47 = vld [vmem:[%s5516_s7 + $0x7d8] sm:$0xff]  ;;  %v1005_v32 = vld [vmem:[#allocation4 + $0x9a8] sm:$0xff] }
 0x152   : > { %1741 = vmatprep.mubr.f32.mxu0 %v369_v2  ;;  %4640 = vmatpush3.bf16.msra.mxu0 %v4639_v4  ;;  %v465_v2 = vld [vmem:[%s5516_s7 + $0x4c8] sm:$0xff]  ;;  %v4655_v4 = vpack.c.bf16 %v899_v56, %v898_v55  ;;  %v560_v48 = vld [vmem:[%s5516_s7 + $0x7c0] sm:$0xff]  ;;  %v611_v55 = vld [vmem:[%s5516_s7 + $0x958] sm:$0xff] }
 0x153   : > { %1882 = vmatmul.mubr.f32.gmra.mrb[66].mxu1 %v346_v1  ;;  %4642 = vmatprep.subr.bf16.mxu0 %v4641_v6  ;;  %v442_v1 = vld [vmem:[%s5516_s7 + $0x410] sm:$0xff]  ;;  %v4657_v6 = vpack.c.bf16 %v917_v61, %v916_v60  ;;  %v608_v56 = vld [vmem:[%s5516_s7 + $0x940] sm:$0xff] }
 0x154   : > { %1886 = vmatprep.mubr.f32.mxu1 %v371_v3  ;;  %4672 = vmatpush3.bf16.msra.mxu1 %v4671_v5  ;;  %v467_v3 = vld [vmem:[%s5516_s7 + $0x4d8] sm:$0xff]  ;;  %v4687_v5 = vpack.c.bf16 %v931_v59, %v930_v57  ;;  %v610_v57 = vld [vmem:[%s5516_s7 + $0x950] sm:$0xff]  ;;  %v632_v60 = vld [vmem:[%s5516_s7 + $0xa00] sm:$0xff] }
 0x155   : > { %1742 = vmatmul.mubr.f32.gmra.mrb[68].mxu0 %v368_v14  ;;  %4674 = vmatprep.subr.bf16.mxu1 %v4673_v10  ;;  %v4689_v10 = vpack.c.bf16 %v949_v0, %v948_v63  ;;  %v464_v14 = vld [vmem:[%s5516_s7 + $0x4c0] sm:$0xff]  ;;  %v635_v59 = vld [vmem:[%s5516_s7 + $0xa18] sm:$0xff]  ;;  %v634_v61 = vld [vmem:[%s5516_s7 + $0xa10] sm:$0xff] }
 0x156   : > { %1746 = vmatprep.mubr.f32.mxu0 %v393_v18  ;;  %4644 = vmatpush3.bf16.msra.mxu0 %v4643_v20  ;;  %v489_v18 = vld [vmem:[%s5516_s7 + $0x588] sm:$0xff]  ;;  %v4659_v20 = vpack.c.bf16 %v901_v8, %v900_v7  ;;  %v659_v63 = vld [vmem:[%s5516_s7 + $0xad8] sm:$0xff]  ;;  %v656_v0 = vld [vmem:[%s5516_s7 + $0xac0] sm:$0xff] }
 0x157   : > { %1887 = vmatmul.mubr.f32.gmra.mrb[68].mxu1 %v370_v17  ;;  %4646 = vmatprep.subr.bf16.mxu0 %v4645_v22  ;;  %v466_v17 = vld [vmem:[%s5516_s7 + $0x4d0] sm:$0xff]  ;;  %v4661_v22 = vpack.c.bf16 %v919_v13, %v918_v12  ;;  %v952_v7 = vld [vmem:[#allocation4 + $0x800] sm:$0xff]  ;;  %v953_v8 = vld [vmem:[#allocation4 + $0x808] sm:$0xff] }
 0x158   : > { %1891 = vmatprep.mubr.f32.mxu1 %v395_v19  ;;  %4676 = vmatpush3.bf16.msra.mxu1 %v4675_v21  ;;  %v491_v19 = vld [vmem:[%s5516_s7 + $0x598] sm:$0xff]  ;;  %v4691_v21 = vpack.c.bf16 %v933_v11, %v932_v9  ;;  %v985_v11 = vld [vmem:[#allocation4 + $0x908] sm:$0xff]  ;;  %v970_v12 = vld [vmem:[#allocation4 + $0x890] sm:$0xff] }
 0x159   : > { %1747 = vmatmul.mubr.f32.gmra.mrb[70].mxu0 %v392_v30  ;;  %4678 = vmatprep.subr.bf16.mxu1 %v4677_v26  ;;  %v4693_v26 = vpack.c.bf16 %v951_v16, %v950_v15  ;;  %v488_v30 = vld [vmem:[%s5516_s7 + $0x580] sm:$0xff]  ;;  %v327_v9 = vld [vmem:[%s5516_s7 + $0x78] sm:$0xff]  ;;  %v4699_v15 = vpack.c.bf16 %v953_v8, %v952_v7  ;;  %v1002_v16 = vld [vmem:[#allocation4 + $0x990] sm:$0xff] }
 0x15a   : > { %1751 = vmatprep.mubr.f32.mxu0 %v417_v34  ;;  %4648 = vmatpush3.bf16.msra.mxu0 %v4647_v36  ;;  %v513_v34 = vld [vmem:[%s5516_s7 + $0x648] sm:$0xff]  ;;  %v515_v36 = vld [vmem:[%s5516_s7 + $0x658] sm:$0xff]  ;;  %v1004_v31 = vld [vmem:[#allocation4 + $0x9a0] sm:$0xff] }
 0x15b   : > { %1892 = vmatmul.mubr.f32.gmra.mrb[70].mxu1 %v394_v33  ;;  %4650 = vmatprep.subr.bf16.mxu0 %v4649_v38  ;;  %v490_v33 = vld [vmem:[%s5516_s7 + $0x590] sm:$0xff]  ;;  %v4697_v38 = vpack.c.bf16 %v969_v29, %v968_v28  ;;  %v971_v13 = vld [vmem:[#allocation4 + $0x898] sm:$0xff]  ;;  %v972_v28 = vld [vmem:[#allocation4 + $0x8a0] sm:$0xff] }
 0x15c   : > { %1896 = vmatprep.mubr.f32.mxu1 %v419_v35  ;;  %4680 = vmatpush3.bf16.msra.mxu1 %v4679_v37  ;;  %v4663_v35 = vpack.c.bf16 %v903_v24, %v902_v23  ;;  %v4695_v37 = vpack.c.bf16 %v935_v27, %v934_v25  ;;  %v954_v23 = vld [vmem:[#allocation4 + $0x810] sm:$0xff]  ;;  %v955_v24 = vld [vmem:[#allocation4 + $0x818] sm:$0xff]  ;;  %v973_v29 = vld [vmem:[#allocation4 + $0x8a8] sm:$0xff] }
 0x15d   : > { %1752 = vmatmul.mubr.f32.gmra.mrb[72].mxu0 %v416_v46  ;;  %4682 = vmatprep.subr.bf16.mxu1 %v4681_v42  ;;  %v537_v42 = vld [vmem:[%s5516_s7 + $0x708] sm:$0xff]  ;;  %v986_v25 = vld [vmem:[#allocation4 + $0x910] sm:$0xff]  ;;  %v987_v27 = vld [vmem:[#allocation4 + $0x918] sm:$0xff] }
 0x15e   : > { %1756 = vmatprep.mubr.f32.mxu0 %v441_v50  ;;  %4652 = vmatpush3.bf16.msra.mxu0 %v4651_v52  ;;  %v561_v46 = vld [vmem:[%s5516_s7 + $0x7c8] sm:$0xff]  ;;  %v584_v52 = vld [vmem:[%s5516_s7 + $0x880] sm:$0xff] }
 0x15f   : > { %1897 = vmatmul.mubr.f32.gmra.mrb[72].mxu1 %v418_v49  ;;  %4654 = vmatprep.subr.bf16.mxu0 %v4653_v54  ;;  %v562_v49 = vld [vmem:[%s5516_s7 + $0x7d0] sm:$0xff]  ;;  %v585_v50 = vld [vmem:[%s5516_s7 + $0x888] sm:$0xff]  ;;  %v960_v7 = vld [vmem:[#allocation4 + $0x840] sm:$0xff] }
 0x160   : > { %1901 = vmatprep.mubr.f32.mxu1 %v443_v51  ;;  %4684 = vmatpush3.bf16.msra.mxu1 %v4683_v53  ;;  %v587_v51 = vld [vmem:[%s5516_s7 + $0x898] sm:$0xff]  ;;  %v586_v53 = vld [vmem:[%s5516_s7 + $0x890] sm:$0xff]  ;;  %v609_v54 = vld [vmem:[%s5516_s7 + $0x948] sm:$0xff] }
 0x161   : > { %1757 = vmatmul.mubr.f32.gmra.mrb[74].mxu0 %v440_v62  ;;  %4686 = vmatprep.subr.bf16.mxu1 %v4685_v58  ;;  %v633_v58 = vld [vmem:[%s5516_s7 + $0xa08] sm:$0xff] }
 0x162   : > { %1761 = vmatprep.mubr.f32.mxu0 %v465_v2  ;;  %4656 = vmatpush3.bf16.msra.mxu0 %v4655_v4  ;;  %v657_v62 = vld [vmem:[%s5516_s7 + $0xac8] sm:$0xff]  ;;  %v680_v4 = vld [vmem:[%s5516_s7 + $0xb80] sm:$0xff] }
 0x163   : > { %1902 = vmatmul.mubr.f32.gmra.mrb[74].mxu1 %v442_v1  ;;  %4658 = vmatprep.subr.bf16.mxu0 %v4657_v6  ;;  %v658_v1 = vld [vmem:[%s5516_s7 + $0xad0] sm:$0xff]  ;;  %v681_v2 = vld [vmem:[%s5516_s7 + $0xb88] sm:$0xff] }
 0x164   : > { %1906 = vmatprep.mubr.f32.mxu1 %v467_v3  ;;  %4688 = vmatpush3.bf16.msra.mxu1 %v4687_v5  ;;  %v683_v3 = vld [vmem:[%s5516_s7 + $0xb98] sm:$0xff]  ;;  %v682_v5 = vld [vmem:[%s5516_s7 + $0xb90] sm:$0xff]  ;;  %v325_v6 = vld [vmem:[%s5516_s7 + $0x68] sm:$0xff] }
 0x165   : > { %1762 = vmatmul.mubr.f32.gmra.mrb[76].mxu0 %v464_v14  ;;  %4690 = vmatprep.subr.bf16.mxu1 %v4689_v10  ;;  %v984_v10 = vld [vmem:[#allocation4 + $0x900] sm:$0xff]  ;;  %v961_v8 = vld [vmem:[#allocation4 + $0x848] sm:$0xff] }
 0x166   : > { %1766 = vmatprep.mubr.f32.mxu0 %v489_v18  ;;  %4660 = vmatpush3.bf16.msra.mxu0 %v4659_v20  ;;  %v324_v14 = vld [vmem:[%s5516_s7 + $0x60] sm:$0xff]  ;;  %v326_v18 = vld [vmem:[%s5516_s7 + $0x70] sm:$0xff]  ;;  %v4731_v20 = vpack.c.bf16 %v985_v11, %v984_v10  ;;  %v993_v11 = vld [vmem:[#allocation4 + $0x948] sm:$0xff] }
 0x167   : > { %1907 = vmatmul.mubr.f32.gmra.mrb[76].mxu1 %v466_v17  ;;  %4662 = vmatprep.subr.bf16.mxu0 %v4661_v22  ;;  %v1003_v17 = vld [vmem:[#allocation4 + $0x998] sm:$0xff]  ;;  %v4701_v22 = vpack.c.bf16 %v971_v13, %v970_v12  ;;  %v978_v12 = vld [vmem:[#allocation4 + $0x8d0] sm:$0xff] }
 0x168   : > { %1911 = vmatprep.mubr.f32.mxu1 %v491_v19  ;;  %4692 = vmatpush3.bf16.msra.mxu1 %v4691_v21  ;;  %v349_v19 = vld [vmem:[%s5516_s7 + $0x128] sm:$0xff]  ;;  %v351_v21 = vld [vmem:[%s5516_s7 + $0x138] sm:$0xff] }
 0x169   : > { %1767 = vmatmul.mubr.f32.gmra.mrb[78].mxu0 %v488_v30  ;;  %4694 = vmatprep.subr.bf16.mxu1 %v4693_v26  ;;  %v4733_v26 = vpack.c.bf16 %v1003_v17, %v1002_v16  ;;  %v348_v30 = vld [vmem:[%s5516_s7 + $0x120] sm:$0xff]  ;;  %v979_v13 = vld [vmem:[#allocation4 + $0x8d8] sm:$0xff]  ;;  %v422_v17 = vld [vmem:[%s5516_s7 + $0x370] sm:$0xff] }
 0x16a   : > { %1771 = vmatprep.mubr.f32.mxu0 %v513_v34  ;;  %4664 = vmatpush3.bf16.msra.mxu0 %v4663_v35  ;;  %v373_v34 = vld [vmem:[%s5516_s7 + $0x1e8] sm:$0xff]  ;;  %v375_v35 = vld [vmem:[%s5516_s7 + $0x1f8] sm:$0xff] }
 0x16b   : > { %1912 = vmatmul.mubr.f32.gmra.mrb[78].mxu1 %v490_v33  ;;  %4698 = vmatprep.subr.bf16.mxu0 %v4697_v38  ;;  %v350_v33 = vld [vmem:[%s5516_s7 + $0x130] sm:$0xff]  ;;  %v4705_v38 = vpack.c.bf16 %v973_v29, %v972_v28  ;;  %v1011_v16 = vld [vmem:[#allocation4 + $0x9d8] sm:$0xff]  ;;  %v980_v28 = vld [vmem:[#allocation4 + $0x8e0] sm:$0xff] }
 0x16c   : > { %1916 = vmatprep.mubr.f32.mxu1 %v515_v36  ;;  %4696 = vmatpush3.bf16.msra.mxu1 %v4695_v37  ;;  %v4703_v36 = vpack.c.bf16 %v955_v24, %v954_v23  ;;  %v4735_v37 = vpack.c.bf16 %v987_v27, %v986_v25  ;;  %v962_v23 = vld [vmem:[#allocation4 + $0x850] sm:$0xff]  ;;  %v963_v24 = vld [vmem:[#allocation4 + $0x858] sm:$0xff]  ;;  %v981_v29 = vld [vmem:[#allocation4 + $0x8e8] sm:$0xff] }
 0x16d   : > { %1772 = vmatmul.mubr.f32.gmra.mrb[80].mxu0 %v512_v40  ;;  %4730 = vmatprep.subr.bf16.mxu1 %v4729_v39  ;;  %v956_v39 = vld [vmem:[#allocation4 + $0x820] sm:$0xff]  ;;  %v957_v40 = vld [vmem:[#allocation4 + $0x828] sm:$0xff]  ;;  %v994_v25 = vld [vmem:[#allocation4 + $0x950] sm:$0xff] }
 0x16e   : > { %1776 = vmatprep.mubr.f32.mxu0 %v537_v42  ;;  %v4737_v42 = vpack.c.bf16 %v1005_v32, %v1004_v31  ;;  %v995_v27 = vld [vmem:[#allocation4 + $0x958] sm:$0xff]  ;;  %v1012_v31 = vld [vmem:[#allocation4 + $0x9e0] sm:$0xff]  ;;  %v1013_v32 = vld [vmem:[#allocation4 + $0x9e8] sm:$0xff] }
 0x16f   : > { %1917 = vmatmul.mubr.f32.gmra.mrb[80].mxu1 %v514_v41  ;;  %v988_v41 = vld [vmem:[#allocation4 + $0x920] sm:$0xff] }
 0x170   : > { %1921 = vmatprep.mubr.f32.mxu1 %v539_v43  ;;  %v989_v43 = vld [vmem:[#allocation4 + $0x928] sm:$0xff] }
 0x171   : > { %1777 = vmatmul.mubr.f32.gmra.mrb[82].mxu0 %v536_v44  ;;  %v974_v44 = vld [vmem:[#allocation4 + $0x8b0] sm:$0xff] }
 0x172   : > { %1781 = vmatprep.mubr.f32.mxu0 %v561_v46  ;;  %v372_v46 = vld [vmem:[%s5516_s7 + $0x1e0] sm:$0xff] }
 0x173   : > { %1922 = vmatmul.mubr.f32.gmra.mrb[82].mxu1 %v538_v45  ;;  %v975_v45 = vld [vmem:[#allocation4 + $0x8b8] sm:$0xff] }
 0x174   : > { %1926 = vmatprep.mubr.f32.mxu1 %v563_v47  ;;  %v1006_v47 = vld [vmem:[#allocation4 + $0x9b0] sm:$0xff] }
 0x175   : > { %1782 = vmatmul.mubr.f32.gmra.mrb[84].mxu0 %v560_v48  ;;  %v1007_v48 = vld [vmem:[#allocation4 + $0x9b8] sm:$0xff] }
 0x176   : > { %1786 = vmatprep.mubr.f32.mxu0 %v585_v50  ;;  %v397_v50 = vld [vmem:[%s5516_s7 + $0x2a8] sm:$0xff] }
 0x177   : > { %1927 = vmatmul.mubr.f32.gmra.mrb[84].mxu1 %v562_v49  ;;  %v374_v49 = vld [vmem:[%s5516_s7 + $0x1f0] sm:$0xff] }
 0x178   : > { %1931 = vmatprep.mubr.f32.mxu1 %v587_v51  ;;  %v399_v51 = vld [vmem:[%s5516_s7 + $0x2b8] sm:$0xff] }
 0x179   : > { %1787 = vmatmul.mubr.f32.gmra.mrb[86].mxu0 %v584_v52  ;;  %v4707_v52 = vpack.c.bf16 %v957_v40, %v956_v39  ;;  %v4751_v39 = vpack.c.bf16 %v995_v27, %v994_v25  ;;  %v4721_v40 = vpack.c.bf16 %v981_v29, %v980_v28 }
 0x17a   : > { %1791 = vmatprep.mubr.f32.mxu0 %v609_v54  ;;  %v4709_v54 = vpack.c.bf16 %v975_v45, %v974_v44 }
 0x17b   : > { %1932 = vmatmul.mubr.f32.gmra.mrb[86].mxu1 %v586_v53  ;;  %v4739_v53 = vpack.c.bf16 %v989_v43, %v988_v41  ;;  %v964_v41 = vld [vmem:[#allocation4 + $0x860] sm:$0xff] }
 0x17c   : > { %1936 = vmatprep.mubr.f32.mxu1 %v611_v55  ;;  %v958_v55 = vld [vmem:[#allocation4 + $0x830] sm:$0xff]  ;;  %v996_v43 = vld [vmem:[#allocation4 + $0x960] sm:$0xff] }
 0x17d   : > { %1792 = vmatmul.mubr.f32.gmra.mrb[88].mxu0 %v608_v56  ;;  %v959_v56 = vld [vmem:[#allocation4 + $0x838] sm:$0xff] }
 0x17e   : > { %1796 = vmatprep.mubr.f32.mxu0 %v633_v58  ;;  %v4741_v58 = vpack.c.bf16 %v1007_v48, %v1006_v47  ;;  %v997_v47 = vld [vmem:[#allocation4 + $0x968] sm:$0xff]  ;;  %v982_v48 = vld [vmem:[#allocation4 + $0x8f0] sm:$0xff] }
 0x17f   : > { %1937 = vmatmul.mubr.f32.gmra.mrb[88].mxu1 %v610_v57  ;;  %v990_v57 = vld [vmem:[#allocation4 + $0x930] sm:$0xff] }
 0x180   : > { %1941 = vmatprep.mubr.f32.mxu1 %v635_v59  ;;  %v991_v59 = vld [vmem:[#allocation4 + $0x938] sm:$0xff] }
 0x181   : > { %1797 = vmatmul.mubr.f32.gmra.mrb[90].mxu0 %v632_v60  ;;  %v976_v60 = vld [vmem:[#allocation4 + $0x8c0] sm:$0xff] }
 0x182   : > { %1801 = vmatprep.mubr.f32.mxu0 %v657_v62  ;;  %v396_v62 = vld [vmem:[%s5516_s7 + $0x2a0] sm:$0xff] }
 0x183   : > { %1942 = vmatmul.mubr.f32.gmra.mrb[90].mxu1 %v634_v61  ;;  %v977_v61 = vld [vmem:[#allocation4 + $0x8c8] sm:$0xff] }
 0x184   : > { %1946 = vmatprep.mubr.f32.mxu1 %v659_v63  ;;  %v1008_v63 = vld [vmem:[#allocation4 + $0x9c0] sm:$0xff] }
 0x185   : > { %1802 = vmatmul.mubr.f32.gmra.mrb[92].mxu0 %v656_v0  ;;  %v1009_v0 = vld [vmem:[#allocation4 + $0x9c8] sm:$0xff] }
 0x186   : > { %1806 = vmatprep.mubr.f32.mxu0 %v681_v2  ;;  %v421_v2 = vld [vmem:[%s5516_s7 + $0x368] sm:$0xff]  ;;  %v4745_v10 = vpack.c.bf16 %v1009_v0, %v1008_v63  ;;  %v966_v0 = vld [vmem:[#allocation4 + $0x870] sm:$0xff] }
 0x187   : > { %1947 = vmatmul.mubr.f32.gmra.mrb[92].mxu1 %v658_v1  ;;  %v398_v1 = vld [vmem:[%s5516_s7 + $0x2b0] sm:$0xff] }
 0x188   : > { %1951 = vmatprep.mubr.f32.mxu1 %v683_v3  ;;  %v423_v3 = vld [vmem:[%s5516_s7 + $0x378] sm:$0xff] }
 0x189   : > { %1807 = vmatmul.mubr.f32.gmra.mrb[94].mxu0 %v680_v4  ;;  %v4711_v4 = vpack.c.bf16 %v959_v56, %v958_v55  ;;  %v470_v56 = vld [vmem:[%s5516_s7 + $0x4f0] sm:$0xff] }
 0x18a   : > { %2021 = vmatprep.mubr.f32.mxu0 %v325_v6  ;;  %v4713_v6 = vpack.c.bf16 %v977_v61, %v976_v60 }
 0x18b   : > { %1952 = vmatmul.mubr.f32.gmra.mrb[94].mxu1 %v682_v5  ;;  %v4743_v5 = vpack.c.bf16 %v991_v59, %v990_v57  ;;  %v493_v57 = vld [vmem:[%s5516_s7 + $0x5a8] sm:$0xff] }
 0x18c   : > { %2166 = vmatprep.mubr.f32.mxu1 %v327_v9  ;;  %v992_v9 = vld [vmem:[#allocation4 + $0x940] sm:$0xff] }
 0x18d   : > { %2022 = vmatmul.mubr.f32.vlgmr.msra.gmra.mrb[96].mxu0 %v324_v14  ;;  %v420_v14 = vld [vmem:[%s5516_s7 + $0x360] sm:$0xff] }
 0x18e   : > { %4700 = vmatpush3.bf16.msra.mxu0 %v4699_v15  ;;  %2026 = vmatprep.mubr.f32.mxu0 %v349_v19  ;;  %v1010_v15 = vld [vmem:[#allocation4 + $0x9d0] sm:$0xff]  ;;  %v447_v19 = vld [vmem:[%s5516_s7 + $0x438] sm:$0xff] }
 0x18f   : > { %2167 = vmatmul.mubr.f32.vlgmr.msra.gmra.mrb[96].mxu1 %v326_v18  ;;  %4702 = vmatprep.subr.bf16.mxu0 %v4701_v22  ;;  %v445_v18 = vld [vmem:[%s5516_s7 + $0x428] sm:$0xff]  ;;  %v4717_v22 = vpack.c.bf16 %v979_v13, %v978_v12  ;;  %v492_v12 = vld [vmem:[%s5516_s7 + $0x5a0] sm:$0xff] }
 0x190   : > { %4732 = vmatpush3.bf16.msra.mxu1 %v4731_v20  ;;  %2171 = vmatprep.mubr.f32.mxu1 %v351_v21  ;;  %v4715_v20 = vpack.c.bf16 %v961_v8, %v960_v7  ;;  %v4747_v21 = vpack.c.bf16 %v993_v11, %v992_v9  ;;  %v1032_v7 = vld [vmem:[#allocation4 + $0xa80] sm:$0xff]  ;;  %v1033_v8 = vld [vmem:[#allocation4 + $0xa88] sm:$0xff] }
 0x191   : > { %2027 = vmatmul.mubr.f32.gmra.mrb[98].mxu0 %v348_v30  ;;  %4734 = vmatprep.subr.bf16.mxu1 %v4733_v26  ;;  %v4749_v26 = vpack.c.bf16 %v1011_v16, %v1010_v15  ;;  %v444_v30 = vld [vmem:[%s5516_s7 + $0x420] sm:$0xff]  ;;  %v494_v16 = vld [vmem:[%s5516_s7 + $0x5b0] sm:$0xff] }
 0x192   : > { %2031 = vmatprep.mubr.f32.mxu0 %v373_v34  ;;  %4704 = vmatpush3.bf16.msra.mxu0 %v4703_v36  ;;  %v446_v34 = vld [vmem:[%s5516_s7 + $0x430] sm:$0xff]  ;;  %v471_v36 = vld [vmem:[%s5516_s7 + $0x4f8] sm:$0xff]  ;;  %v1064_v13 = vld [vmem:[#allocation4 + $0xb80] sm:$0xff] }
 0x193   : > { %2172 = vmatmul.mubr.f32.gmra.mrb[98].mxu1 %v350_v33  ;;  %4706 = vmatprep.subr.bf16.mxu0 %v4705_v38  ;;  %v5745_v33 = vld [vmem:[#allocation6] ss:$0 sm:$0xff] }
 0x194   : > { %2176 = vmatprep.mubr.f32.mxu1 %v375_v35  ;;  %4736 = vmatpush3.bf16.msra.mxu1 %v4735_v37  ;;  %v469_v35 = vld [vmem:[%s5516_s7 + $0x4e8] sm:$0xff]  ;;  %v4719_v37 = vpack.c.bf16 %v963_v24, %v962_v23  ;;  %v4761_v23 = vpack.c.bf16 %v1033_v8, %v1032_v7 }
 0x195   : > { %2032 = vmatmul.mubr.f32.gmra.mrb[100].mxu0 %v372_v46  ;;  %4738 = vmatprep.subr.bf16.mxu1 %v4737_v42  ;;  %v965_v42 = vld [vmem:[#allocation4 + $0x868] sm:$0xff]  ;;  %v4753_v46 = vpack.c.bf16 %v1013_v32, %v1012_v31  ;;  %v518_v32 = vld [vmem:[%s5516_s7 + $0x670] sm:$0xff] }
 0x196   : > { %2036 = vmatprep.mubr.f32.mxu0 %v397_v50  ;;  %4708 = vmatpush3.bf16.msra.mxu0 %v4707_v52  ;;  %v468_v52 = vld [vmem:[%s5516_s7 + $0x4e0] sm:$0xff]  ;;  %v4723_v59 = vpack.c.bf16 %v965_v42, %v964_v41 }
 0x197   : > { %2177 = vmatmul.mubr.f32.gmra.mrb[100].mxu1 %v374_v49  ;;  %4710 = vmatprep.subr.bf16.mxu0 %v4709_v54  ;;  %v983_v49 = vld [vmem:[#allocation4 + $0x8f8] sm:$0xff] }
 0x198   : > { %2181 = vmatprep.mubr.f32.mxu1 %v399_v51  ;;  %4740 = vmatpush3.bf16.msra.mxu1 %v4739_v53  ;;  %v1014_v53 = vld [vmem:[#allocation4 + $0x9f0] sm:$0xff]  ;;  %v1015_v54 = vld [vmem:[#allocation4 + $0x9f8] sm:$0xff]  ;;  %v4725_v63 = vpack.c.bf16 %v983_v49, %v982_v48 }
 0x199   : > { %2037 = vmatmul.mubr.f32.gmra.mrb[102].mxu0 %v396_v62  ;;  %4742 = vmatprep.subr.bf16.mxu1 %v4741_v58  ;;  %v495_v58 = vld [vmem:[%s5516_s7 + $0x5b8] sm:$0xff]  ;;  %v4755_v62 = vpack.c.bf16 %v997_v47, %v996_v43  ;;  %v540_v43 = vld [vmem:[%s5516_s7 + $0x720] sm:$0xff] }
 0x19a   : > { %2041 = vmatprep.mubr.f32.mxu0 %v421_v2  ;;  %4712 = vmatpush3.bf16.msra.mxu0 %v4711_v4  ;;  %v998_v2 = vld [vmem:[#allocation4 + $0x970] sm:$0xff]  ;;  %v567_v49 = vld [vmem:[%s5516_s7 + $0x7f8] sm:$0xff] }
 0x19b   : > { %2182 = vmatmul.mubr.f32.gmra.mrb[102].mxu1 %v398_v1  ;;  %4714 = vmatprep.subr.bf16.mxu0 %v4713_v6  ;;  %v967_v1 = vld [vmem:[#allocation4 + $0x878] sm:$0xff] }
 0x19c   : > { %2186 = vmatprep.mubr.f32.mxu1 %v423_v3  ;;  %4744 = vmatpush3.bf16.msra.mxu1 %v4743_v5  ;;  %v4757_v5 = vpack.c.bf16 %v1015_v54, %v1014_v53  ;;  %v999_v6 = vld [vmem:[#allocation4 + $0x978] sm:$0xff] }
 0x19d   : > { %2042 = vmatmul.mubr.f32.gmra.mrb[104].mxu0 %v420_v14  ;;  %4746 = vmatprep.subr.bf16.mxu1 %v4745_v10  ;;  %v1065_v14 = vld [vmem:[#allocation4 + $0xb88] sm:$0xff] }
 0x19e   : > { %2046 = vmatprep.mubr.f32.mxu0 %v445_v18  ;;  %4716 = vmatpush3.bf16.msra.mxu0 %v4715_v20  ;;  %v4727_v18 = vpack.c.bf16 %v967_v1, %v966_v0 }
 0x19f   : > { %2187 = vmatmul.mubr.f32.gmra.mrb[104].mxu1 %v422_v17  ;;  %4718 = vmatprep.subr.bf16.mxu0 %v4717_v22  ;;  %v517_v17 = vld [vmem:[%s5516_s7 + $0x668] sm:$0xff]  ;;  %v4759_v22 = vpack.c.bf16 %v999_v6, %v998_v2 }
 0x1a0   : > { %2191 = vmatprep.mubr.f32.mxu1 %v447_v19  ;;  %v3425_v38 = vpop.f32.mrb[0].mxu0  ;;  %4748 = vmatpush3.bf16.msra.mxu1 %v4747_v21  ;;  %v519_v21 = vld [vmem:[%s5516_s7 + $0x678] sm:$0xff]  ;;  %v613_v6 = vld [vmem:[%s5516_s7 + $0x968] sm:$0xff] }
 0x1a1   : > { %v3426_v44 = vpop.f32.mrb[1].mxu0  ;;  %2047 = vmatmul.mubr.f32.gmra.mrb[106].mxu0 %v444_v30  ;;  %4750 = vmatprep.subr.bf16.mxu1 %v4749_v26  ;;  %v4793_v26 = vpack.c.bf16 %v1065_v14, %v1064_v13  ;;  %v516_v30 = vld [vmem:[%s5516_s7 + $0x660] sm:$0xff] }
 0x1a2   : > { %v3505_v45 = vpop.f32.mrb[0].mxu1  ;;  %v3427_v50 = vadd.f32 %v3426_v44, %v3425_v38  ;;  %2051 = vmatprep.mubr.f32.mxu0 %v469_v35  ;;  %4720 = vmatpush3.bf16.msra.mxu0 %v4719_v37  ;;  %v543_v37 = vld [vmem:[%s5516_s7 + $0x738] sm:$0xff] }
 0x1a3   : > { %v3506_v51 = vpop.f32.mrb[1].mxu1  ;;  %2192 = vmatmul.mubr.f32.gmra.mrb[106].mxu1 %v446_v34  ;;  %4722 = vmatprep.subr.bf16.mxu0 %v4721_v40  ;;  %v541_v34 = vld [vmem:[%s5516_s7 + $0x728] sm:$0xff] }
 0x1a4   : > { %v3507_v55 = vadd.f32 %v3506_v51, %v3505_v45  ;;  %2196 = vmatprep.mubr.f32.mxu1 %v471_v36  ;;  %v1154_v60 = vadd.f32 %v3427_v50, %v5745_v33  ;;  %v3428_v61 = vpop.f32.mrb[2].mxu0  ;;  %4752 = vmatpush3.bf16.msra.mxu1 %v4751_v39  ;;  %v542_v45 = vld [vmem:[%s5516_s7 + $0x730] sm:$0xff] }
 0x1a5   : > { %v3429_v3 = vpop.f32.mrb[3].mxu0  ;;  %2052 = vmatmul.mubr.f32.gmra.mrb[108].mxu0 %v468_v52  ;;  %4754 = vmatprep.subr.bf16.mxu1 %v4753_v46  ;;  %v565_v46 = vld [vmem:[%s5516_s7 + $0x7e8] sm:$0xff] }
 0x1a6   : > { %v3508_v4 = vpop.f32.mrb[2].mxu1  ;;  %v5755_v9 = vadd.f32 %v3507_v55, %v1154_v60  ;;  %v3430_v10 = vadd.f32 %v3429_v3, %v3428_v61  ;;  %2056 = vmatprep.mubr.f32.mxu0 %v493_v57  ;;  %4724 = vmatpush3.bf16.msra.mxu0 %v4723_v59  ;;  %v564_v55 = vld [vmem:[%s5516_s7 + $0x7e0] sm:$0xff]  ;;  %v566_v57 = vld [vmem:[%s5516_s7 + $0x7f0] sm:$0xff]  ;;  %v591_v61 = vld [vmem:[%s5516_s7 + $0x8b8] sm:$0xff] }
 0x1a7   : > { %v3509_v11 = vpop.f32.mrb[3].mxu1  ;;  %2197 = vmatmul.mubr.f32.gmra.mrb[108].mxu1 %v470_v56  ;;  %4726 = vmatprep.subr.bf16.mxu0 %v4725_v63  ;;  %v588_v3 = vld [vmem:[%s5516_s7 + $0x8a0] sm:$0xff] }
 0x1a8   : > { %v3510_v15 = vadd.f32 %v3509_v11, %v3508_v4  ;;  %2201 = vmatprep.mubr.f32.mxu1 %v495_v58  ;;  %v1159_v19 = vadd.f32 %v3430_v10, %v5745_v33  ;;  %v3431_v20 = vpop.f32.mrb[4].mxu0  ;;  %4756 = vmatpush3.bf16.msra.mxu1 %v4755_v62  ;;  %v589_v58 = vld [vmem:[%s5516_s7 + $0x8a8] sm:$0xff]  ;;  %v615_v10 = vld [vmem:[%s5516_s7 + $0x978] sm:$0xff] }
 0x1a9   : > { %v3432_v24 = vpop.f32.mrb[5].mxu0  ;;  %2057 = vmatmul.mubr.f32.gmra.mrb[110].mxu0 %v492_v12  ;;  %4758 = vmatprep.subr.bf16.mxu1 %v4757_v5  ;;  %v590_v5 = vld [vmem:[%s5516_s7 + $0x8b0] sm:$0xff] }
 0x1aa   : > { %v3511_v25 = vpop.f32.mrb[4].mxu1  ;;  %v5762_v27 = vadd.f32 %v3510_v15, %v1159_v19  ;;  %v3433_v28 = vadd.f32 %v3432_v24, %v3431_v20  ;;  %2061 = vmatprep.mubr.f32.mxu0 %v517_v17  ;;  %4728 = vmatpush3.bf16.msra.mxu0 %v4727_v18  ;;  %v614_v18 = vld [vmem:[%s5516_s7 + $0x970] sm:$0xff]  ;;  %v637_v19 = vld [vmem:[%s5516_s7 + $0xa28] sm:$0xff] }
 0x1ab   : > { %v3512_v29 = vpop.f32.mrb[5].mxu1  ;;  %2202 = vmatmul.mubr.f32.gmra.mrb[110].mxu1 %v494_v16  ;;  %4762 = vmatprep.subr.bf16.mxu0 %v4761_v23  ;;  %v612_v16 = vld [vmem:[%s5516_s7 + $0x960] sm:$0xff] }
 0x1ac   : > { %v3513_v31 = vadd.f32 %v3512_v29, %v3511_v25  ;;  %2206 = vmatprep.mubr.f32.mxu1 %v519_v21  ;;  %v1164_v35 = vadd.f32 %v3433_v28, %v5745_v33  ;;  %v3434_v36 = vpop.f32.mrb[6].mxu0  ;;  %4760 = vmatpush3.bf16.msra.mxu1 %v4759_v22  ;;  %v639_v22 = vld [vmem:[%s5516_s7 + $0xa38] sm:$0xff]  ;;  %v636_v29 = vld [vmem:[%s5516_s7 + $0xa20] sm:$0xff] }
 0x1ad   : > { %v3435_v38 = vpop.f32.mrb[7].mxu0  ;;  %2062 = vmatmul.mubr.f32.gmra.mrb[112].mxu0 %v516_v30  ;;  %4794 = vmatprep.subr.bf16.mxu1 %v4793_v26 }
 0x1ae   : > { %v3514_v39 = vpop.f32.mrb[6].mxu1  ;;  %v5769_v40 = vadd.f32 %v3513_v31, %v1164_v35  ;;  %v3436_v41 = vadd.f32 %v3435_v38, %v3434_v36  ;;  %2066 = vmatprep.mubr.f32.mxu0 %v541_v34  ;;  %v638_v31 = vld [vmem:[%s5516_s7 + $0xa30] sm:$0xff]  ;;  %v663_v36 = vld [vmem:[%s5516_s7 + $0xaf8] sm:$0xff] }
 0x1af   : > { %v3515_v42 = vpop.f32.mrb[7].mxu1  ;;  %2207 = vmatmul.mubr.f32.gmra.mrb[112].mxu1 %v518_v32  ;;  %v661_v32 = vld [vmem:[%s5516_s7 + $0xae8] sm:$0xff] }
 0x1b0   : > { %v3516_v44 = vadd.f32 %v3515_v42, %v3514_v39  ;;  %2211 = vmatprep.mubr.f32.mxu1 %v543_v37  ;;  %v1169_v47 = vadd.f32 %v3436_v41, %v5745_v33  ;;  %v3437_v48 = vpop.f32.mrb[8].mxu0 }
 0x1b1   : > { %v3438_v50 = vpop.f32.mrb[9].mxu0  ;;  %2067 = vmatmul.mubr.f32.gmra.mrb[114].mxu0 %v540_v43  ;;  %v660_v43 = vld [vmem:[%s5516_s7 + $0xae0] sm:$0xff] }
 0x1b2   : > { %v3517_v51 = vpop.f32.mrb[8].mxu1  ;;  %v5776_v52 = vadd.f32 %v3516_v44, %v1169_v47  ;;  %v3439_v53 = vadd.f32 %v3438_v50, %v3437_v48  ;;  %2071 = vmatprep.mubr.f32.mxu0 %v565_v46  ;;  %v685_v46 = vld [vmem:[%s5516_s7 + $0xba8] sm:$0xff] }
 0x1b3   : > { %v3518_v54 = vpop.f32.mrb[9].mxu1  ;;  %2212 = vmatmul.mubr.f32.gmra.mrb[114].mxu1 %v542_v45  ;;  %v662_v45 = vld [vmem:[%s5516_s7 + $0xaf0] sm:$0xff] }
 0x1b4   : > { %v3519_v56 = vadd.f32 %v3518_v54, %v3517_v51  ;;  %2216 = vmatprep.mubr.f32.mxu1 %v567_v49  ;;  %v1174_v59 = vadd.f32 %v3439_v53, %v5745_v33  ;;  %v3440_v60 = vpop.f32.mrb[10].mxu0  ;;  %v687_v49 = vld [vmem:[%s5516_s7 + $0xbb8] sm:$0xff] }
 0x1b5   : > { %v3441_v62 = vpop.f32.mrb[11].mxu0  ;;  %2072 = vmatmul.mubr.f32.gmra.mrb[116].mxu0 %v564_v55 }
 0x1b6   : > { %v3520_v63 = vpop.f32.mrb[10].mxu1  ;;  %v5783_v0 = vadd.f32 %v3519_v56, %v1174_v59  ;;  %v3442_v1 = vadd.f32 %v3441_v62, %v3440_v60  ;;  %2076 = vmatprep.mubr.f32.mxu0 %v589_v58  ;;  %v684_v56 = vld [vmem:[%s5516_s7 + $0xba0] sm:$0xff]  ;;  %v329_v59 = vld [vmem:[%s5516_s7 + $0x88] sm:$0xff] }
 0x1b7   : > { %v3521_v2 = vpop.f32.mrb[11].mxu1  ;;  %2217 = vmatmul.mubr.f32.gmra.mrb[116].mxu1 %v566_v57  ;;  %v686_v57 = vld [vmem:[%s5516_s7 + $0xbb0] sm:$0xff]  ;;  %v1016_v60 = vld [vmem:[#allocation4 + $0xa00] sm:$0xff] }
 0x1b8   : > { %v3522_v4 = vadd.f32 %v3521_v2, %v3520_v63  ;;  %2221 = vmatprep.mubr.f32.mxu1 %v591_v61  ;;  %v1179_v7 = vadd.f32 %v3442_v1, %v5745_v33  ;;  %v3443_v8 = vpop.f32.mrb[12].mxu0  ;;  %v1017_v61 = vld [vmem:[#allocation4 + $0xa08] sm:$0xff]  ;;  %v331_v1 = vld [vmem:[%s5516_s7 + $0x98] sm:$0xff]  ;;  %v1048_v2 = vld [vmem:[#allocation4 + $0xb00] sm:$0xff] }
 0x1b9   : > { %v3444_v11 = vpop.f32.mrb[13].mxu0  ;;  %2077 = vmatmul.mubr.f32.gmra.mrb[118].mxu0 %v588_v3  ;;  %v1049_v3 = vld [vmem:[#allocation4 + $0xb08] sm:$0xff] }
 0x1ba   : > { %v3523_v12 = vpop.f32.mrb[12].mxu1  ;;  %v5790_v13 = vadd.f32 %v3522_v4, %v1179_v7  ;;  %v3445_v14 = vadd.f32 %v3444_v11, %v3443_v8  ;;  %2081 = vmatprep.mubr.f32.mxu0 %v613_v6  ;;  %v1034_v6 = vld [vmem:[#allocation4 + $0xa90] sm:$0xff]  ;;  %v1035_v7 = vld [vmem:[#allocation4 + $0xa98] sm:$0xff] }
 0x1bb   : > { %v3524_v15 = vpop.f32.mrb[13].mxu1  ;;  %2222 = vmatmul.mubr.f32.gmra.mrb[118].mxu1 %v590_v5 }
 0x1bc   : > { %v3525_v17 = vadd.f32 %v3524_v15, %v3523_v12  ;;  %2226 = vmatprep.mubr.f32.mxu1 %v615_v10  ;;  %v1184_v20 = vadd.f32 %v3445_v14, %v5745_v33  ;;  %v3446_v21 = vpop.f32.mrb[14].mxu0  ;;  %v328_v12 = vld [vmem:[%s5516_s7 + $0x80] sm:$0xff]  ;;  %v4763_v14 = vpack.c.bf16 %v1017_v61, %v1016_v60  ;;  %v1066_v15 = vld [vmem:[#allocation4 + $0xb90] sm:$0xff] }
 0x1bd   : > { %v3447_v23 = vpop.f32.mrb[15].mxu0  ;;  %2082 = vmatmul.mubr.f32.gmra.mrb[120].mxu0 %v612_v16  ;;  %v1067_v16 = vld [vmem:[#allocation4 + $0xb98] sm:$0xff] }
 0x1be   : > { %v3526_v24 = vpop.f32.mrb[14].mxu1  ;;  %v5797_v25 = vadd.f32 %v3525_v17, %v1184_v20  ;;  %v3448_v26 = vadd.f32 %v3447_v23, %v3446_v21  ;;  %2086 = vmatprep.mubr.f32.mxu0 %v637_v19  ;;  %v353_v19 = vld [vmem:[%s5516_s7 + $0x148] sm:$0xff]  ;;  %v4795_v20 = vpack.c.bf16 %v1049_v3, %v1048_v2  ;;  %v355_v21 = vld [vmem:[%s5516_s7 + $0x158] sm:$0xff] }
 0x1bf   : > { %v3527_v28 = vpop.f32.mrb[15].mxu1  ;;  %2227 = vmatmul.mubr.f32.gmra.mrb[120].mxu1 %v614_v18  ;;  %v330_v18 = vld [vmem:[%s5516_s7 + $0x90] sm:$0xff] }
 0x1c0   : > { %v3528_v30 = vadd.f32 %v3527_v28, %v3526_v24  ;;  %2231 = vmatprep.mubr.f32.mxu1 %v639_v22  ;;  %v1189_v34 = vadd.f32 %v3448_v26, %v5745_v33  ;;  %v3449_v35 = vpop.f32.mrb[16].mxu0  ;;  %v4765_v24 = vpack.c.bf16 %v1035_v7, %v1034_v6  ;;  %v1018_v26 = vld [vmem:[#allocation4 + $0xa10] sm:$0xff]  ;;  %v1019_v28 = vld [vmem:[#allocation4 + $0xa18] sm:$0xff] }
 0x1c1   : > { %v3450_v37 = vpop.f32.mrb[17].mxu0  ;;  %2087 = vmatmul.mubr.f32.gmra.mrb[122].mxu0 %v636_v29  ;;  %v1050_v29 = vld [vmem:[#allocation4 + $0xb10] sm:$0xff]  ;;  %v1071_v7 = vld [vmem:[#allocation4 + $0xbb8] sm:$0xff] }
 0x1c2   : > { %v3529_v38 = vpop.f32.mrb[16].mxu1  ;;  %v5804_v39 = vadd.f32 %v3528_v30, %v1189_v34  ;;  %v3451_v41 = vadd.f32 %v3450_v37, %v3449_v35  ;;  %2091 = vmatprep.mubr.f32.mxu0 %v661_v32  ;;  %v4797_v32 = vpack.c.bf16 %v1067_v16, %v1066_v15  ;;  %v1051_v34 = vld [vmem:[#allocation4 + $0xb18] sm:$0xff]  ;;  %v1036_v35 = vld [vmem:[#allocation4 + $0xaa0] sm:$0xff]  ;;  %v1070_v6 = vld [vmem:[#allocation4 + $0xbb0] sm:$0xff] }
 0x1c3   : > { %v3530_v42 = vpop.f32.mrb[17].mxu1  ;;  %2232 = vmatmul.mubr.f32.gmra.mrb[122].mxu1 %v638_v31 }
 0x1c4   : > { %v3531_v44 = vadd.f32 %v3530_v42, %v3529_v38  ;;  %2236 = vmatprep.mubr.f32.mxu1 %v663_v36  ;;  %v1194_v47 = vadd.f32 %v3451_v41, %v5745_v33  ;;  %v3452_v48 = vpop.f32.mrb[18].mxu0  ;;  %v1037_v36 = vld [vmem:[#allocation4 + $0xaa8] sm:$0xff]  ;;  %v352_v42 = vld [vmem:[%s5516_s7 + $0x140] sm:$0xff] }
 0x1c5   : > { %v3453_v50 = vpop.f32.mrb[19].mxu0  ;;  %2092 = vmatmul.mubr.f32.gmra.mrb[124].mxu0 %v660_v43  ;;  %v1068_v43 = vld [vmem:[#allocation4 + $0xba0] sm:$0xff] }
 0x1c6   : > { %v3532_v51 = vpop.f32.mrb[18].mxu1  ;;  %v5811_v53 = vadd.f32 %v3531_v44, %v1194_v47  ;;  %v3454_v54 = vadd.f32 %v3453_v50, %v3452_v48  ;;  %2096 = vmatprep.mubr.f32.mxu0 %v685_v46  ;;  %v1069_v44 = vld [vmem:[#allocation4 + $0xba8] sm:$0xff]  ;;  %v354_v46 = vld [vmem:[%s5516_s7 + $0x150] sm:$0xff]  ;;  %v379_v48 = vld [vmem:[%s5516_s7 + $0x218] sm:$0xff] }
 0x1c7   : > { %v3533_v55 = vpop.f32.mrb[19].mxu1  ;;  %2237 = vmatmul.mubr.f32.gmra.mrb[124].mxu1 %v662_v45  ;;  %v377_v47 = vld [vmem:[%s5516_s7 + $0x208] sm:$0xff]  ;;  %v4801_v61 = vpack.c.bf16 %v1069_v44, %v1068_v43  ;;  %v427_v44 = vld [vmem:[%s5516_s7 + $0x398] sm:$0xff] }
 0x1c8   : > { %v3534_v58 = vadd.f32 %v3533_v55, %v3532_v51  ;;  %2241 = vmatprep.mubr.f32.mxu1 %v687_v49  ;;  %v1199_v62 = vadd.f32 %v3454_v54, %v5745_v33  ;;  %v3455_v63 = vpop.f32.mrb[20].mxu0  ;;  %v4767_v49 = vpack.c.bf16 %v1019_v28, %v1018_v26  ;;  %v4799_v54 = vpack.c.bf16 %v1051_v34, %v1050_v29  ;;  %v1055_v28 = vld [vmem:[#allocation4 + $0xb38] sm:$0xff]  ;;  %v1040_v29 = vld [vmem:[#allocation4 + $0xac0] sm:$0xff]  ;;  %v425_v43 = vld [vmem:[%s5516_s7 + $0x388] sm:$0xff] }
 0x1c9   : > { %v3456_v4 = vpop.f32.mrb[21].mxu0  ;;  %2097 = vmatmul.mubr.f32.gmra.mrb[126].mxu0 %v684_v56  ;;  %v4769_v55 = vpack.c.bf16 %v1037_v36, %v1036_v35  ;;  %v1020_v56 = vld [vmem:[#allocation4 + $0xa20] sm:$0xff]  ;;  %v4805_v26 = vpack.c.bf16 %v1071_v7, %v1070_v6  ;;  %v426_v6 = vld [vmem:[%s5516_s7 + $0x390] sm:$0xff]  ;;  %v449_v7 = vld [vmem:[%s5516_s7 + $0x448] sm:$0xff] }
 0x1ca   : > { %v3535_v5 = vpop.f32.mrb[20].mxu1  ;;  %v5818_v8 = vadd.f32 %v3534_v58, %v1199_v62  ;;  %v3457_v10 = vadd.f32 %v3456_v4, %v3455_v63  ;;  %2311 = vmatprep.mubr.f32.mxu0 %v329_v59  ;;  %v1052_v58 = vld [vmem:[#allocation4 + $0xb20] sm:$0xff]  ;;  %v1053_v62 = vld [vmem:[#allocation4 + $0xb28] sm:$0xff]  ;;  %v1038_v63 = vld [vmem:[#allocation4 + $0xab0] sm:$0xff] }
 0x1cb   : > { %v3536_v11 = vpop.f32.mrb[21].mxu1  ;;  %2242 = vmatmul.mubr.f32.gmra.mrb[126].mxu1 %v686_v57  ;;  %v1021_v57 = vld [vmem:[#allocation4 + $0xa28] sm:$0xff]  ;;  %v400_v35 = vld [vmem:[%s5516_s7 + $0x2c0] sm:$0xff] }
 0x1cc   : > { %v3537_v17 = vadd.f32 %v3536_v11, %v3535_v5  ;;  %2456 = vmatprep.mubr.f32.mxu1 %v331_v1  ;;  %v1204_v22 = vadd.f32 %v3457_v10, %v5745_v33  ;;  %v3458_v23 = vpop.f32.mrb[22].mxu0  ;;  %v1039_v1 = vld [vmem:[#allocation4 + $0xab8] sm:$0xff]  ;;  %v376_v5 = vld [vmem:[%s5516_s7 + $0x200] sm:$0xff]  ;;  %v378_v11 = vld [vmem:[%s5516_s7 + $0x210] sm:$0xff]  ;;  %v4771_v15 = vpack.c.bf16 %v1021_v57, %v1020_v56 }
 0x1cd   : > { %v3459_v30 = vpop.f32.mrb[23].mxu0  ;;  %2312 = vmatmul.mubr.f32.vlgmr.msra.gmra.mrb[128].mxu0 %v328_v12  ;;  %v401_v12 = vld [vmem:[%s5516_s7 + $0x2c8] sm:$0xff]  ;;  %v1072_v36 = vld [vmem:[#allocation4 + $0xbc0] sm:$0xff] }
 0x1ce   : > { %v3538_v31 = vpop.f32.mrb[22].mxu1  ;;  %v5825_v37 = vadd.f32 %v3537_v17, %v1204_v22  ;;  %v3460_v38 = vadd.f32 %v3459_v30, %v3458_v23  ;;  %4764 = vmatpush3.bf16.msra.mxu0 %v4763_v14  ;;  %2316 = vmatprep.mubr.f32.mxu0 %v353_v19  ;;  %v403_v14 = vld [vmem:[%s5516_s7 + $0x2d8] sm:$0xff]  ;;  %v4773_v19 = vpack.c.bf16 %v1039_v1, %v1038_v63  ;;  %v1054_v22 = vld [vmem:[#allocation4 + $0xb30] sm:$0xff]  ;;  %v1041_v30 = vld [vmem:[#allocation4 + $0xac8] sm:$0xff] }
 0x1cf   : > { %v3539_v41 = vpop.f32.mrb[23].mxu1  ;;  %2457 = vmatmul.mubr.f32.vlgmr.msra.gmra.mrb[128].mxu1 %v330_v18  ;;  %4766 = vmatprep.subr.bf16.mxu0 %v4765_v24  ;;  %v4803_v18 = vpack.c.bf16 %v1053_v62, %v1052_v58  ;;  %v1057_v58 = vld [vmem:[#allocation4 + $0xb48] sm:$0xff]  ;;  %v424_v1 = vld [vmem:[%s5516_s7 + $0x380] sm:$0xff] }
 0x1d0   : > { %v3540_v45 = vadd.f32 %v3539_v41, %v3538_v31  ;;  %4796 = vmatpush3.bf16.msra.mxu1 %v4795_v20  ;;  %v1209_v50 = vadd.f32 %v3460_v38, %v5745_v33  ;;  %v3461_v51 = vpop.f32.mrb[24].mxu0  ;;  %2461 = vmatprep.mubr.f32.mxu1 %v355_v21  ;;  %v1022_v20 = vld [vmem:[#allocation4 + $0xa30] sm:$0xff]  ;;  %v1023_v21 = vld [vmem:[#allocation4 + $0xa38] sm:$0xff]  ;;  %v1073_v38 = vld [vmem:[#allocation4 + $0xbc8] sm:$0xff] }
 0x1d1   : > { %v3462_v59 = vpop.f32.mrb[25].mxu0  ;;  %2317 = vmatmul.mubr.f32.gmra.mrb[130].mxu0 %v352_v42  ;;  %4798 = vmatprep.subr.bf16.mxu1 %v4797_v32  ;;  %v402_v42 = vld [vmem:[%s5516_s7 + $0x2d0] sm:$0xff]  ;;  %v4809_v57 = vpack.c.bf16 %v1073_v38, %v1072_v36 }
 0x1d2   : > { %v3541_v60 = vpop.f32.mrb[24].mxu1  ;;  %v5832_v2 = vadd.f32 %v3540_v45, %v1209_v50  ;;  %v3463_v3 = vadd.f32 %v3462_v59, %v3461_v51  ;;  %2321 = vmatprep.mubr.f32.mxu0 %v377_v47  ;;  %4768 = vmatpush3.bf16.msra.mxu0 %v4767_v49  ;;  %v4775_v45 = vpack.c.bf16 %v1023_v21, %v1022_v20  ;;  %v1024_v50 = vld [vmem:[#allocation4 + $0xa40] sm:$0xff]  ;;  %v1025_v51 = vld [vmem:[#allocation4 + $0xa48] sm:$0xff]  ;;  %v1042_v59 = vld [vmem:[#allocation4 + $0xad0] sm:$0xff] }
 0x1d3   : > { %v3542_v4 = vpop.f32.mrb[25].mxu1  ;;  %2462 = vmatmul.mubr.f32.gmra.mrb[130].mxu1 %v354_v46  ;;  %4770 = vmatprep.subr.bf16.mxu0 %v4769_v55  ;;  %v4777_v49 = vpack.c.bf16 %v1041_v30, %v1040_v29  ;;  %v450_v38 = vld [vmem:[%s5516_s7 + $0x450] sm:$0xff] }
 0x1d4   : > { %v3543_v10 = vadd.f32 %v3542_v4, %v3541_v60  ;;  %2466 = vmatprep.mubr.f32.mxu1 %v379_v48  ;;  %v1214_v16 = vadd.f32 %v3463_v3, %v5745_v33  ;;  %v3464_v17 = vpop.f32.mrb[26].mxu0  ;;  %4800 = vmatpush3.bf16.msra.mxu1 %v4799_v54  ;;  %v4807_v48 = vpack.c.bf16 %v1055_v28, %v1054_v22  ;;  %v1056_v54 = vld [vmem:[#allocation4 + $0xb40] sm:$0xff]  ;;  %v1043_v60 = vld [vmem:[#allocation4 + $0xad8] sm:$0xff]  ;;  %v1074_v3 = vld [vmem:[#allocation4 + $0xbd0] sm:$0xff] }
 0x1d5   : > { %v3465_v23 = vpop.f32.mrb[27].mxu0  ;;  %2322 = vmatmul.mubr.f32.gmra.mrb[132].mxu0 %v376_v5  ;;  %4802 = vmatprep.subr.bf16.mxu1 %v4801_v61  ;;  %v1075_v4 = vld [vmem:[#allocation4 + $0xbd8] sm:$0xff] }
 0x1d6   : > { %v3544_v24 = vpop.f32.mrb[26].mxu1  ;;  %v5839_v31 = vadd.f32 %v3543_v10, %v1214_v16  ;;  %v3466_v32 = vadd.f32 %v3465_v23, %v3464_v17  ;;  %2326 = vmatprep.mubr.f32.mxu0 %v401_v12  ;;  %4772 = vmatpush3.bf16.msra.mxu0 %v4771_v15  ;;  %v451_v10 = vld [vmem:[%s5516_s7 + $0x458] sm:$0xff]  ;;  %v4811_v15 = vpack.c.bf16 %v1057_v58, %v1056_v54  ;;  %v1026_v17 = vld [vmem:[#allocation4 + $0xa50] sm:$0xff] }
 0x1d7   : > { %v3545_v34 = vpop.f32.mrb[27].mxu1  ;;  %2467 = vmatmul.mubr.f32.gmra.mrb[132].mxu1 %v378_v11  ;;  %4774 = vmatprep.subr.bf16.mxu0 %v4773_v19  ;;  %v4779_v11 = vpack.c.bf16 %v1025_v51, %v1024_v50  ;;  %v4781_v16 = vpack.c.bf16 %v1043_v60, %v1042_v59  ;;  %v1058_v19 = vld [vmem:[#allocation4 + $0xb50] sm:$0xff]  ;;  %v4813_v22 = vpack.c.bf16 %v1075_v4, %v1074_v3  ;;  %v1059_v23 = vld [vmem:[#allocation4 + $0xb58] sm:$0xff]  ;;  %v1060_v50 = vld [vmem:[#allocation4 + $0xb60] sm:$0xff] }
 0x1d8   : > { %v3546_v41 = vadd.f32 %v3545_v34, %v3544_v24  ;;  %2471 = vmatprep.mubr.f32.mxu1 %v403_v14  ;;  %v1219_v46 = vadd.f32 %v3466_v32, %v5745_v33  ;;  %v3467_v47 = vpop.f32.mrb[28].mxu0  ;;  %4804 = vmatpush3.bf16.msra.mxu1 %v4803_v18  ;;  %v1027_v18 = vld [vmem:[#allocation4 + $0xa58] sm:$0xff]  ;;  %v1044_v24 = vld [vmem:[#allocation4 + $0xae0] sm:$0xff]  ;;  %v474_v4 = vld [vmem:[%s5516_s7 + $0x510] sm:$0xff] }
 0x1d9   : > { %v3468_v55 = vpop.f32.mrb[29].mxu0  ;;  %2327 = vmatmul.mubr.f32.gmra.mrb[134].mxu0 %v400_v35  ;;  %4806 = vmatprep.subr.bf16.mxu1 %v4805_v26  ;;  %v1045_v26 = vld [vmem:[#allocation4 + $0xae8] sm:$0xff]  ;;  %v448_v32 = vld [vmem:[%s5516_s7 + $0x440] sm:$0xff]  ;;  %v1047_v58 = vld [vmem:[#allocation4 + $0xaf8] sm:$0xff] }
 0x1da   : > { %v3547_v56 = vpop.f32.mrb[28].mxu1  ;;  %v5846_v61 = vadd.f32 %v3546_v41, %v1219_v46  ;;  %v3469_v62 = vadd.f32 %v3468_v55, %v3467_v47  ;;  %2331 = vmatprep.mubr.f32.mxu0 %v425_v43  ;;  %4776 = vmatpush3.bf16.msra.mxu0 %v4775_v45  ;;  %v1076_v34 = vld [vmem:[#allocation4 + $0xbe0] sm:$0xff]  ;;  %v1077_v35 = vld [vmem:[#allocation4 + $0xbe8] sm:$0xff]  ;;  %v4783_v43 = vpack.c.bf16 %v1027_v18, %v1026_v17 }
 0x1db   : > { %v3548_v63 = vpop.f32.mrb[29].mxu1  ;;  %2472 = vmatmul.mubr.f32.gmra.mrb[134].mxu1 %v402_v42  ;;  %4778 = vmatprep.subr.bf16.mxu0 %v4777_v49  ;;  %v473_v41 = vld [vmem:[%s5516_s7 + $0x508] sm:$0xff]  ;;  %v475_v42 = vld [vmem:[%s5516_s7 + $0x518] sm:$0xff]  ;;  %v4815_v46 = vpack.c.bf16 %v1059_v23, %v1058_v19  ;;  %v4785_v47 = vpack.c.bf16 %v1045_v26, %v1044_v24  ;;  %v4817_v55 = vpack.c.bf16 %v1077_v35, %v1076_v34  ;;  %v496_v24 = vld [vmem:[%s5516_s7 + $0x5c0] sm:$0xff] }
 0x1dc   : > { %v3549_v5 = vadd.f32 %v3548_v63, %v3547_v56  ;;  %2476 = vmatprep.mubr.f32.mxu1 %v427_v44  ;;  %v1224_v12 = vadd.f32 %v3469_v62, %v5745_v33  ;;  %v3470_v14 = vpop.f32.mrb[30].mxu0  ;;  %4808 = vmatpush3.bf16.msra.mxu1 %v4807_v48  ;;  %v1028_v48 = vld [vmem:[#allocation4 + $0xa60] sm:$0xff]  ;;  %v1029_v49 = vld [vmem:[#allocation4 + $0xa68] sm:$0xff]  ;;  %v1078_v63 = vld [vmem:[#allocation4 + $0xbf0] sm:$0xff] }
 0x1dd   : > { %v3471_v20 = vpop.f32.mrb[31].mxu0  ;;  %2332 = vmatmul.mubr.f32.gmra.mrb[136].mxu0 %v424_v1  ;;  %4810 = vmatprep.subr.bf16.mxu1 %v4809_v57  ;;  %v1061_v56 = vld [vmem:[#allocation4 + $0xb68] sm:$0xff]  ;;  %v1046_v57 = vld [vmem:[#allocation4 + $0xaf0] sm:$0xff]  ;;  %v472_v62 = vld [vmem:[%s5516_s7 + $0x500] sm:$0xff] }
 0x1de   : > { %v3550_v21 = vpop.f32.mrb[30].mxu1  ;;  %v5853_v28 = vadd.f32 %v3549_v5, %v1224_v12  ;;  %v3472_v29 = vadd.f32 %v3471_v20, %v3470_v14  ;;  %2336 = vmatprep.mubr.f32.mxu0 %v449_v7  ;;  %4780 = vmatpush3.bf16.msra.mxu0 %v4779_v11  ;;  %v1079_v1 = vld [vmem:[#allocation4 + $0xbf8] sm:$0xff]  ;;  %v497_v5 = vld [vmem:[%s5516_s7 + $0x5c8] sm:$0xff]  ;;  %v4819_v12 = vpack.c.bf16 %v1061_v56, %v1060_v50  ;;  %v1062_v20 = vld [vmem:[#allocation4 + $0xb70] sm:$0xff] }
 0x1df   : > { %v3551_v30 = vpop.f32.mrb[31].mxu1  ;;  %2477 = vmatmul.mubr.f32.gmra.mrb[136].mxu1 %v426_v6  ;;  %4782 = vmatprep.subr.bf16.mxu0 %v4781_v16  ;;  %v4787_v6 = vpack.c.bf16 %v1029_v49, %v1028_v48  ;;  %v499_v11 = vld [vmem:[%s5516_s7 + $0x5d8] sm:$0xff]  ;;  %v4789_v14 = vpack.c.bf16 %v1047_v58, %v1046_v57  ;;  %v4821_v19 = vpack.c.bf16 %v1079_v1, %v1078_v63  ;;  %v545_v48 = vld [vmem:[%s5516_s7 + $0x748] sm:$0xff] }
 0x1e0   : > { %v3552_v36 = vadd.f32 %v3551_v30, %v3550_v21  ;;  %2481 = vmatprep.mubr.f32.mxu1 %v451_v10  ;;  %v1229_v44 = vadd.f32 %v3472_v29, %v5745_v33  ;;  %v3585_v45 = vpop.f32.mrb[32].mxu0  ;;  %4812 = vmatpush3.bf16.msra.mxu1 %v4811_v15  ;;  %v1030_v15 = vld [vmem:[#allocation4 + $0xa70] sm:$0xff]  ;;  %v1031_v16 = vld [vmem:[#allocation4 + $0xa78] sm:$0xff]  ;;  %v521_v30 = vld [vmem:[%s5516_s7 + $0x688] sm:$0xff] }
 0x1e1   : > { %v3586_v51 = vpop.f32.mrb[33].mxu0  ;;  %2337 = vmatmul.mubr.f32.gmra.mrb[138].mxu0 %v448_v32  ;;  %4814 = vmatprep.subr.bf16.mxu1 %v4813_v22  ;;  %v1063_v21 = vld [vmem:[#allocation4 + $0xb78] sm:$0xff]  ;;  %v498_v29 = vld [vmem:[%s5516_s7 + $0x5d0] sm:$0xff]  ;;  %v4791_v32 = vpack.c.bf16 %v1031_v16, %v1030_v15  ;;  %v593_v15 = vld [vmem:[%s5516_s7 + $0x8c8] sm:$0xff] }
 0x1e2   : > { %v3665_v54 = vpop.f32.mrb[32].mxu1  ;;  %v5860_v33 = vadd.f32 %v3552_v36, %v1229_v44  ;;  %v3587_v59 = vadd.f32 %v3586_v51, %v3585_v45  ;;  %2341 = vmatprep.mubr.f32.mxu0 %v473_v41  ;;  %4784 = vmatpush3.bf16.msra.mxu0 %v4783_v43  ;;  %v523_v36 = vld [vmem:[%s5516_s7 + $0x698] sm:$0xff] }
 0x1e3   : > { %v3666_v60 = vpop.f32.mrb[33].mxu1  ;;  %2482 = vmatmul.mubr.f32.gmra.mrb[138].mxu1 %v450_v38  ;;  %4786 = vmatprep.subr.bf16.mxu0 %v4785_v47  ;;  %v4823_v38 = vpack.c.bf16 %v1063_v21, %v1062_v20  ;;  %v522_v47 = vld [vmem:[%s5516_s7 + $0x690] sm:$0xff]  ;;  %v547_v51 = vld [vmem:[%s5516_s7 + $0x758] sm:$0xff] }
 0x1e4   : > { %v3667_v3 = vadd.f32 %v3666_v60, %v3665_v54  ;;  %2486 = vmatprep.mubr.f32.mxu1 %v475_v42  ;;  %v1444_v7 = vadd.f32 %v3587_v59, %v5755_v9  ;;  %v3588_v10 = vpop.f32.mrb[34].mxu0  ;;  %4816 = vmatpush3.bf16.msra.mxu1 %v4815_v46  ;;  %v520_v46 = vld [vmem:[%s5516_s7 + $0x680] sm:$0xff] }
 0x1e5   : > { %v3589_v17 = vpop.f32.mrb[35].mxu0  ;;  %2342 = vmatmul.mubr.f32.gmra.mrb[140].mxu0 %v472_v62  ;;  %4818 = vmatprep.subr.bf16.mxu1 %v4817_v55  ;;  %v544_v59 = vld [vmem:[%s5516_s7 + $0x740] sm:$0xff]  ;;  %v546_v62 = vld [vmem:[%s5516_s7 + $0x750] sm:$0xff] }
 0x1e6   : > { %v3668_v18 = vpop.f32.mrb[34].mxu1  ;;  %v5867_v9 = vadd.f32 %v3667_v3, %v1444_v7  ;;  %v3590_v22 = vadd.f32 %v3589_v17, %v3588_v10  ;;  %2346 = vmatprep.mubr.f32.mxu0 %v497_v5  ;;  %4788 = vmatpush3.bf16.msra.mxu0 %v4787_v6  ;;  %v571_v3 = vld [vmem:[%s5516_s7 + $0x818] sm:$0xff] }
 0x1e7   : > { %v3669_v23 = vpop.f32.mrb[35].mxu1  ;;  %2487 = vmatmul.mubr.f32.gmra.mrb[140].mxu1 %v474_v4  ;;  %4790 = vmatprep.subr.bf16.mxu0 %v4789_v14  ;;  %v570_v14 = vld [vmem:[%s5516_s7 + $0x810] sm:$0xff]  ;;  %v595_v17 = vld [vmem:[%s5516_s7 + $0x8d8] sm:$0xff] }
 0x1e8   : > { %v3670_v26 = vadd.f32 %v3669_v23, %v3668_v18  ;;  %2491 = vmatprep.mubr.f32.mxu1 %v499_v11  ;;  %v1449_v34 = vadd.f32 %v3590_v22, %v5762_v27  ;;  %v3591_v35 = vpop.f32.mrb[36].mxu0  ;;  %4820 = vmatpush3.bf16.msra.mxu1 %v4819_v12  ;;  %v568_v11 = vld [vmem:[%s5516_s7 + $0x800] sm:$0xff] }
 0x1e9   : > { %v3592_v41 = vpop.f32.mrb[37].mxu0  ;;  %2347 = vmatmul.mubr.f32.gmra.mrb[142].mxu0 %v496_v24  ;;  %4822 = vmatprep.subr.bf16.mxu1 %v4821_v19  ;;  %v592_v23 = vld [vmem:[%s5516_s7 + $0x8c0] sm:$0xff] }
 0x1ea   : > { %v3671_v42 = vpop.f32.mrb[36].mxu1  ;;  %v5874_v43 = vadd.f32 %v3670_v26, %v1449_v34  ;;  %v3593_v44 = vadd.f32 %v3592_v41, %v3591_v35  ;;  %2351 = vmatprep.mubr.f32.mxu0 %v521_v30  ;;  %4792 = vmatpush3.bf16.msra.mxu0 %v4791_v32  ;;  %v594_v26 = vld [vmem:[%s5516_s7 + $0x8d0] sm:$0xff]  ;;  %v619_v32 = vld [vmem:[%s5516_s7 + $0x998] sm:$0xff] }
 0x1eb   : > { %v3672_v45 = vpop.f32.mrb[37].mxu1  ;;  %2492 = vmatmul.mubr.f32.gmra.mrb[142].mxu1 %v498_v29  ;;  %v617_v29 = vld [vmem:[%s5516_s7 + $0x988] sm:$0xff] }
 0x1ec   : > { %v3673_v27 = vadd.f32 %v3672_v45, %v3671_v42  ;;  %2496 = vmatprep.mubr.f32.mxu1 %v523_v36  ;;  %v1454_v49 = vadd.f32 %v3593_v44, %v5769_v40  ;;  %v3594_v50 = vpop.f32.mrb[38].mxu0  ;;  %4824 = vmatpush3.bf16.msra.mxu1 %v4823_v38  ;;  %v569_v40 = vld [vmem:[%s5516_s7 + $0x808] sm:$0xff]  ;;  %v616_v42 = vld [vmem:[%s5516_s7 + $0x980] sm:$0xff]  ;;  %v618_v45 = vld [vmem:[%s5516_s7 + $0x990] sm:$0xff] }
 0x1ed   : > { %v3595_v54 = vpop.f32.mrb[39].mxu0  ;;  %2352 = vmatmul.mubr.f32.gmra.mrb[144].mxu0 %v520_v46  ;;  %v641_v46 = vld [vmem:[%s5516_s7 + $0xa48] sm:$0xff] }
 0x1ee   : > { %v3674_v55 = vpop.f32.mrb[38].mxu1  ;;  %v5881_v56 = vadd.f32 %v3673_v27, %v1454_v49  ;;  %v3596_v57 = vadd.f32 %v3595_v54, %v3594_v50  ;;  %2356 = vmatprep.mubr.f32.mxu0 %v545_v48 }
 0x1ef   : > { %v3675_v58 = vpop.f32.mrb[39].mxu1  ;;  %2497 = vmatmul.mubr.f32.gmra.mrb[144].mxu1 %v522_v47  ;;  %v643_v47 = vld [vmem:[%s5516_s7 + $0xa58] sm:$0xff] }
 0x1f0   : > { %v3676_v60 = vadd.f32 %v3675_v58, %v3674_v55  ;;  %2501 = vmatprep.mubr.f32.mxu1 %v547_v51  ;;  %v1459_v63 = vadd.f32 %v3596_v57, %v5776_v52  ;;  %v3597_v1 = vpop.f32.mrb[40].mxu0  ;;  %v640_v55 = vld [vmem:[%s5516_s7 + $0xa40] sm:$0xff]  ;;  %v642_v58 = vld [vmem:[%s5516_s7 + $0xa50] sm:$0xff] }
 0x1f1   : > { %v3598_v4 = vpop.f32.mrb[41].mxu0  ;;  %2357 = vmatmul.mubr.f32.gmra.mrb[146].mxu0 %v544_v59  ;;  %v665_v59 = vld [vmem:[%s5516_s7 + $0xb08] sm:$0xff] }
 0x1f2   : > { %v3677_v5 = vpop.f32.mrb[40].mxu1  ;;  %v5888_v6 = vadd.f32 %v3676_v60, %v1459_v63  ;;  %v3599_v7 = vadd.f32 %v3598_v4, %v3597_v1  ;;  %2361 = vmatprep.mubr.f32.mxu0 %v569_v40 }
 0x1f3   : > { %v3678_v10 = vpop.f32.mrb[41].mxu1  ;;  %2502 = vmatmul.mubr.f32.gmra.mrb[146].mxu1 %v546_v62  ;;  %v667_v62 = vld [vmem:[%s5516_s7 + $0xb18] sm:$0xff] }
 0x1f4   : > { %v3679_v12 = vadd.f32 %v3678_v10, %v3677_v5  ;;  %2506 = vmatprep.mubr.f32.mxu1 %v571_v3  ;;  %v1464_v52 = vadd.f32 %v3599_v7, %v5783_v0  ;;  %v3600_v16 = vpop.f32.mrb[42].mxu0  ;;  %v664_v5 = vld [vmem:[%s5516_s7 + $0xb00] sm:$0xff]  ;;  %v666_v10 = vld [vmem:[%s5516_s7 + $0xb10] sm:$0xff] }
 0x1f5   : > { %v3601_v18 = vpop.f32.mrb[43].mxu0  ;;  %2362 = vmatmul.mubr.f32.gmra.mrb[148].mxu0 %v568_v11  ;;  %v689_v11 = vld [vmem:[%s5516_s7 + $0xbc8] sm:$0xff] }
 0x1f6   : > { %v3680_v19 = vpop.f32.mrb[42].mxu1  ;;  %v5895_v20 = vadd.f32 %v3679_v12, %v1464_v52  ;;  %v3602_v21 = vadd.f32 %v3601_v18, %v3600_v16  ;;  %2366 = vmatprep.mubr.f32.mxu0 %v593_v15 }
 0x1f7   : > { %v3681_v22 = vpop.f32.mrb[43].mxu1  ;;  %2507 = vmatmul.mubr.f32.gmra.mrb[148].mxu1 %v570_v14  ;;  %v691_v14 = vld [vmem:[%s5516_s7 + $0xbd8] sm:$0xff] }
 0x1f8   : > { %v3682_v24 = vadd.f32 %v3681_v22, %v3680_v19  ;;  %2511 = vmatprep.mubr.f32.mxu1 %v595_v17  ;;  %v1469_v0 = vadd.f32 %v3602_v21, %v5790_v13  ;;  %v3603_v30 = vpop.f32.mrb[44].mxu0  ;;  %v688_v19 = vld [vmem:[%s5516_s7 + $0xbc0] sm:$0xff]  ;;  %v690_v22 = vld [vmem:[%s5516_s7 + $0xbd0] sm:$0xff] }
 0x1f9   : > { %v3604_v34 = vpop.f32.mrb[45].mxu0  ;;  %2367 = vmatmul.mubr.f32.gmra.mrb[150].mxu0 %v592_v23  ;;  %v333_v23 = vld [vmem:[%s5516_s7 + $0xa8] sm:$0xff] }
 0x1fa   : > { %v3683_v35 = vpop.f32.mrb[44].mxu1  ;;  %v5902_v36 = vadd.f32 %v3682_v24, %v1469_v0  ;;  %v3605_v38 = vadd.f32 %v3604_v34, %v3603_v30  ;;  %2371 = vmatprep.mubr.f32.mxu0 %v617_v29 }
 0x1fb   : > { %v3684_v41 = vpop.f32.mrb[45].mxu1  ;;  %2512 = vmatmul.mubr.f32.gmra.mrb[150].mxu1 %v594_v26  ;;  %v335_v26 = vld [vmem:[%s5516_s7 + $0xb8] sm:$0xff] }
 0x1fc   : > { %v3685_v44 = vadd.f32 %v3684_v41, %v3683_v35  ;;  %2516 = vmatprep.mubr.f32.mxu1 %v619_v32  ;;  %v1474_v13 = vadd.f32 %v3605_v38, %v5797_v25  ;;  %v3606_v27 = vpop.f32.mrb[46].mxu0  ;;  %v332_v35 = vld [vmem:[%s5516_s7 + $0xa0] sm:$0xff]  ;;  %v334_v41 = vld [vmem:[%s5516_s7 + $0xb0] sm:$0xff] }
 0x1fd   : > { %v3607_v48 = vpop.f32.mrb[47].mxu0  ;;  %2372 = vmatmul.mubr.f32.gmra.mrb[152].mxu0 %v616_v42  ;;  %v357_v42 = vld [vmem:[%s5516_s7 + $0x168] sm:$0xff] }
 0x1fe   : > { %v3686_v49 = vpop.f32.mrb[46].mxu1  ;;  %v5909_v50 = vadd.f32 %v3685_v44, %v1474_v13  ;;  %v3608_v51 = vadd.f32 %v3607_v48, %v3606_v27  ;;  %2376 = vmatprep.mubr.f32.mxu0 %v641_v46 }
 0x1ff   : > { %v3687_v54 = vpop.f32.mrb[47].mxu1  ;;  %2517 = vmatmul.mubr.f32.gmra.mrb[152].mxu1 %v618_v45  ;;  %v359_v45 = vld [vmem:[%s5516_s7 + $0x178] sm:$0xff] }
 0x200   : > { %v3688_v57 = vadd.f32 %v3687_v54, %v3686_v49  ;;  %2521 = vmatprep.mubr.f32.mxu1 %v643_v47  ;;  %v1479_v25 = vadd.f32 %v3608_v51, %v5804_v39  ;;  %v3609_v60 = vpop.f32.mrb[48].mxu0  ;;  %v356_v49 = vld [vmem:[%s5516_s7 + $0x160] sm:$0xff]  ;;  %v358_v54 = vld [vmem:[%s5516_s7 + $0x170] sm:$0xff] }
 0x201   : > { %v3610_v40 = vpop.f32.mrb[49].mxu0  ;;  %2377 = vmatmul.mubr.f32.gmra.mrb[154].mxu0 %v640_v55  ;;  %v381_v55 = vld [vmem:[%s5516_s7 + $0x228] sm:$0xff] }
 0x202   : > { %v3689_v63 = vpop.f32.mrb[48].mxu1  ;;  %v5916_v1 = vadd.f32 %v3688_v57, %v1479_v25  ;;  %v3611_v3 = vadd.f32 %v3610_v40, %v3609_v60  ;;  %2381 = vmatprep.mubr.f32.mxu0 %v665_v59 }
 0x203   : > { %v3690_v4 = vpop.f32.mrb[49].mxu1  ;;  %2522 = vmatmul.mubr.f32.gmra.mrb[154].mxu1 %v642_v58  ;;  %v383_v58 = vld [vmem:[%s5516_s7 + $0x238] sm:$0xff] }
 0x204   : > { %v3691_v7 = vadd.f32 %v3690_v4, %v3689_v63  ;;  %2526 = vmatprep.mubr.f32.mxu1 %v667_v62  ;;  %v1484_v39 = vadd.f32 %v3611_v3, %v5811_v53  ;;  %v3612_v12 = vpop.f32.mrb[50].mxu0  ;;  %v380_v63 = vld [vmem:[%s5516_s7 + $0x220] sm:$0xff]  ;;  %v382_v4 = vld [vmem:[%s5516_s7 + $0x230] sm:$0xff] }
 0x205   : > { %v3613_v15 = vpop.f32.mrb[51].mxu0  ;;  %2382 = vmatmul.mubr.f32.gmra.mrb[156].mxu0 %v664_v5  ;;  %v405_v5 = vld [vmem:[%s5516_s7 + $0x2e8] sm:$0xff] }
 0x206   : > { %v3692_v52 = vpop.f32.mrb[50].mxu1  ;;  %v5923_v16 = vadd.f32 %v3691_v7, %v1484_v39  ;;  %v3614_v17 = vadd.f32 %v3613_v15, %v3612_v12  ;;  %2386 = vmatprep.mubr.f32.mxu0 %v689_v11 }
 0x207   : > { %v3693_v18 = vpop.f32.mrb[51].mxu1  ;;  %2527 = vmatmul.mubr.f32.gmra.mrb[156].mxu1 %v666_v10  ;;  %v407_v10 = vld [vmem:[%s5516_s7 + $0x2f8] sm:$0xff] }
 0x208   : > { %v3694_v21 = vadd.f32 %v3693_v18, %v3692_v52  ;;  %2531 = vmatprep.mubr.f32.mxu1 %v691_v14  ;;  %v1489_v53 = vadd.f32 %v3614_v17, %v5818_v8  ;;  %v3615_v24 = vpop.f32.mrb[52].mxu0  ;;  %v404_v52 = vld [vmem:[%s5516_s7 + $0x2e0] sm:$0xff]  ;;  %v406_v18 = vld [vmem:[%s5516_s7 + $0x2f0] sm:$0xff] }
 0x209   : > { %v3616_v29 = vpop.f32.mrb[53].mxu0  ;;  %2387 = vmatmul.mubr.f32.gmra.mrb[158].mxu0 %v688_v19  ;;  %v429_v19 = vld [vmem:[%s5516_s7 + $0x3a8] sm:$0xff] }
 0x20a   : > { %v3695_v0 = vpop.f32.mrb[52].mxu1  ;;  %v5930_v30 = vadd.f32 %v3694_v21, %v1489_v53  ;;  %v3617_v32 = vadd.f32 %v3616_v29, %v3615_v24  ;;  %2601 = vmatprep.mubr.f32.mxu0 %v333_v23 }
 0x20b   : > { %v3696_v34 = vpop.f32.mrb[53].mxu1  ;;  %2532 = vmatmul.mubr.f32.gmra.mrb[158].mxu1 %v690_v22  ;;  %v431_v22 = vld [vmem:[%s5516_s7 + $0x3b8] sm:$0xff] }
 0x20c   : > { %v3697_v38 = vadd.f32 %v3696_v34, %v3695_v0  ;;  %2746 = vmatprep.mubr.f32.mxu1 %v335_v26  ;;  %v1494_v8 = vadd.f32 %v3617_v32, %v5825_v37  ;;  %v3618_v44 = vpop.f32.mrb[54].mxu0  ;;  %v428_v0 = vld [vmem:[%s5516_s7 + $0x3a0] sm:$0xff]  ;;  %v430_v34 = vld [vmem:[%s5516_s7 + $0x3b0] sm:$0xff] }
 0x20d   : > { %v3619_v46 = vpop.f32.mrb[55].mxu0  ;;  %2602 = vmatmul.mubr.f32.vlgmr.msra.gmra.mrb[160].mxu0 %v332_v35  ;;  %v453_v35 = vld [vmem:[%s5516_s7 + $0x468] sm:$0xff] }
 0x20e   : > { %v3698_v13 = vpop.f32.mrb[54].mxu1  ;;  %v5937_v27 = vadd.f32 %v3697_v38, %v1494_v8  ;;  %v3620_v47 = vadd.f32 %v3619_v46, %v3618_v44  ;;  %2606 = vmatprep.mubr.f32.mxu0 %v357_v42 }
 0x20f   : > { %v3699_v48 = vpop.f32.mrb[55].mxu1  ;;  %2747 = vmatmul.mubr.f32.vlgmr.msra.gmra.mrb[160].mxu1 %v334_v41  ;;  %v455_v41 = vld [vmem:[%s5516_s7 + $0x478] sm:$0xff] }
 0x210   : > { %v3700_v51 = vadd.f32 %v3699_v48, %v3698_v13  ;;  %2751 = vmatprep.mubr.f32.mxu1 %v359_v45  ;;  %v1499_v37 = vadd.f32 %v3620_v47, %v5832_v2  ;;  %v3621_v57 = vpop.f32.mrb[56].mxu0  ;;  %v452_v13 = vld [vmem:[%s5516_s7 + $0x460] sm:$0xff]  ;;  %v454_v48 = vld [vmem:[%s5516_s7 + $0x470] sm:$0xff] }
 0x211   : > { %v3622_v59 = vpop.f32.mrb[57].mxu0  ;;  %2607 = vmatmul.mubr.f32.gmra.mrb[162].mxu0 %v356_v49  ;;  %v477_v49 = vld [vmem:[%s5516_s7 + $0x528] sm:$0xff] }
 0x212   : > { %v3701_v25 = vpop.f32.mrb[56].mxu1  ;;  %v5944_v60 = vadd.f32 %v3700_v51, %v1499_v37  ;;  %v3623_v62 = vadd.f32 %v3622_v59, %v3621_v57  ;;  %2611 = vmatprep.mubr.f32.mxu0 %v381_v55 }
 0x213   : > { %v3702_v40 = vpop.f32.mrb[57].mxu1  ;;  %2752 = vmatmul.mubr.f32.gmra.mrb[162].mxu1 %v358_v54  ;;  %v479_v54 = vld [vmem:[%s5516_s7 + $0x538] sm:$0xff] }
 0x214   : > { %v3703_v3 = vadd.f32 %v3702_v40, %v3701_v25  ;;  %2756 = vmatprep.mubr.f32.mxu1 %v383_v58  ;;  %v1504_v2 = vadd.f32 %v3623_v62, %v5839_v31  ;;  %v3624_v7 = vpop.f32.mrb[58].mxu0  ;;  %v476_v25 = vld [vmem:[%s5516_s7 + $0x520] sm:$0xff]  ;;  %v478_v40 = vld [vmem:[%s5516_s7 + $0x530] sm:$0xff] }
 0x215   : > { %v3625_v11 = vpop.f32.mrb[59].mxu0  ;;  %2612 = vmatmul.mubr.f32.gmra.mrb[164].mxu0 %v380_v63  ;;  %v501_v63 = vld [vmem:[%s5516_s7 + $0x5e8] sm:$0xff] }
 0x216   : > { %v3704_v39 = vpop.f32.mrb[58].mxu1  ;;  %v5951_v12 = vadd.f32 %v3703_v3, %v1504_v2  ;;  %v3626_v14 = vadd.f32 %v3625_v11, %v3624_v7  ;;  %2616 = vmatprep.mubr.f32.mxu0 %v405_v5 }
 0x217   : > { %v3705_v15 = vpop.f32.mrb[59].mxu1  ;;  %2757 = vmatmul.mubr.f32.gmra.mrb[164].mxu1 %v382_v4  ;;  %v503_v4 = vld [vmem:[%s5516_s7 + $0x5f8] sm:$0xff] }
 0x218   : > { %v3706_v17 = vadd.f32 %v3705_v15, %v3704_v39  ;;  %2761 = vmatprep.mubr.f32.mxu1 %v407_v10  ;;  %v1509_v31 = vadd.f32 %v3626_v14, %v5846_v61  ;;  %v3627_v21 = vpop.f32.mrb[60].mxu0  ;;  %v500_v39 = vld [vmem:[%s5516_s7 + $0x5e0] sm:$0xff]  ;;  %v502_v15 = vld [vmem:[%s5516_s7 + $0x5f0] sm:$0xff] }
 0x219   : > { %v3628_v23 = vpop.f32.mrb[61].mxu0  ;;  %2617 = vmatmul.mubr.f32.gmra.mrb[166].mxu0 %v404_v52  ;;  %v525_v52 = vld [vmem:[%s5516_s7 + $0x6a8] sm:$0xff] }
 0x21a   : > { %v3707_v53 = vpop.f32.mrb[60].mxu1  ;;  %v5958_v24 = vadd.f32 %v3706_v17, %v1509_v31  ;;  %v3629_v26 = vadd.f32 %v3628_v23, %v3627_v21  ;;  %2621 = vmatprep.mubr.f32.mxu0 %v429_v19 }
 0x21b   : > { %v3708_v29 = vpop.f32.mrb[61].mxu1  ;;  %2762 = vmatmul.mubr.f32.gmra.mrb[166].mxu1 %v406_v18  ;;  %v527_v18 = vld [vmem:[%s5516_s7 + $0x6b8] sm:$0xff] }
 0x21c   : > { %v3709_v32 = vadd.f32 %v3708_v29, %v3707_v53  ;;  %2766 = vmatprep.mubr.f32.mxu1 %v431_v22  ;;  %v1514_v61 = vadd.f32 %v3629_v26, %v5853_v28  ;;  %v3630_v38 = vpop.f32.mrb[62].mxu0  ;;  %v524_v53 = vld [vmem:[%s5516_s7 + $0x6a0] sm:$0xff]  ;;  %v526_v29 = vld [vmem:[%s5516_s7 + $0x6b0] sm:$0xff] }
 0x21d   : > { %v3631_v42 = vpop.f32.mrb[63].mxu0  ;;  %2622 = vmatmul.mubr.f32.gmra.mrb[168].mxu0 %v428_v0  ;;  %v549_v0 = vld [vmem:[%s5516_s7 + $0x768] sm:$0xff] }
 0x21e   : > { %v3710_v8 = vpop.f32.mrb[62].mxu1  ;;  %v5965_v44 = vadd.f32 %v3709_v32, %v1514_v61  ;;  %v3632_v45 = vadd.f32 %v3631_v42, %v3630_v38  ;;  %2626 = vmatprep.mubr.f32.mxu0 %v453_v35 }
 0x21f   : > { %v3711_v46 = vpop.f32.mrb[63].mxu1  ;;  %2767 = vmatmul.mubr.f32.gmra.mrb[168].mxu1 %v430_v34  ;;  %v551_v34 = vld [vmem:[%s5516_s7 + $0x778] sm:$0xff] }
 0x220   : > { %v3712_v47 = vadd.f32 %v3711_v46, %v3710_v8  ;;  %2771 = vmatprep.mubr.f32.mxu1 %v455_v41  ;;  %v1519_v28 = vadd.f32 %v3632_v45, %v5860_v33  ;;  %v3745_v51 = vpop.f32.mrb[64].mxu0  ;;  %v548_v8 = vld [vmem:[%s5516_s7 + $0x760] sm:$0xff]  ;;  %v550_v46 = vld [vmem:[%s5516_s7 + $0x770] sm:$0xff] }
 0x221   : > { %v3746_v55 = vpop.f32.mrb[65].mxu0  ;;  %2627 = vmatmul.mubr.f32.gmra.mrb[170].mxu0 %v452_v13  ;;  %v573_v13 = vld [vmem:[%s5516_s7 + $0x828] sm:$0xff] }
 0x222   : > { %v3825_v37 = vpop.f32.mrb[64].mxu1  ;;  %v5972_v57 = vadd.f32 %v3712_v47, %v1519_v28  ;;  %v3747_v58 = vadd.f32 %v3746_v55, %v3745_v51  ;;  %2631 = vmatprep.mubr.f32.mxu0 %v477_v49 }
 0x223   : > { %v3826_v59 = vpop.f32.mrb[65].mxu1  ;;  %2772 = vmatmul.mubr.f32.gmra.mrb[170].mxu1 %v454_v48  ;;  %v575_v48 = vld [vmem:[%s5516_s7 + $0x838] sm:$0xff] }
 0x224   : > { %v3827_v62 = vadd.f32 %v3826_v59, %v3825_v37  ;;  %2776 = vmatprep.mubr.f32.mxu1 %v479_v54  ;;  %v1734_v33 = vadd.f32 %v3747_v58, %v5867_v9  ;;  %v3748_v3 = vpop.f32.mrb[66].mxu0  ;;  %v572_v37 = vld [vmem:[%s5516_s7 + $0x820] sm:$0xff]  ;;  %v574_v59 = vld [vmem:[%s5516_s7 + $0x830] sm:$0xff] }
 0x225   : > { %v3749_v5 = vpop.f32.mrb[67].mxu0  ;;  %2632 = vmatmul.mubr.f32.gmra.mrb[172].mxu0 %v476_v25  ;;  %v597_v25 = vld [vmem:[%s5516_s7 + $0x8e8] sm:$0xff] }
 0x226   : > { %v3828_v2 = vpop.f32.mrb[66].mxu1  ;;  %v5979_v7 = vadd.f32 %v3827_v62, %v1734_v33  ;;  %v3750_v10 = vadd.f32 %v3749_v5, %v3748_v3  ;;  %2636 = vmatprep.mubr.f32.mxu0 %v501_v63 }
 0x227   : > { %v3829_v11 = vpop.f32.mrb[67].mxu1  ;;  %2777 = vmatmul.mubr.f32.gmra.mrb[172].mxu1 %v478_v40  ;;  %v599_v40 = vld [vmem:[%s5516_s7 + $0x8f8] sm:$0xff] }
 0x228   : > { %v3830_v14 = vadd.f32 %v3829_v11, %v3828_v2  ;;  %2781 = vmatprep.mubr.f32.mxu1 %v503_v4  ;;  %v1739_v9 = vadd.f32 %v3750_v10, %v5874_v43  ;;  %v3751_v17 = vpop.f32.mrb[68].mxu0  ;;  %v596_v2 = vld [vmem:[%s5516_s7 + $0x8e0] sm:$0xff]  ;;  %v598_v11 = vld [vmem:[%s5516_s7 + $0x8f0] sm:$0xff] }
 0x229   : > { %v3752_v19 = vpop.f32.mrb[69].mxu0  ;;  %2637 = vmatmul.mubr.f32.gmra.mrb[174].mxu0 %v500_v39  ;;  %v621_v39 = vld [vmem:[%s5516_s7 + $0x9a8] sm:$0xff] }
 0x22a   : > { %v3831_v31 = vpop.f32.mrb[68].mxu1  ;;  %v5986_v21 = vadd.f32 %v3830_v14, %v1739_v9  ;;  %v3753_v22 = vadd.f32 %v3752_v19, %v3751_v17  ;;  %2641 = vmatprep.mubr.f32.mxu0 %v525_v52 }
 0x22b   : > { %v3832_v23 = vpop.f32.mrb[69].mxu1  ;;  %2782 = vmatmul.mubr.f32.gmra.mrb[174].mxu1 %v502_v15  ;;  %v623_v15 = vld [vmem:[%s5516_s7 + $0x9b8] sm:$0xff] }
 0x22c   : > { %v3833_v26 = vadd.f32 %v3832_v23, %v3831_v31  ;;  %2786 = vmatprep.mubr.f32.mxu1 %v527_v18  ;;  %v1744_v43 = vadd.f32 %v3753_v22, %v5881_v56  ;;  %v3754_v32 = vpop.f32.mrb[70].mxu0  ;;  %v620_v31 = vld [vmem:[%s5516_s7 + $0x9a0] sm:$0xff]  ;;  %v622_v23 = vld [vmem:[%s5516_s7 + $0x9b0] sm:$0xff] }
 0x22d   : > { %v3755_v35 = vpop.f32.mrb[71].mxu0  ;;  %2642 = vmatmul.mubr.f32.gmra.mrb[176].mxu0 %v524_v53  ;;  %v645_v53 = vld [vmem:[%s5516_s7 + $0xa68] sm:$0xff] }
 0x22e   : > { %v3834_v61 = vpop.f32.mrb[70].mxu1  ;;  %v5993_v38 = vadd.f32 %v3833_v26, %v1744_v43  ;;  %v3756_v41 = vadd.f32 %v3755_v35, %v3754_v32  ;;  %2646 = vmatprep.mubr.f32.mxu0 %v549_v0 }
 0x22f   : > { %v3835_v42 = vpop.f32.mrb[71].mxu1  ;;  %2787 = vmatmul.mubr.f32.gmra.mrb[176].mxu1 %v526_v29  ;;  %v647_v29 = vld [vmem:[%s5516_s7 + $0xa78] sm:$0xff] }
 0x230   : > { %v3836_v45 = vadd.f32 %v3835_v42, %v3834_v61  ;;  %2791 = vmatprep.mubr.f32.mxu1 %v551_v34  ;;  %v1749_v56 = vadd.f32 %v3756_v41, %v5888_v6  ;;  %v3757_v47 = vpop.f32.mrb[72].mxu0  ;;  %v644_v61 = vld [vmem:[%s5516_s7 + $0xa60] sm:$0xff]  ;;  %v646_v42 = vld [vmem:[%s5516_s7 + $0xa70] sm:$0xff] }
 0x231   : > { %v3758_v49 = vpop.f32.mrb[73].mxu0  ;;  %2647 = vmatmul.mubr.f32.gmra.mrb[178].mxu0 %v548_v8  ;;  %v669_v8 = vld [vmem:[%s5516_s7 + $0xb28] sm:$0xff] }
 0x232   : > { %v3837_v28 = vpop.f32.mrb[72].mxu1  ;;  %v6000_v51 = vadd.f32 %v3836_v45, %v1749_v56  ;;  %v3759_v54 = vadd.f32 %v3758_v49, %v3757_v47  ;;  %2651 = vmatprep.mubr.f32.mxu0 %v573_v13 }
 0x233   : > { %v3838_v55 = vpop.f32.mrb[73].mxu1  ;;  %2792 = vmatmul.mubr.f32.gmra.mrb[178].mxu1 %v550_v46  ;;  %v671_v46 = vld [vmem:[%s5516_s7 + $0xb38] sm:$0xff] }
 0x234   : > { %v3839_v58 = vadd.f32 %v3838_v55, %v3837_v28  ;;  %2796 = vmatprep.mubr.f32.mxu1 %v575_v48  ;;  %v1754_v6 = vadd.f32 %v3759_v54, %v5895_v20  ;;  %v3760_v62 = vpop.f32.mrb[74].mxu0  ;;  %v668_v28 = vld [vmem:[%s5516_s7 + $0xb20] sm:$0xff]  ;;  %v670_v55 = vld [vmem:[%s5516_s7 + $0xb30] sm:$0xff] }
 0x235   : > { %v3761_v63 = vpop.f32.mrb[75].mxu0  ;;  %2652 = vmatmul.mubr.f32.gmra.mrb[180].mxu0 %v572_v37  ;;  %v693_v37 = vld [vmem:[%s5516_s7 + $0xbe8] sm:$0xff] }
 0x236   : > { %v3840_v33 = vpop.f32.mrb[74].mxu1  ;;  %v6007_v3 = vadd.f32 %v3839_v58, %v1754_v6  ;;  %v3762_v4 = vadd.f32 %v3761_v63, %v3760_v62  ;;  %2656 = vmatprep.mubr.f32.mxu0 %v597_v25 }
 0x237   : > { %v3841_v5 = vpop.f32.mrb[75].mxu1  ;;  %2797 = vmatmul.mubr.f32.gmra.mrb[180].mxu1 %v574_v59  ;;  %v695_v59 = vld [vmem:[%s5516_s7 + $0xbf8] sm:$0xff] }
 0x238   : > { %v3842_v10 = vadd.f32 %v3841_v5, %v3840_v33  ;;  %2801 = vmatprep.mubr.f32.mxu1 %v599_v40  ;;  %v1759_v20 = vadd.f32 %v3762_v4, %v5902_v36  ;;  %v3763_v14 = vpop.f32.mrb[76].mxu0  ;;  %v692_v33 = vld [vmem:[%s5516_s7 + $0xbe0] sm:$0xff]  ;;  %v694_v5 = vld [vmem:[%s5516_s7 + $0xbf0] sm:$0xff] }
 0x239   : > { %v3764_v52 = vpop.f32.mrb[77].mxu0  ;;  %2657 = vmatmul.mubr.f32.gmra.mrb[182].mxu0 %v596_v2 }
 0x23a   : > { %v3843_v9 = vpop.f32.mrb[76].mxu1  ;;  %v6014_v17 = vadd.f32 %v3842_v10, %v1759_v20  ;;  %v3765_v18 = vadd.f32 %v3764_v52, %v3763_v14  ;;  %2661 = vmatprep.mubr.f32.mxu0 %v621_v39  ;;  %v2843_v52 = vld [vmem:[#allocation7] sm:$0xff] }
 0x23b   : > { %v3844_v19 = vpop.f32.mrb[77].mxu1  ;;  %2802 = vmatmul.mubr.f32.gmra.mrb[182].mxu1 %v598_v11 }
 0x23c   : > { %v3845_v22 = vadd.f32 %v3844_v19, %v3843_v9  ;;  %2806 = vmatprep.mubr.f32.mxu1 %v623_v15  ;;  %v1764_v36 = vadd.f32 %v3765_v18, %v5909_v50  ;;  %v3766_v26 = vpop.f32.mrb[78].mxu0  ;;  %v2844_v9 = vld [vmem:[#allocation7 + $0x8] sm:$0xff] }
 0x23d   : > { %v3767_v0 = vpop.f32.mrb[79].mxu0  ;;  %2662 = vmatmul.mubr.f32.gmra.mrb[184].mxu0 %v620_v31  ;;  %v4825_v31 = vpack.c.bf16 %v2844_v9, %v2843_v52 }
 0x23e   : > { %v3846_v43 = vpop.f32.mrb[78].mxu1  ;;  %v6021_v32 = vadd.f32 %v3845_v22, %v1764_v36  ;;  %v3768_v34 = vadd.f32 %v3767_v0, %v3766_v26  ;;  %2666 = vmatprep.mubr.f32.mxu0 %v645_v53  ;;  %v2846_v0 = vld [vmem:[#allocation7 + $0x18] sm:$0xff] }
 0x23f   : > { %v3847_v35 = vpop.f32.mrb[79].mxu1  ;;  %2807 = vmatmul.mubr.f32.gmra.mrb[184].mxu1 %v622_v23  ;;  %4826 = vmatprep.subr.bf16.mxu0 %v4825_v31 }
 0x240   : > { %v3848_v41 = vadd.f32 %v3847_v35, %v3846_v43  ;;  %2811 = vmatprep.mubr.f32.mxu1 %v647_v29  ;;  %v1769_v50 = vadd.f32 %v3768_v34, %v5916_v1  ;;  %v3769_v45 = vpop.f32.mrb[80].mxu0  ;;  %4857 = vmatprep.subr.bf16.mxu1 %v4825_v31  ;;  %v2845_v29 = vld [vmem:[#allocation7 + $0x10] sm:$0xff] }
 0x241   : > { %v3770_v13 = vpop.f32.mrb[81].mxu0  ;;  %2667 = vmatmul.mubr.f32.gmra.mrb[186].mxu0 %v644_v61  ;;  %4865 = vmatpush3.bf16.msra.mxu1 %v4825_v31  ;;  %v4829_v35 = vpack.c.bf16 %v2846_v0, %v2845_v29 }
 0x242   : > { %v3849_v56 = vpop.f32.mrb[80].mxu1  ;;  %v6028_v47 = vadd.f32 %v3848_v41, %v1769_v50  ;;  %v3771_v48 = vadd.f32 %v3770_v13, %v3769_v45  ;;  %2671 = vmatprep.mubr.f32.mxu0 %v669_v8  ;;  %4828 = vmatpush3.bf16.msra.mxu0 %v4825_v31  ;;  %v2847_v45 = vld [vmem:[#allocation7 + $0x20] sm:$0xff]  ;;  %v2854_v31 = vld [vmem:[#allocation7 + $0x58] sm:$0xff] }
 0x243   : > { %v3850_v49 = vpop.f32.mrb[81].mxu1  ;;  %2812 = vmatmul.mubr.f32.gmra.mrb[186].mxu1 %v646_v42  ;;  %4830 = vmatprep.subr.bf16.mxu0 %v4829_v35 }
 0x244   : > { %v3851_v54 = vadd.f32 %v3850_v49, %v3849_v56  ;;  %2816 = vmatprep.mubr.f32.mxu1 %v671_v46  ;;  %v1774_v1 = vadd.f32 %v3771_v48, %v5923_v16  ;;  %v3772_v58 = vpop.f32.mrb[82].mxu0  ;;  %4858 = vmatprep.subr.bf16.mxu1 %v4829_v35  ;;  %v2848_v46 = vld [vmem:[#allocation7 + $0x28] sm:$0xff] }
 0x245   : > { %v3773_v25 = vpop.f32.mrb[83].mxu0  ;;  %2672 = vmatmul.mubr.f32.gmra.mrb[188].mxu0 %v668_v28  ;;  %4866 = vmatpush3.bf16.msra.mxu1 %v4829_v35  ;;  %v4833_v48 = vpack.c.bf16 %v2848_v46, %v2847_v45 }
 0x246   : > { %v3852_v6 = vpop.f32.mrb[82].mxu1  ;;  %v6035_v62 = vadd.f32 %v3851_v54, %v1774_v1  ;;  %v3774_v40 = vadd.f32 %v3773_v25, %v3772_v58  ;;  %2676 = vmatprep.mubr.f32.mxu0 %v693_v37  ;;  %4832 = vmatpush3.bf16.msra.mxu0 %v4829_v35  ;;  %v2849_v1 = vld [vmem:[#allocation7 + $0x30] sm:$0xff]  ;;  %v2850_v58 = vld [vmem:[#allocation7 + $0x38] sm:$0xff]  ;;  %v2856_v35 = vld [vmem:[#allocation7 + $0x68] sm:$0xff] }
 0x247   : > { %v3853_v63 = vpop.f32.mrb[83].mxu1  ;;  %2817 = vmatmul.mubr.f32.gmra.mrb[188].mxu1 %v670_v55  ;;  %4834 = vmatprep.subr.bf16.mxu0 %v4833_v48 }
 0x248   : > { %v3854_v4 = vadd.f32 %v3853_v63, %v3852_v6  ;;  %2821 = vmatprep.mubr.f32.mxu1 %v695_v59  ;;  %v1779_v2 = vadd.f32 %v3774_v40, %v5930_v30  ;;  %v3775_v10 = vpop.f32.mrb[84].mxu0  ;;  %4859 = vmatprep.subr.bf16.mxu1 %v4833_v48  ;;  %v4837_v6 = vpack.c.bf16 %v2850_v58, %v2849_v1 }
 0x249   : > { %v3776_v11 = vpop.f32.mrb[85].mxu0  ;;  %2677 = vmatmul.mubr.f32.gmra.mrb[190].mxu0 %v692_v33  ;;  %4867 = vmatpush3.bf16.msra.mxu1 %v4833_v48 }
 0x24a   : > { %v3855_v16 = vpop.f32.mrb[84].mxu1  ;;  %v6040_v39 = vadd.f32 %v3854_v4, %v1779_v2  ;;  %v3777_v20 = vadd.f32 %v3776_v11, %v3775_v10  ;;  %4836 = vmatpush3.bf16.msra.mxu0 %v4833_v48  ;;  %4860 = vmatprep.subr.bf16.mxu1 %v4837_v6  ;;  %v2851_v2 = vld [vmem:[#allocation7 + $0x40] sm:$0xff]  ;;  %v2852_v10 = vld [vmem:[#allocation7 + $0x48] sm:$0xff]  ;;  %v2858_v48 = vld [vmem:[#allocation7 + $0x78] sm:$0xff] }
 0x24b   : > { %v3856_v14 = vpop.f32.mrb[85].mxu1  ;;  %2822 = vmatmul.mubr.f32.gmra.mrb[190].mxu1 %v694_v5  ;;  %4838 = vmatprep.subr.bf16.mxu0 %v4837_v6 }
 0x24c   : > { %v3857_v15 = vadd.f32 %v3856_v14, %v3855_v16  ;;  %v1784_v18 = vadd.f32 %v3777_v20, %v5937_v27  ;;  %v3778_v19 = vpop.f32.mrb[86].mxu0  ;;  %v4841_v20 = vpack.c.bf16 %v2852_v10, %v2851_v2 }
 0x24d   : > { %v3779_v22 = vpop.f32.mrb[87].mxu0  ;;  %4868 = vmatpush3.bf16.msra.mxu1 %v4837_v6 }
 0x24e   : > { %v3858_v23 = vpop.f32.mrb[86].mxu1  ;;  %v6043_v53 = vadd.f32 %v3857_v15, %v1784_v18  ;;  %v3780_v30 = vadd.f32 %v3779_v22, %v3778_v19  ;;  %4840 = vmatpush3.bf16.msra.mxu0 %v4837_v6  ;;  %4861 = vmatprep.subr.bf16.mxu1 %v4841_v20  ;;  %v2853_v19 = vld [vmem:[#allocation7 + $0x50] sm:$0xff] }
 0x24f   : > { %v3859_v36 = vpop.f32.mrb[87].mxu1  ;;  %4842 = vmatprep.subr.bf16.mxu0 %v4841_v20 }
 0x250   : > { %v3860_v26 = vadd.f32 %v3859_v36, %v3858_v23  ;;  %v1789_v43 = vadd.f32 %v3780_v30, %v5944_v60  ;;  %v3781_v34 = vpop.f32.mrb[88].mxu0  ;;  %v4845_v30 = vpack.c.bf16 %v2854_v31, %v2853_v19 }
 0x251   : > { %v3782_v27 = vpop.f32.mrb[89].mxu0  ;;  %4869 = vmatpush3.bf16.msra.mxu1 %v4841_v20 }
 0x252   : > { %v3861_v61 = vpop.f32.mrb[88].mxu1  ;;  %v6046_v41 = vadd.f32 %v3860_v26, %v1789_v43  ;;  %v3783_v42 = vadd.f32 %v3782_v27, %v3781_v34  ;;  %4844 = vmatpush3.bf16.msra.mxu0 %v4841_v20  ;;  %4862 = vmatprep.subr.bf16.mxu1 %v4845_v30  ;;  %v2855_v34 = vld [vmem:[#allocation7 + $0x60] sm:$0xff] }
 0x253   : > { %v3862_v8 = vpop.f32.mrb[89].mxu1  ;;  %4846 = vmatprep.subr.bf16.mxu0 %v4845_v30 }
 0x254   : > { %v3863_v50 = vadd.f32 %v3862_v8, %v3861_v61  ;;  %v1794_v13 = vadd.f32 %v3783_v42, %v5951_v12  ;;  %v3784_v56 = vpop.f32.mrb[90].mxu0  ;;  %v4849_v42 = vpack.c.bf16 %v2856_v35, %v2855_v34 }
 0x255   : > { %v3785_v60 = vpop.f32.mrb[91].mxu0  ;;  %4870 = vmatpush3.bf16.msra.mxu1 %v4845_v30 }
 0x256   : > { %v3864_v49 = vpop.f32.mrb[90].mxu1  ;;  %v6049_v28 = vadd.f32 %v3863_v50, %v1794_v13  ;;  %v3786_v54 = vadd.f32 %v3785_v60, %v3784_v56  ;;  %4848 = vmatpush3.bf16.msra.mxu0 %v4845_v30  ;;  %4863 = vmatprep.subr.bf16.mxu1 %v4849_v42  ;;  %v2857_v56 = vld [vmem:[#allocation7 + $0x70] sm:$0xff] }
 0x257   : > { %v3865_v55 = vpop.f32.mrb[91].mxu1  ;;  %4850 = vmatprep.subr.bf16.mxu0 %v4849_v42 }
 0x258   : > { %v3866_v37 = vadd.f32 %v3865_v55, %v3864_v49  ;;  %v1799_v59 = vadd.f32 %v3786_v54, %v5958_v24  ;;  %v3787_v25 = vpop.f32.mrb[92].mxu0  ;;  %v4853_v54 = vpack.c.bf16 %v2858_v48, %v2857_v56 }
 0x259   : > { %v3788_v12 = vpop.f32.mrb[93].mxu0  ;;  %4871 = vmatpush3.bf16.msra.mxu1 %v4849_v42 }
 0x25a   : > { %v3867_v40 = vpop.f32.mrb[92].mxu1  ;;  %v6052_v63 = vadd.f32 %v3866_v37, %v1799_v59  ;;  %v3789_v33 = vadd.f32 %v3788_v12, %v3787_v25  ;;  %4852 = vmatpush3.bf16.msra.mxu0 %v4849_v42  ;;  %4864 = vmatprep.subr.bf16.mxu1 %v4853_v54 }
 0x25b   : > { %v3868_v4 = vpop.f32.mrb[93].mxu1  ;;  %4854 = vmatprep.subr.bf16.mxu0 %v4853_v54 }
 0x25c   : > { %v3869_v5 = vadd.f32 %v3868_v4, %v3867_v40  ;;  %v1804_v11 = vadd.f32 %v3789_v33, %v5965_v44  ;;  %v3790_v16 = vpop.f32.mrb[94].mxu0 }
 0x25d   : > { %v3791_v24 = vpop.f32.mrb[95].mxu0  ;;  %4872 = vmatpush3.bf16.msra.mxu1 %v4853_v54 }
 0x25e   : > { %v3870_v14 = vpop.f32.mrb[94].mxu1  ;;  %v6055_v15 = vadd.f32 %v3869_v5, %v1804_v11  ;;  %v3792_v52 = vadd.f32 %v3791_v24, %v3790_v16  ;;  %4856 = vmatpush3.bf16.msra.mxu0 %v4853_v54 }
 0x25f   : > { %v3871_v9 = vpop.f32.mrb[95].mxu1 }
 0x260   : > { %v3872_v18 = vadd.f32 %v3871_v9, %v3870_v14  ;;  %v1809_v22 = vadd.f32 %v3792_v52, %v5972_v57  ;;  %v3905_v23 = vpop.f32.mrb[96].mxu0 }
 0x261   : > { %v3906_v44 = vpop.f32.mrb[97].mxu0 }
 0x262   : > { %v3985_v36 = vpop.f32.mrb[96].mxu1  ;;  %v6058_v26 = vadd.f32 %v3872_v18, %v1809_v22  ;;  %v3907_v29 = vadd.f32 %v3906_v44, %v3905_v23 }
 0x263   : > { %v3986_v0 = vpop.f32.mrb[97].mxu1 }
 0x264   : > { %v3987_v43 = vadd.f32 %v3986_v0, %v3985_v36  ;;  %v2024_v27 = vadd.f32 %v3907_v29, %v5979_v7  ;;  %v3908_v61 = vpop.f32.mrb[98].mxu0 }
 0x265   : > { %v3909_v57 = vpop.f32.mrb[99].mxu0 }
 0x266   : > { %v3988_v8 = vpop.f32.mrb[98].mxu1  ;;  %v6061_v50 = vadd.f32 %v3987_v43, %v2024_v27  ;;  %v3910_v45 = vadd.f32 %v3909_v57, %v3908_v61 }
 0x267   : > { %v3989_v46 = vpop.f32.mrb[99].mxu1 }
 0x268   : > { %v3990_v13 = vadd.f32 %v3989_v46, %v3988_v8  ;;  %v2029_v60 = vadd.f32 %v3910_v45, %v5986_v21  ;;  %v3911_v49 = vpop.f32.mrb[100].mxu0 }
 0x269   : > { %v3912_v7 = vpop.f32.mrb[101].mxu0 }
 0x26a   : > { %v3991_v55 = vpop.f32.mrb[100].mxu1  ;;  %v6064_v37 = vadd.f32 %v3990_v13, %v2029_v60  ;;  %v3913_v1 = vadd.f32 %v3912_v7, %v3911_v49 }
 0x26b   : > { %v3992_v58 = vpop.f32.mrb[101].mxu1 }
 0x26c   : > { %v3993_v59 = vadd.f32 %v3992_v58, %v3991_v55  ;;  %v2034_v25 = vadd.f32 %v3913_v1, %v5993_v38  ;;  %v3914_v6 = vpop.f32.mrb[102].mxu0 }
 0x26d   : > { %v3915_v12 = vpop.f32.mrb[103].mxu0 }
 0x26e   : > { %v3994_v40 = vpop.f32.mrb[102].mxu1  ;;  %v6067_v33 = vadd.f32 %v3993_v59, %v2034_v25  ;;  %v3916_v21 = vadd.f32 %v3915_v12, %v3914_v6 }
 0x26f   : > { %v3995_v4 = vpop.f32.mrb[103].mxu1 }
 0x270   : > { %v3996_v5 = vadd.f32 %v3995_v4, %v3994_v40  ;;  %v2039_v2 = vadd.f32 %v3916_v21, %v6000_v51  ;;  %v3917_v10 = vpop.f32.mrb[104].mxu0 }
 0x271   : > { %v3918_v11 = vpop.f32.mrb[105].mxu0 }
 0x272   : > { %v3997_v16 = vpop.f32.mrb[104].mxu1  ;;  %v6070_v20 = vadd.f32 %v3996_v5, %v2039_v2  ;;  %v3919_v24 = vadd.f32 %v3918_v11, %v3917_v10 }
 0x273   : > { %v3998_v14 = vpop.f32.mrb[105].mxu1 }
 0x274   : > { %v3999_v52 = vadd.f32 %v3998_v14, %v3997_v16  ;;  %v2044_v38 = vadd.f32 %v3919_v24, %v6007_v3  ;;  %v3920_v9 = vpop.f32.mrb[106].mxu0 }
 0x275   : > { %v3921_v18 = vpop.f32.mrb[107].mxu0 }
 0x276   : > { %v4000_v19 = vpop.f32.mrb[106].mxu1  ;;  %v6073_v31 = vadd.f32 %v3999_v52, %v2044_v38  ;;  %v3922_v22 = vadd.f32 %v3921_v18, %v3920_v9 }
 0x277   : > { %v4001_v23 = vpop.f32.mrb[107].mxu1 }
 0x278   : > { %v4002_v30 = vadd.f32 %v4001_v23, %v4000_v19  ;;  %v2049_v51 = vadd.f32 %v3922_v22, %v6014_v17  ;;  %v3923_v44 = vpop.f32.mrb[108].mxu0 }
 0x279   : > { %v3924_v36 = vpop.f32.mrb[109].mxu0 }
 0x27a   : > { %v4003_v29 = vpop.f32.mrb[108].mxu1  ;;  %v6076_v0 = vadd.f32 %v4002_v30, %v2049_v51  ;;  %v3925_v43 = vadd.f32 %v3924_v36, %v3923_v44 }
 0x27b   : > { %v4004_v34 = vpop.f32.mrb[109].mxu1 }
 0x27c   : > { %v4005_v35 = vadd.f32 %v4004_v34, %v4003_v29  ;;  %v2054_v3 = vadd.f32 %v3925_v43, %v6021_v32  ;;  %v3926_v27 = vpop.f32.mrb[110].mxu0 }
 0x27d   : > { %v3927_v61 = vpop.f32.mrb[111].mxu0 }
 0x27e   : > { %v4006_v42 = vpop.f32.mrb[110].mxu1  ;;  %v6079_v57 = vadd.f32 %v4005_v35, %v2054_v3  ;;  %v3928_v8 = vadd.f32 %v3927_v61, %v3926_v27 }
 0x27f   : > { %v4007_v45 = vpop.f32.mrb[111].mxu1 }
 0x280   : > { %v4008_v46 = vadd.f32 %v4007_v45, %v4006_v42  ;;  %v2059_v17 = vadd.f32 %v3928_v8, %v6028_v47  ;;  %v3929_v13 = vpop.f32.mrb[112].mxu0 }
 0x281   : > { %v3930_v56 = vpop.f32.mrb[113].mxu0 }
 0x282   : > { %v4009_v48 = vpop.f32.mrb[112].mxu1  ;;  %v6082_v60 = vadd.f32 %v4008_v46, %v2059_v17  ;;  %v3931_v49 = vadd.f32 %v3930_v56, %v3929_v13 }
 0x283   : > { %v4010_v54 = vpop.f32.mrb[113].mxu1 }
 0x284   : > { %v4011_v7 = vadd.f32 %v4010_v54, %v4009_v48  ;;  %v2064_v32 = vadd.f32 %v3931_v49, %v6035_v62  ;;  %v3932_v55 = vpop.f32.mrb[114].mxu0 }
 0x285   : > { %v3933_v1 = vpop.f32.mrb[115].mxu0 }
 0x286   : > { %v4012_v58 = vpop.f32.mrb[114].mxu1  ;;  %v6085_v59 = vadd.f32 %v4011_v7, %v2064_v32  ;;  %v3934_v25 = vadd.f32 %v3933_v1, %v3932_v55 }
 0x287   : > { %v4013_v6 = vpop.f32.mrb[115].mxu1 }
 0x288   : > { %v4014_v12 = vadd.f32 %v4013_v6, %v4012_v58  ;;  %v2069_v47 = vadd.f32 %v3934_v25, %v6040_v39  ;;  %v3935_v40 = vpop.f32.mrb[116].mxu0 }
 0x289   : > { %v3936_v21 = vpop.f32.mrb[117].mxu0 }
 0x28a   : > { %v4015_v4 = vpop.f32.mrb[116].mxu1  ;;  %v6088_v5 = vadd.f32 %v4014_v12, %v2069_v47  ;;  %v3937_v2 = vadd.f32 %v3936_v21, %v3935_v40 }
 0x28b   : > { %v4016_v10 = vpop.f32.mrb[117].mxu1 }
 0x28c   : > { %v4017_v11 = vadd.f32 %v4016_v10, %v4015_v4  ;;  %v2074_v62 = vadd.f32 %v3937_v2, %v6043_v53  ;;  %v3938_v16 = vpop.f32.mrb[118].mxu0 }
 0x28d   : > { %v3939_v24 = vpop.f32.mrb[119].mxu0 }
 0x28e   : > { %v4018_v14 = vpop.f32.mrb[118].mxu1  ;;  %v6091_v52 = vadd.f32 %v4017_v11, %v2074_v62  ;;  %v3940_v38 = vadd.f32 %v3939_v24, %v3938_v16 }
 0x28f   : > { %v4019_v9 = vpop.f32.mrb[119].mxu1 }
 0x290   : > { %v4020_v18 = vadd.f32 %v4019_v9, %v4018_v14  ;;  %v2079_v39 = vadd.f32 %v3940_v38, %v6046_v41  ;;  %v3941_v19 = vpop.f32.mrb[120].mxu0 }
 0x291   : > { %v3942_v22 = vpop.f32.mrb[121].mxu0 }
 0x292   : > { %v4021_v23 = vpop.f32.mrb[120].mxu1  ;;  %v6094_v30 = vadd.f32 %v4020_v18, %v2079_v39  ;;  %v3943_v51 = vadd.f32 %v3942_v22, %v3941_v19 }
 0x293   : > { %v4022_v44 = vpop.f32.mrb[121].mxu1 }
 0x294   : > { %v4023_v36 = vadd.f32 %v4022_v44, %v4021_v23  ;;  %v2084_v53 = vadd.f32 %v3943_v51, %v6049_v28  ;;  %v3944_v29 = vpop.f32.mrb[122].mxu0 }
 0x295   : > { %v3945_v43 = vpop.f32.mrb[123].mxu0 }
 0x296   : > { %v4024_v34 = vpop.f32.mrb[122].mxu1  ;;  %v6097_v35 = vadd.f32 %v4023_v36, %v2084_v53  ;;  %v3946_v3 = vadd.f32 %v3945_v43, %v3944_v29 }
 0x297   : > { %v4025_v27 = vpop.f32.mrb[123].mxu1 }
 0x298   : > { %v4026_v61 = vadd.f32 %v4025_v27, %v4024_v34  ;;  %v2089_v41 = vadd.f32 %v3946_v3, %v6052_v63  ;;  %v3947_v42 = vpop.f32.mrb[124].mxu0 }
 0x299   : > { %v3948_v8 = vpop.f32.mrb[125].mxu0 }
 0x29a   : > { %v4027_v45 = vpop.f32.mrb[124].mxu1  ;;  %v6100_v46 = vadd.f32 %v4026_v61, %v2089_v41  ;;  %v3949_v17 = vadd.f32 %v3948_v8, %v3947_v42 }
 0x29b   : > { %v4028_v13 = vpop.f32.mrb[125].mxu1 }
 0x29c   : > { %v4029_v56 = vadd.f32 %v4028_v13, %v4027_v45  ;;  %v2094_v28 = vadd.f32 %v3949_v17, %v6055_v15  ;;  %v3950_v48 = vpop.f32.mrb[126].mxu0 }
 0x29d   : > { %v3951_v49 = vpop.f32.mrb[127].mxu0 }
 0x29e   : > { %v4030_v54 = vpop.f32.mrb[126].mxu1  ;;  %v6103_v7 = vadd.f32 %v4029_v56, %v2094_v28  ;;  %v3952_v32 = vadd.f32 %v3951_v49, %v3950_v48 }
 0x29f   : > { %v4031_v55 = vpop.f32.mrb[127].mxu1 }
 0x2a0   : > { %v4032_v1 = vadd.f32 %v4031_v55, %v4030_v54  ;;  %v2099_v63 = vadd.f32 %v3952_v32, %v6058_v26  ;;  %v4065_v58 = vpop.f32.mrb[128].mxu0 }
 0x2a1   : > { %v4066_v25 = vpop.f32.mrb[129].mxu0 }
 0x2a2   : > { %v4145_v6 = vpop.f32.mrb[128].mxu1  ;;  %v6106_v12 = vadd.f32 %v4032_v1, %v2099_v63  ;;  %v4067_v47 = vadd.f32 %v4066_v25, %v4065_v58 }
 0x2a3   : > { %v4146_v40 = vpop.f32.mrb[129].mxu1 }
 0x2a4   : > { %v4147_v21 = vadd.f32 %v4146_v40, %v4145_v6  ;;  %v2314_v15 = vadd.f32 %v4067_v47, %v6061_v50  ;;  %v4068_v4 = vpop.f32.mrb[130].mxu0 }
 0x2a5   : > { %v4069_v2 = vpop.f32.mrb[131].mxu0 }
 0x2a6   : > { %v4148_v10 = vpop.f32.mrb[130].mxu1  ;;  %v6109_v11 = vadd.f32 %v4147_v21, %v2314_v15  ;;  %v4070_v62 = vadd.f32 %v4069_v2, %v4068_v4 }
 0x2a7   : > { %v4149_v16 = vpop.f32.mrb[131].mxu1 }
 0x2a8   : > { %v4150_v24 = vadd.f32 %v4149_v16, %v4148_v10  ;;  %v2319_v26 = vadd.f32 %v4070_v62, %v6064_v37  ;;  %v4071_v14 = vpop.f32.mrb[132].mxu0 }
 0x2a9   : > { %v4072_v38 = vpop.f32.mrb[133].mxu0 }
 0x2aa   : > { %v4151_v9 = vpop.f32.mrb[132].mxu1  ;;  %v6112_v18 = vadd.f32 %v4150_v24, %v2319_v26  ;;  %v4073_v39 = vadd.f32 %v4072_v38, %v4071_v14 }
 0x2ab   : > { %v4152_v19 = vpop.f32.mrb[133].mxu1 }
 0x2ac   : > { %v4153_v22 = vadd.f32 %v4152_v19, %v4151_v9  ;;  %v2324_v50 = vadd.f32 %v4073_v39, %v6067_v33  ;;  %v4074_v23 = vpop.f32.mrb[134].mxu0 }
 0x2ad   : > { %v4075_v51 = vpop.f32.mrb[135].mxu0 }
 0x2ae   : > { %v4154_v44 = vpop.f32.mrb[134].mxu1  ;;  %v6115_v36 = vadd.f32 %v4153_v22, %v2324_v50  ;;  %v4076_v53 = vadd.f32 %v4075_v51, %v4074_v23 }
 0x2af   : > { %v4155_v29 = vpop.f32.mrb[135].mxu1 }
 0x2b0   : > { %v4156_v43 = vadd.f32 %v4155_v29, %v4154_v44  ;;  %v2329_v37 = vadd.f32 %v4076_v53, %v6070_v20  ;;  %v4077_v34 = vpop.f32.mrb[136].mxu0 }
 0x2b1   : > { %v4078_v3 = vpop.f32.mrb[137].mxu0 }
 0x2b2   : > { %v4157_v27 = vpop.f32.mrb[136].mxu1  ;;  %v6118_v61 = vadd.f32 %v4156_v43, %v2329_v37  ;;  %v4079_v41 = vadd.f32 %v4078_v3, %v4077_v34 }
 0x2b3   : > { %v4158_v42 = vpop.f32.mrb[137].mxu1 }
 0x2b4   : > { %v4159_v8 = vadd.f32 %v4158_v42, %v4157_v27  ;;  %v2334_v33 = vadd.f32 %v4079_v41, %v6073_v31  ;;  %v4080_v45 = vpop.f32.mrb[138].mxu0 }
 0x2b5   : > { %v4081_v17 = vpop.f32.mrb[139].mxu0 }
 0x2b6   : > { %v4160_v13 = vpop.f32.mrb[138].mxu1  ;;  %v6121_v56 = vadd.f32 %v4159_v8, %v2334_v33  ;;  %v4082_v28 = vadd.f32 %v4081_v17, %v4080_v45 }
 0x2b7   : > { %v4161_v48 = vpop.f32.mrb[139].mxu1 }
 0x2b8   : > { %v4162_v49 = vadd.f32 %v4161_v48, %v4160_v13  ;;  %v2339_v20 = vadd.f32 %v4082_v28, %v6076_v0  ;;  %v4083_v54 = vpop.f32.mrb[140].mxu0 }
 0x2b9   : > { %v4084_v32 = vpop.f32.mrb[141].mxu0 }
 0x2ba   : > { %v4163_v55 = vpop.f32.mrb[140].mxu1  ;;  %v6124_v1 = vadd.f32 %v4162_v49, %v2339_v20  ;;  %v4085_v63 = vadd.f32 %v4084_v32, %v4083_v54 }
 0x2bb   : > { %v4164_v58 = vpop.f32.mrb[141].mxu1 }
 0x2bc   : > { %v4165_v25 = vadd.f32 %v4164_v58, %v4163_v55  ;;  %v2344_v31 = vadd.f32 %v4085_v63, %v6079_v57  ;;  %v4086_v6 = vpop.f32.mrb[142].mxu0 }
 0x2bd   : > { %v4087_v47 = vpop.f32.mrb[143].mxu0 }
 0x2be   : > { %v4166_v40 = vpop.f32.mrb[142].mxu1  ;;  %v6127_v21 = vadd.f32 %v4165_v25, %v2344_v31  ;;  %v4088_v15 = vadd.f32 %v4087_v47, %v4086_v6 }
 0x2bf   : > { %v4167_v4 = vpop.f32.mrb[143].mxu1 }
 0x2c0   : > { %v4168_v2 = vadd.f32 %v4167_v4, %v4166_v40  ;;  %v2349_v0 = vadd.f32 %v4088_v15, %v6082_v60  ;;  %v4089_v10 = vpop.f32.mrb[144].mxu0 }
 0x2c1   : > { %v4090_v62 = vpop.f32.mrb[145].mxu0 }
 0x2c2   : > { %v4169_v16 = vpop.f32.mrb[144].mxu1  ;;  %v6130_v24 = vadd.f32 %v4168_v2, %v2349_v0  ;;  %v4091_v26 = vadd.f32 %v4090_v62, %v4089_v10 }
 0x2c3   : > { %v4170_v14 = vpop.f32.mrb[145].mxu1 }
 0x2c4   : > { %v4171_v38 = vadd.f32 %v4170_v14, %v4169_v16  ;;  %v2354_v57 = vadd.f32 %v4091_v26, %v6085_v59  ;;  %v4092_v9 = vpop.f32.mrb[146].mxu0 }
 0x2c5   : > { %v4093_v39 = vpop.f32.mrb[147].mxu0 }
 0x2c6   : > { %v4172_v19 = vpop.f32.mrb[146].mxu1  ;;  %v6133_v22 = vadd.f32 %v4171_v38, %v2354_v57  ;;  %v4094_v50 = vadd.f32 %v4093_v39, %v4092_v9 }
 0x2c7   : > { %v4173_v23 = vpop.f32.mrb[147].mxu1 }
 0x2c8   : > { %v4174_v51 = vadd.f32 %v4173_v23, %v4172_v19  ;;  %v2359_v60 = vadd.f32 %v4094_v50, %v6088_v5  ;;  %v4095_v44 = vpop.f32.mrb[148].mxu0 }
 0x2c9   : > { %v4096_v53 = vpop.f32.mrb[149].mxu0 }
 0x2ca   : > { %v4175_v29 = vpop.f32.mrb[148].mxu1  ;;  %v6136_v43 = vadd.f32 %v4174_v51, %v2359_v60  ;;  %v4097_v37 = vadd.f32 %v4096_v53, %v4095_v44 }
 0x2cb   : > { %v4176_v34 = vpop.f32.mrb[149].mxu1 }
 0x2cc   : > { %v4177_v3 = vadd.f32 %v4176_v34, %v4175_v29  ;;  %v2364_v59 = vadd.f32 %v4097_v37, %v6091_v52  ;;  %v4098_v27 = vpop.f32.mrb[150].mxu0 }
 0x2cd   : > { %v4099_v41 = vpop.f32.mrb[151].mxu0 }
 0x2ce   : > { %v4178_v42 = vpop.f32.mrb[150].mxu1  ;;  %v6139_v8 = vadd.f32 %v4177_v3, %v2364_v59  ;;  %v4100_v33 = vadd.f32 %v4099_v41, %v4098_v27 }
 0x2cf   : > { %v4179_v45 = vpop.f32.mrb[151].mxu1 }
 0x2d0   : > { %v4180_v17 = vadd.f32 %v4179_v45, %v4178_v42  ;;  %v2369_v5 = vadd.f32 %v4100_v33, %v6094_v30  ;;  %v4101_v13 = vpop.f32.mrb[152].mxu0 }
 0x2d1   : > { %v4102_v28 = vpop.f32.mrb[153].mxu0 }
 0x2d2   : > { %v4181_v48 = vpop.f32.mrb[152].mxu1  ;;  %v6142_v49 = vadd.f32 %v4180_v17, %v2369_v5  ;;  %v4103_v20 = vadd.f32 %v4102_v28, %v4101_v13 }
 0x2d3   : > { %v4182_v54 = vpop.f32.mrb[153].mxu1 }
 0x2d4   : > { %v4183_v32 = vadd.f32 %v4182_v54, %v4181_v48  ;;  %v2374_v52 = vadd.f32 %v4103_v20, %v6097_v35  ;;  %v4104_v55 = vpop.f32.mrb[154].mxu0 }
 0x2d5   : > { %v4105_v63 = vpop.f32.mrb[155].mxu0 }
 0x2d6   : > { %v4184_v58 = vpop.f32.mrb[154].mxu1  ;;  %v6145_v25 = vadd.f32 %v4183_v32, %v2374_v52  ;;  %v4106_v31 = vadd.f32 %v4105_v63, %v4104_v55 }
 0x2d7   : > { %v4185_v6 = vpop.f32.mrb[155].mxu1 }
 0x2d8   : > { %v4186_v47 = vadd.f32 %v4185_v6, %v4184_v58  ;;  %v2379_v30 = vadd.f32 %v4106_v31, %v6100_v46  ;;  %v4107_v40 = vpop.f32.mrb[156].mxu0 }
 0x2d9   : > { %v4108_v15 = vpop.f32.mrb[157].mxu0 }
 0x2da   : > { %v4187_v4 = vpop.f32.mrb[156].mxu1  ;;  %v6148_v2 = vadd.f32 %v4186_v47, %v2379_v30  ;;  %v4109_v0 = vadd.f32 %v4108_v15, %v4107_v40 }
 0x2db   : > { %v4188_v10 = vpop.f32.mrb[157].mxu1 }
 0x2dc   : > { %v4189_v62 = vadd.f32 %v4188_v10, %v4187_v4  ;;  %v2384_v35 = vadd.f32 %v4109_v0, %v6103_v7  ;;  %v4110_v16 = vpop.f32.mrb[158].mxu0 }
 0x2dd   : > { %v4111_v26 = vpop.f32.mrb[159].mxu0 }
 0x2de   : > { %v4190_v14 = vpop.f32.mrb[158].mxu1  ;;  %v6151_v38 = vadd.f32 %v4189_v62, %v2384_v35  ;;  %v4112_v57 = vadd.f32 %v4111_v26, %v4110_v16 }
 0x2df   : > { %v4191_v9 = vpop.f32.mrb[159].mxu1 }
 0x2e0   : > { %v4192_v39 = vadd.f32 %v4191_v9, %v4190_v14  ;;  %v2389_v46 = vadd.f32 %v4112_v57, %v6106_v12  ;;  %v4225_v19 = vpop.f32.mrb[160].mxu0 }
 0x2e1   : > { %v4226_v50 = vpop.f32.mrb[161].mxu0 }
 0x2e2   : > { %v4305_v23 = vpop.f32.mrb[160].mxu1  ;;  %v6154_v51 = vadd.f32 %v4192_v39, %v2389_v46  ;;  %v4227_v60 = vadd.f32 %v4226_v50, %v4225_v19 }
 0x2e3   : > { %v4306_v44 = vpop.f32.mrb[161].mxu1 }
 0x2e4   : > { %v4307_v53 = vadd.f32 %v4306_v44, %v4305_v23  ;;  %v2604_v7 = vadd.f32 %v4227_v60, %v6109_v11  ;;  %v4228_v29 = vpop.f32.mrb[162].mxu0 }
 0x2e5   : > { %v4229_v37 = vpop.f32.mrb[163].mxu0 }
 0x2e6   : > { %v4308_v34 = vpop.f32.mrb[162].mxu1  ;;  %v2749_v3 = vadd.f32 %v4307_v53, %v2604_v7  ;;  %v4230_v59 = vadd.f32 %v4229_v37, %v4228_v29 }
 0x2e7   : > { %v4309_v27 = vpop.f32.mrb[163].mxu1 }
 0x2e8   : > { %v4310_v41 = vadd.f32 %v4309_v27, %v4308_v34  ;;  %v2827_v42 = vmax.f32 %v2749_v3, 0.0  ;;  %v2609_v12 = vadd.f32 %v4230_v59, %v6112_v18  ;;  %v4231_v33 = vpop.f32.mrb[164].mxu0 }
 0x2e9   : > { %v4232_v45 = vpop.f32.mrb[165].mxu0 }
 0x2ea   : > { %v4311_v17 = vpop.f32.mrb[164].mxu1  ;;  %v2754_v5 = vadd.f32 %v4310_v41, %v2609_v12  ;;  %v4233_v13 = vadd.f32 %v4232_v45, %v4231_v33  ;;  %4417 = vmatprep.mubr.f32.mxu0 %v2827_v42 }
 0x2eb   : > { %v4312_v28 = vpop.f32.mrb[165].mxu1 }
 0x2ec   : > { %v4313_v48 = vadd.f32 %v4312_v28, %v4311_v17  ;;  %v2828_v20 = vmax.f32 %v2754_v5, 0.0  ;;  %v2614_v11 = vadd.f32 %v4233_v13, %v6115_v36  ;;  %v4234_v54 = vpop.f32.mrb[166].mxu0 }
 0x2ed   : > { %v4235_v32 = vpop.f32.mrb[167].mxu0 }
 0x2ee   : > { %v4314_v52 = vpop.f32.mrb[166].mxu1  ;;  %v2759_v55 = vadd.f32 %v4313_v48, %v2614_v11  ;;  %v4236_v63 = vadd.f32 %v4235_v32, %v4234_v54  ;;  %4418 = vmatmul.mubr.f32.vlgmr.msra.gmra.mrb[192].mxu0 %v2828_v20 }
 0x2ef   : > { %v4315_v58 = vpop.f32.mrb[167].mxu1 }
 0x2f0   : > { %v4316_v31 = vadd.f32 %v4315_v58, %v4314_v52  ;;  %v2829_v18 = vmax.f32 %v2759_v55, 0.0  ;;  %v2619_v6 = vadd.f32 %v4236_v63, %v6118_v61  ;;  %v4237_v47 = vpop.f32.mrb[168].mxu0 }
 0x2f1   : > { %v4238_v30 = vpop.f32.mrb[169].mxu0 }
 0x2f2   : > { %v4317_v40 = vpop.f32.mrb[168].mxu1  ;;  %v2764_v15 = vadd.f32 %v4316_v31, %v2619_v6  ;;  %v4239_v4 = vadd.f32 %v4238_v30, %v4237_v47  ;;  %4420 = vmatprep.mubr.f32.mxu0 %v2829_v18 }
 0x2f3   : > { %v4318_v0 = vpop.f32.mrb[169].mxu1 }
 0x2f4   : > { %v4319_v10 = vadd.f32 %v4318_v0, %v4317_v40  ;;  %v2830_v36 = vmax.f32 %v2764_v15, 0.0  ;;  %v2624_v62 = vadd.f32 %v4239_v4, %v6121_v56  ;;  %v4240_v35 = vpop.f32.mrb[170].mxu0 }
 0x2f5   : > { %v4241_v16 = vpop.f32.mrb[171].mxu0 }
 0x2f6   : > { %v4320_v26 = vpop.f32.mrb[170].mxu1  ;;  %v2769_v14 = vadd.f32 %v4319_v10, %v2624_v62  ;;  %v4242_v57 = vadd.f32 %v4241_v16, %v4240_v35  ;;  %4421 = vmatmul.mubr.f32.gmra.mrb[194].mxu0 %v2830_v36 }
 0x2f7   : > { %v4321_v9 = vpop.f32.mrb[171].mxu1 }
 0x2f8   : > { %v4322_v39 = vadd.f32 %v4321_v9, %v4320_v26  ;;  %v2831_v61 = vmax.f32 %v2769_v14, 0.0  ;;  %v2629_v46 = vadd.f32 %v4242_v57, %v6124_v1  ;;  %v4243_v19 = vpop.f32.mrb[172].mxu0 }
 0x2f9   : > { %v4244_v50 = vpop.f32.mrb[173].mxu0 }
 0x2fa   : > { %v4323_v23 = vpop.f32.mrb[172].mxu1  ;;  %v2774_v60 = vadd.f32 %v4322_v39, %v2629_v46  ;;  %v4245_v44 = vadd.f32 %v4244_v50, %v4243_v19  ;;  %4423 = vmatprep.mubr.f32.mxu0 %v2831_v61 }
 0x2fb   : > { %v4324_v53 = vpop.f32.mrb[173].mxu1 }
 0x2fc   : > { %v4325_v7 = vadd.f32 %v4324_v53, %v4323_v23  ;;  %v2832_v56 = vmax.f32 %v2774_v60, 0.0  ;;  %v2634_v29 = vadd.f32 %v4245_v44, %v6127_v21  ;;  %v4246_v37 = vpop.f32.mrb[174].mxu0 }
 0x2fd   : > { %v4247_v34 = vpop.f32.mrb[175].mxu0 }
 0x2fe   : > { %v4326_v3 = vpop.f32.mrb[174].mxu1  ;;  %v2779_v59 = vadd.f32 %v4325_v7, %v2634_v29  ;;  %v4248_v27 = vadd.f32 %v4247_v34, %v4246_v37  ;;  %4424 = vmatmul.mubr.f32.gmra.mrb[196].mxu0 %v2832_v56 }
 0x2ff   : > { %v4327_v41 = vpop.f32.mrb[175].mxu1 }
 0x300   : > { %v4328_v42 = vadd.f32 %v4327_v41, %v4326_v3  ;;  %v2833_v1 = vmax.f32 %v2779_v59, 0.0  ;;  %v2639_v12 = vadd.f32 %v4248_v27, %v6130_v24  ;;  %v4249_v33 = vpop.f32.mrb[176].mxu0 }
 0x301   : > { %v4250_v45 = vpop.f32.mrb[177].mxu0 }
 0x302   : > { %v4329_v17 = vpop.f32.mrb[176].mxu1  ;;  %v2784_v5 = vadd.f32 %v4328_v42, %v2639_v12  ;;  %v4251_v13 = vadd.f32 %v4250_v45, %v4249_v33  ;;  %4426 = vmatprep.mubr.f32.mxu0 %v2833_v1 }
 0x303   : > { %v4330_v28 = vpop.f32.mrb[177].mxu1 }
 0x304   : > { %v4331_v48 = vadd.f32 %v4330_v28, %v4329_v17  ;;  %v2834_v21 = vmax.f32 %v2784_v5, 0.0  ;;  %v2644_v20 = vadd.f32 %v4251_v13, %v6133_v22  ;;  %v4252_v11 = vpop.f32.mrb[178].mxu0 }
 0x305   : > { %v4253_v54 = vpop.f32.mrb[179].mxu0 }
 0x306   : > { %v4332_v32 = vpop.f32.mrb[178].mxu1  ;;  %v2789_v52 = vadd.f32 %v4331_v48, %v2644_v20  ;;  %v4254_v55 = vadd.f32 %v4253_v54, %v4252_v11  ;;  %4427 = vmatmul.mubr.f32.gmra.mrb[198].mxu0 %v2834_v21 }
 0x307   : > { %v4333_v63 = vpop.f32.mrb[179].mxu1 }
 0x308   : > { %v4334_v58 = vadd.f32 %v4333_v63, %v4332_v32  ;;  %v2835_v24 = vmax.f32 %v2789_v52, 0.0  ;;  %v2649_v31 = vadd.f32 %v4254_v55, %v6136_v43  ;;  %v4255_v18 = vpop.f32.mrb[180].mxu0  ;;  %v3372_v52 = vld [vmem:[#allocation9] ss:$0 sm:$0xff] }
 0x309   : > { %v4256_v6 = vpop.f32.mrb[181].mxu0 }
 0x30a   : > { %v4335_v47 = vpop.f32.mrb[180].mxu1  ;;  %v2794_v30 = vadd.f32 %v4334_v58, %v2649_v31  ;;  %v4257_v40 = vadd.f32 %v4256_v6, %v4255_v18  ;;  %4429 = vmatprep.mubr.f32.mxu1 %v2835_v24 }
 0x30b   : > { %v4336_v15 = vpop.f32.mrb[181].mxu1 }
 0x30c   : > { %v4337_v4 = vadd.f32 %v4336_v15, %v4335_v47  ;;  %v2836_v22 = vmax.f32 %v2794_v30, 0.0  ;;  %v2654_v0 = vadd.f32 %v4257_v40, %v6139_v8  ;;  %v4258_v10 = vpop.f32.mrb[182].mxu0 }
 0x30d   : > { %v4259_v36 = vpop.f32.mrb[183].mxu0 }
 0x30e   : > { %v4338_v62 = vpop.f32.mrb[182].mxu1  ;;  %v2799_v35 = vadd.f32 %v4337_v4, %v2654_v0  ;;  %v4260_v16 = vadd.f32 %v4259_v36, %v4258_v10  ;;  %4430 = vmatmul.mubr.f32.vlgmr.msra.gmra.mrb[192].mxu1 %v2836_v22 }
 0x30f   : > { %v4339_v26 = vpop.f32.mrb[183].mxu1 }
 0x310   : > { %v4340_v14 = vadd.f32 %v4339_v26, %v4338_v62  ;;  %v2837_v43 = vmax.f32 %v2799_v35, 0.0  ;;  %v2659_v57 = vadd.f32 %v4260_v16, %v6142_v49  ;;  %v4261_v9 = vpop.f32.mrb[184].mxu0 }
 0x311   : > { %v4262_v39 = vpop.f32.mrb[185].mxu0 }
 0x312   : > { %v4341_v61 = vpop.f32.mrb[184].mxu1  ;;  %v2804_v46 = vadd.f32 %v4340_v14, %v2659_v57  ;;  %v4263_v19 = vadd.f32 %v4262_v39, %v4261_v9  ;;  %4432 = vmatprep.mubr.f32.mxu1 %v2837_v43 }
 0x313   : > { %v4342_v50 = vpop.f32.mrb[185].mxu1 }
 0x314   : > { %v4343_v23 = vadd.f32 %v4342_v50, %v4341_v61  ;;  %v2838_v8 = vmax.f32 %v2804_v46, 0.0  ;;  %v2664_v60 = vadd.f32 %v4263_v19, %v6145_v25  ;;  %v4264_v44 = vpop.f32.mrb[186].mxu0 }
 0x315   : > { %v4265_v53 = vpop.f32.mrb[187].mxu0 }
 0x316   : > { %v4344_v7 = vpop.f32.mrb[186].mxu1  ;;  %v2809_v56 = vadd.f32 %v4343_v23, %v2664_v60  ;;  %v4266_v29 = vadd.f32 %v4265_v53, %v4264_v44  ;;  %4433 = vmatmul.mubr.f32.gmra.mrb[194].mxu1 %v2838_v8 }
 0x317   : > { %v4345_v37 = vpop.f32.mrb[187].mxu1 }
 0x318   : > { %v4346_v34 = vadd.f32 %v4345_v37, %v4344_v7  ;;  %v2839_v49 = vmax.f32 %v2809_v56, 0.0  ;;  %v2669_v3 = vadd.f32 %v4266_v29, %v6148_v2  ;;  %v4267_v59 = vpop.f32.mrb[188].mxu0 }
 0x319   : > { %v4268_v27 = vpop.f32.mrb[189].mxu0 }
 0x31a   : > { %v4347_v41 = vpop.f32.mrb[188].mxu1  ;;  %v2814_v42 = vadd.f32 %v4346_v34, %v2669_v3  ;;  %v4269_v1 = vadd.f32 %v4268_v27, %v4267_v59  ;;  %4435 = vmatprep.mubr.f32.mxu1 %v2839_v49 }
 0x31b   : > { %v4348_v12 = vpop.f32.mrb[189].mxu1 }
 0x31c   : > { %v4349_v33 = vadd.f32 %v4348_v12, %v4347_v41  ;;  %v2840_v25 = vmax.f32 %v2814_v42, 0.0  ;;  %v2674_v45 = vadd.f32 %v4269_v1, %v6151_v38  ;;  %v4270_v17 = vpop.f32.mrb[190].mxu0 }
 0x31d   : > { %v4271_v5 = vpop.f32.mrb[191].mxu0 }
 0x31e   : > { %v4350_v13 = vpop.f32.mrb[190].mxu1  ;;  %v2819_v28 = vadd.f32 %v4349_v33, %v2674_v45  ;;  %v4272_v48 = vadd.f32 %v4271_v5, %v4270_v17  ;;  %4436 = vmatmul.mubr.f32.gmra.mrb[196].mxu1 %v2840_v25 }
 0x31f   : > { %v4351_v21 = vpop.f32.mrb[191].mxu1 }
 0x320   : > { %v4352_v2 = vadd.f32 %v4351_v21, %v4350_v13  ;;  %v2841_v20 = vmax.f32 %v2819_v28, 0.0  ;;  %v2679_v11 = vadd.f32 %v4272_v48, %v6154_v51 }
 0x322   : > { %v2824_v54 = vadd.f32 %v4352_v2, %v2679_v11  ;;  %4438 = vmatprep.mubr.f32.mxu1 %v2841_v20 }
 0x324   : > { %v2842_v32 = vmax.f32 %v2824_v54, 0.0 }
 0x326   : > { %4439 = vmatmul.mubr.f32.gmra.mrb[198].mxu1 %v2842_v32 }
 0x3c1   : > { %v4419_v55 = vpop.f32.mrb[192].mxu0 }
 0x3c2   : > { %v2938_v63 = vadd.f32 %v4419_v55, %v3372_v52  ;;  %v2932_v38 = vpop.f32.mrb[193].mxu0 }
 0x3c3   : > { %v2933_v58 = vadd.f32 %v3372_v52, %v2932_v38 }
 0x3c4   : > { %3012 = vst [vmem:[%s6173_s30 + $0x8] sm:$0xff] %v2938_v63 }
 0x3c5   : > { %3011 = vst [vmem:[%s6173_s30] sm:$0xff] %v2933_v58 }
 0x3c9   : > { %v4422_v51 = vpop.f32.mrb[194].mxu0 }
 0x3ca   : > { %v2948_v24 = vadd.f32 %v4422_v51, %v3372_v52  ;;  %v2942_v31 = vpop.f32.mrb[195].mxu0 }
 0x3cb   : > { %v2943_v18 = vadd.f32 %v3372_v52, %v2942_v31 }
 0x3cc   : > { %3014 = vst [vmem:[%s6173_s30 + $0x18] sm:$0xff] %v2948_v24 }
 0x3cd   : > { %3013 = vst [vmem:[%s6173_s30 + $0x10] sm:$0xff] %v2943_v18 }
 0x3d1   : > { %v4425_v6 = vpop.f32.mrb[196].mxu0 }
 0x3d2   : > { %v2958_v47 = vadd.f32 %v4425_v6, %v3372_v52  ;;  %v2952_v30 = vpop.f32.mrb[197].mxu0 }
 0x3d3   : > { %v2953_v40 = vadd.f32 %v3372_v52, %v2952_v30 }
 0x3d4   : > { %3016 = vst [vmem:[%s6173_s30 + $0x28] sm:$0xff] %v2958_v47 }
 0x3d5   : > { %3015 = vst [vmem:[%s6173_s30 + $0x20] sm:$0xff] %v2953_v40 }
 0x3d9   : > { %v4428_v15 = vpop.f32.mrb[198].mxu0 }
 0x3da   : > { %v2968_v4 = vadd.f32 %v4428_v15, %v3372_v52  ;;  %v2962_v22 = vpop.f32.mrb[199].mxu0 }
 0x3db   : > { %v2963_v0 = vadd.f32 %v3372_v52, %v2962_v22 }
 0x3dc   : > { %3018 = vst [vmem:[%s6173_s30 + $0x38] sm:$0xff] %v2968_v4 }
 0x3dd   : > { %3017 = vst [vmem:[%s6173_s30 + $0x30] sm:$0xff] %v2963_v0 }
 0x3e1   : > { %v4431_v10 = vpop.f32.mrb[192].mxu1 }
 0x3e2   : > { %v2978_v36 = vadd.f32 %v4431_v10, %v3372_v52  ;;  %v2972_v62 = vpop.f32.mrb[193].mxu1 }
 0x3e3   : > { %v2973_v35 = vadd.f32 %v3372_v52, %v2972_v62 }
 0x3e4   : > { %3020 = vst [vmem:[%s6173_s30 + $0x48] sm:$0xff] %v2978_v36 }
 0x3e5   : > { %3019 = vst [vmem:[%s6173_s30 + $0x40] sm:$0xff] %v2973_v35 }
 0x3e9   : > { %v4434_v16 = vpop.f32.mrb[194].mxu1 }
 0x3ea   : > { %v2988_v26 = vadd.f32 %v4434_v16, %v3372_v52  ;;  %v2982_v14 = vpop.f32.mrb[195].mxu1 }
 0x3eb   : > { %v2983_v43 = vadd.f32 %v3372_v52, %v2982_v14 }
 0x3ec   : > { %3022 = vst [vmem:[%s6173_s30 + $0x58] sm:$0xff] %v2988_v26 }
 0x3ed   : > { %3021 = vst [vmem:[%s6173_s30 + $0x50] sm:$0xff] %v2983_v43 }
 0x3f1   : > { %v4437_v57 = vpop.f32.mrb[196].mxu1 }
 0x3f2   : > { %v2998_v9 = vadd.f32 %v4437_v57, %v3372_v52  ;;  %v2992_v39 = vpop.f32.mrb[197].mxu1 }
 0x3f3   : > { %v2993_v61 = vadd.f32 %v3372_v52, %v2992_v39 }
 0x3f4   : > { %3024 = vst [vmem:[%s6173_s30 + $0x68] sm:$0xff] %v2998_v9 }
 0x3f5   : > { %3023 = vst [vmem:[%s6173_s30 + $0x60] sm:$0xff] %v2993_v61 }
 0x3f7   : > { %3033 = sbr.rel (!%p6317_p8) target bundleno = 1071 (0x42f), region = 64 }
 0x3f9   : > { %v4440_v46 = vpop.f32.mrb[198].mxu1 }
 0x3fa   : > { %v3008_v19 = vadd.f32 %v4440_v46, %v3372_v52  ;;  %v3002_v50 = vpop.f32.mrb[199].mxu1 }
 0x3fb   : > { %v3003_v23 = vadd.f32 %v3372_v52, %v3002_v50 }
 0x3fc   : > { %3026 = vst [vmem:[%s6173_s30 + $0x78] sm:$0xff] %v3008_v19 }
 0x3fd   : > { %3025 = vst [vmem:[%s6173_s30 + $0x70] sm:$0xff] %v3003_v23 }
 0x3fe   : > { %s6329_s17 = smov (!%p3036_p5, %s3035_s17), 16 }
 0x3ff   : > { %s3375_s9 = sshll.u32 %s6329_s17, 7 }
 0x400   : > { %p3378_p10 = scmp.eq.s32.totalorder %s3375_s9, 0 }
 0x401   : > { %s6204_s29 = sshrl.u32 (!%p3378_p10), %s6329_s17, 4 }
 0x402   : > { %3044 = sbr.rel (%p3378_p10) target bundleno = 1071 (0x42f), region = 68  ;;  %p3379_p4 = scmp.le.s32.totalorder (!%p3378_p10), %s6204_s29, 0 }
 0x409   : > { %3268 = sbr.rel (%p3379_p4) target bundleno = 1050 (0x41a), region = 150  ;;  %s6318_s22 = smov (!%p3379_p4), %s6198_s21 }
 0x40a   : > { %s6319_s18 = smov (!%p3379_p4), %s6173_s30  ;;  %s6213_s11 = smov (!%p3379_p4), 0  }
 0x40b   : > { %s6215_s26 = smov (!%p3379_p4), 0  }
 0x410 LB: >> { %v3136_v8 = vld [vmem:[%s5240_s18] sm:$0xff]  ;;  %v3138_v60 = vld [vmem:[%s5240_s18 + $0x8] sm:$0xff]  ;;  %v3140_v44 = vld [vmem:[%s5240_s18 + $0x10] sm:$0xff]  ;;  %s3168_s14 = sadd.s32 1, %s5244_s11  ;;  %s3130_s26 = sadd.s32 1, %s5248_s26   ;;  %s5248_s26 = sphi %s6215_s26, %s3130_s26   ;;  %s5244_s11 = sphi %s6213_s11, %s6320_s11   ;;  %s5240_s18 = sphi %s6319_s18, %s3173_s18   ;;  %s5236_s22 = sphi %s6318_s22, %s3174_s22  }
 0x411   : >> { %3137 = vst [vmem:[%s5236_s22] sm:$0xff] %v3136_v8  ;;  %3139 = vst [vmem:[%s5236_s22 + $0x8] sm:$0xff] %v3138_v60  ;;  %v3142_v53 = vld [vmem:[%s5240_s18 + $0x18] sm:$0xff]  ;;  %v3144_v7 = vld [vmem:[%s5240_s18 + $0x20] sm:$0xff]  ;;  %p3169_p1 = scmp.ge.s32.totalorder %s3168_s14, %s6204_s29  ;;  %p3129_p11 = scmp.ge.s32.totalorder %s3130_s26, %s6204_s29 }
 0x412   : >> { %3141 = vst [vmem:[%s5236_s22 + $0x10] sm:$0xff] %v3140_v44  ;;  %v3146_v56 = vld [vmem:[%s5240_s18 + $0x28] sm:$0xff]  ;;  %3143 = vst [vmem:[%s5236_s22 + $0x18] sm:$0xff] %v3142_v53  ;;  %v3148_v29 = vld [vmem:[%s5240_s18 + $0x30] sm:$0xff] }
 0x413   : >> { %3145 = vst [vmem:[%s5236_s22 + $0x20] sm:$0xff] %v3144_v7  ;;  %3147 = vst [vmem:[%s5236_s22 + $0x28] sm:$0xff] %v3146_v56  ;;  %v3150_v37 = vld [vmem:[%s5240_s18 + $0x38] sm:$0xff]  ;;  %v3152_v34 = vld [vmem:[%s5240_s18 + $0x40] sm:$0xff]  ;;  %s6331_s14 = smov (%p3169_p1, %s3168_s14), 0  ;;  %3132 = sbr.rel (!%p3129_p11) target bundleno = 1040 (0x410), region = 156 }
 0x414   : >> { %3149 = vst [vmem:[%s5236_s22 + $0x30] sm:$0xff] %v3148_v29  ;;  %3151 = vst [vmem:[%s5236_s22 + $0x38] sm:$0xff] %v3150_v37  ;;  %v3154_v49 = vld [vmem:[%s5240_s18 + $0x48] sm:$0xff]  ;;  %v3156_v3 = vld [vmem:[%s5240_s18 + $0x50] sm:$0xff]  ;;  %s3380_s8 = sshll.u32 %s6331_s14, 7  ;;  %s6320_s11 = smov %s6331_s14 }
 0x415   : >> { %3153 = vst [vmem:[%s5236_s22 + $0x40] sm:$0xff] %v3152_v34  ;;  %v3158_v59 = vld [vmem:[%s5240_s18 + $0x58] sm:$0xff]  ;;  %3155 = vst [vmem:[%s5236_s22 + $0x48] sm:$0xff] %v3154_v49  ;;  %v3160_v27 = vld [vmem:[%s5240_s18 + $0x60] sm:$0xff] }
 0x416   : >> { %3157 = vst [vmem:[%s5236_s22 + $0x50] sm:$0xff] %v3156_v3  ;;  %3159 = vst [vmem:[%s5236_s22 + $0x58] sm:$0xff] %v3158_v59  ;;  %v3162_v41 = vld [vmem:[%s5240_s18 + $0x68] sm:$0xff]  ;;  %v3164_v42 = vld [vmem:[%s5240_s18 + $0x70] sm:$0xff] }
 0x417   : >> { %3161 = vst [vmem:[%s5236_s22 + $0x60] sm:$0xff] %v3160_v27  ;;  %3163 = vst [vmem:[%s5236_s22 + $0x68] sm:$0xff] %v3162_v41  ;;  %v3166_v1 = vld [vmem:[%s5240_s18 + $0x78] sm:$0xff]  ;;  %s3173_s18 = scalar_lea.vmem %s6173_s30, %s3380_s8 [#allocation10]  }
 0x418   : >> { %3165 = vst [vmem:[%s5236_s22 + $0x70] sm:$0xff] %v3164_v42  ;;  %3167 = vst [vmem:[%s5236_s22 + $0x78] sm:$0xff] %v3166_v1  ;;  %s3174_s22 = scalar_lea.vmem %s6198_s21, %s3380_s8  }
 0x41a PF: > { %s6273_s13 = sand.u32 15, %s6329_s17   ;;  %s3391_s27 = sshll.u32 %s6204_s29, 7 }
 0x41b   : > { %s3179_s24 = scalar_lea.vmem %s6173_s30, %s3391_s27 [#allocation10]   ;;  %s3181_s25 = scalar_lea.vmem %s6198_s21, %s3391_s27  }
 0x41c   : > { %p3385_p3 = scmp.le.s32.totalorder %s6273_s13, 0 }
 0x41d   : > { %s5250_s12 = smov (!%p3385_p3), %s3181_s25   ;;  %s5254_s7 = smov (!%p3385_p3), %s3179_s24  }
 0x41e   : > { %3282 = sbr.rel (%p3385_p3) target bundleno = 1071 (0x42f), region = 161  ;;  %s5258_s28 = smov (!%p3385_p3), 0  }
 0x41f   : > { %s5262_s15 = smov (!%p3385_p3), 0  }
 0x425 LB: >> { %v3191_v12 = vld [vmem:[%s5256_s7] sm:$0xff]  ;;  %s3193_s16 = sadd.s32 1, %s5260_s28  ;;  %s3185_s15 = sadd.s32 1, %s5264_s15   ;;  %s5264_s15 = sphi %s5262_s15, %s3185_s15   ;;  %s5260_s28 = sphi %s5258_s28, %s5259_s28   ;;  %s5256_s7 = sphi %s5254_s7, %s3198_s7   ;;  %s5252_s12 = sphi %s5250_s12, %s3199_s12  }
 0x426   : >> { %3192 = vst [vmem:[%s5252_s12] sm:$0xff] %v3191_v12  ;;  %p3194_p7 = scmp.ge.s32.totalorder %s3193_s16, %s6273_s13  ;;  %p3184_p6 = scmp.ge.s32.totalorder %s3185_s15, %s6273_s13 }
 0x428   : >> { %s6333_s16 = smov (%p3194_p7, %s3193_s16), 0  ;;  %3187 = sbr.rel (!%p3184_p6) target bundleno = 1061 (0x425), region = 167 }
 0x429   : >> { %s3386_s30 = sshll.u32 %s6333_s16, 3  ;;  %s5259_s28 = smov %s6333_s16  }
 0x42a   : >> { %s3198_s7 = scalar_lea.vmem %s3179_s24, %s3386_s30 [#allocation10]   ;;  %s3199_s12 = scalar_lea.vmem %s3181_s25, %s3386_s30  }
 0x42f PF: > { %s6321_s17 = sld [smem:[#allocation14_spill]]  ;;  %p17_p9 = scmp.ge.s32.totalorder %s5327_s23, 4  }
 0x430   : > { %s6322_s18 = smov %s5224_s19  ;;  %s6323_s19 = smov %s5228_s20 }
 0x431   : > { %s6325_s21 = smov %s5327_s23  ;;  %19 = sbr.rel (!%p17_p9) target bundleno = 5 (0x5), region = 178 }
 0x435   : > { %s6324_s20 = smov %s6321_s17 }
 0x438   :  { %3215 = vsyncpa [#allocation3], 1 }
 0x439   :  { %3217 = vsyncpa [#allocation3 + $0x1], 1 }
 0x43a   :  { %3218 = vsyncpa [#allocation5], 1 }
 0x43b   :  { %3219 = vsyncpa [#allocation8], 1 }

</bundles_post_ra>
